<compile_context>
chip_gen: v7x
topology: tpu7x:2x2x1
jax: 0.10.0
libtpu: 0.0.40
codegen_flags: <defaults>
</compile_context>

<pallas_src>
import functools

import jax
import jax.numpy as jnp
from jax import lax
from jax.experimental import pallas as pl
from jax.experimental.pallas import tpu as pltpu

EPS = 1e-5
LANES = 128


def _round_up(v, m):
    return (v + m - 1) // m * m


def _bn_scale_shift(s_ref, g_ref, b_ref, count):
    """Finalize BN scale/shift from accumulated (sum, sum-of-squares)."""
    inv_n = 1.0 / count
    mean = s_ref[0:1, :] * inv_n
    var = jnp.maximum(s_ref[1:2, :] * inv_n - mean * mean, 0.0)
    inv_std = lax.rsqrt(var + EPS)
    scale = g_ref[...] * inv_std
    shift = b_ref[...] - mean * scale
    return scale, shift


def bottleneck_kernel(x_ref, w1_ref, g1_ref, b1_ref,
                      w2_ref, g2_ref, b2_ref,
                      w3_ref, g3_ref, b3_ref,
                      out_ref,
                      a1_ref, a2_ref, a3_ref,
                      s1_ref, s2_ref, s3_ref,
                      ss1_ref, ss2_ref, ss3_ref,
                      *, N, H, W, TH, Cp, Pp):
    phase = pl.program_id(0)
    n = pl.program_id(1)
    t = pl.program_id(2)
    first = jnp.logical_and(n == 0, t == 0)
    count = float(N * H * W)        # elements per channel for batch stats
    R = TH * W                      # flattened pixels in one row tile
    r0 = t * TH                     # first image row of this tile

    # ---------------- phase 0: conv1 (1x1) + bn1 stats ----------------
    @pl.when(phase == 0)
    def _phase0():
        @pl.when(first)
        def _():
            s1_ref[...] = jnp.zeros_like(s1_ref)

        @pl.when(t == 0)
        def _():
            # Defensive: the row halo is masked again after bn+relu in phase 1,
            # but zero it at first touch so uninitialized bits are never read.
            zrow = jnp.zeros((1, 1, W, Pp), a1_ref.dtype)
            a1_ref[pl.ds(n, 1), pl.ds(0, 1), :, :] = zrow
            a1_ref[pl.ds(n, 1), pl.ds(H + 1, 1), :, :] = zrow

        xb = x_ref[...].reshape(R, Cp).astype(jnp.bfloat16)
        t1 = jnp.dot(xb, w1_ref[...], preferred_element_type=jnp.float32)
        s1_ref[0:1, :] += jnp.sum(t1, axis=0, keepdims=True)
        s1_ref[1:2, :] += jnp.sum(t1 * t1, axis=0, keepdims=True)
        # Full-width, sublane-aligned bf16 store into the row-halo buffer.
        a1_ref[pl.ds(n, 1), pl.ds(1 + r0, TH), :, :] = (
            t1.reshape(1, TH, W, Pp).astype(a1_ref.dtype))

    # ---- phase 1: bn1+relu on the fly, conv2 (3x3 im2col) + bn2 stats ----
    @pl.when(phase == 1)
    def _phase1():
        @pl.when(first)
        def _():
            s2_ref[...] = jnp.zeros_like(s2_ref)
            sc, sh = _bn_scale_shift(s1_ref, g1_ref, b1_ref, count)
            ss1_ref[0:1, :] = sc
            ss1_ref[1:2, :] = sh

        scale1 = ss1_ref[0:1, :]
        shift1 = ss1_ref[1:2, :]
        # Tile rows plus one halo row on each side (padded row coordinates).
        raw = a1_ref[pl.ds(n, 1), pl.ds(r0, TH + 2), :, :].reshape(
            TH + 2, W, Pp).astype(jnp.float32)
        a1n = jnp.maximum(raw * scale1 + shift1, 0.0)
        # Conv padding must be zero in the *normalized* space: mask the rows
        # corresponding to image rows -1 / H (cheap (TH+2, 1, 1) row mask).
        prow = lax.broadcasted_iota(jnp.int32, (TH + 2, 1, 1), 0) + r0
        row_ok = jnp.logical_and(prow >= 1, prow <= H)
        a1n = jnp.where(row_ok, a1n, 0.0)
        # Zero W-halo columns, introduced post-normalization.
        zc = jnp.zeros((TH + 2, 1, Pp), jnp.float32)
        a1w = jnp.concatenate([zc, a1n, zc], axis=1).astype(jnp.bfloat16)

        # im2col: one (R, 9*Pp) @ (9*Pp, Pp) MXU matmul.
        # TODO(synk): benchmark against 9 accumulated (R,Pp)@(Pp,Pp) dots if
        # patch materialization saturates the ld/st or VALU slots first.
        cols = [a1w[dh:dh + TH, dw:dw + W, :].reshape(R, Pp)
                for dh in range(3) for dw in range(3)]
        patch = jnp.concatenate(cols, axis=-1)
        t2 = jnp.dot(patch, w2_ref[...], preferred_element_type=jnp.float32)

        s2_ref[0:1, :] += jnp.sum(t2, axis=0, keepdims=True)
        s2_ref[1:2, :] += jnp.sum(t2 * t2, axis=0, keepdims=True)
        a2_ref[pl.ds(n, 1), pl.ds(r0, TH), :, :] = (
            t2.reshape(1, TH, W, Pp).astype(a2_ref.dtype))

    # -------- phase 2: bn2 + relu, conv3 (1x1) + bn3 stats --------
    @pl.when(phase == 2)
    def _phase2():
        @pl.when(first)
        def _():
            s3_ref[...] = jnp.zeros_like(s3_ref)
            sc, sh = _bn_scale_shift(s2_ref, g2_ref, b2_ref, count)
            ss2_ref[0:1, :] = sc
            ss2_ref[1:2, :] = sh

        a2 = a2_ref[pl.ds(n, 1), pl.ds(r0, TH), :, :].reshape(
            R, Pp).astype(jnp.float32)
        a2n = jnp.maximum(a2 * ss2_ref[0:1, :] + ss2_ref[1:2, :], 0.0
                          ).astype(jnp.bfloat16)
        t3 = jnp.dot(a2n, w3_ref[...], preferred_element_type=jnp.float32)
        s3_ref[0:1, :] += jnp.sum(t3, axis=0, keepdims=True)
        s3_ref[1:2, :] += jnp.sum(t3 * t3, axis=0, keepdims=True)
        a3_ref[pl.ds(n, 1), pl.ds(r0, TH), :, :] = (
            t3.reshape(1, TH, W, Cp).astype(a3_ref.dtype))

    # -------- phase 3: bn3 + residual add + relu -> out --------
    @pl.when(phase == 3)
    def _phase3():
        @pl.when(first)
        def _():
            sc, sh = _bn_scale_shift(s3_ref, g3_ref, b3_ref, count)
            ss3_ref[0:1, :] = sc
            ss3_ref[1:2, :] = sh

        a3 = a3_ref[pl.ds(n, 1), pl.ds(r0, TH), :, :].reshape(
            R, Cp).astype(jnp.float32)
        ident = x_ref[...].reshape(R, Cp).astype(jnp.float32)
        y = jnp.maximum(a3 * ss3_ref[0:1, :] + ss3_ref[1:2, :] + ident, 0.0)
        out_ref[...] = y.reshape(1, TH, W, Cp).astype(out_ref.dtype)


def _pick_tile_h(H, W, target_rows=512):
    """Largest divisor of H with tile_h * W <= target_rows (MXU M-dim fill)."""
    best = 1
    for th in range(1, H + 1):
        if H % th == 0 and th * W <= target_rows:
            best = th
    return best


def _vmem_limit_bytes():
    """Per-generation scoped VMEM limit with ~15% headroom."""
    try:
        cap = int(pltpu.get_tpu_info().vmem_capacity_bytes)
    except Exception:
        cap = 64 * 1024 * 1024
    return int(cap * 0.85)


def bottleneck_pallas(x_nhwc, params, *, tile_h=None):
    N, H, W, Cin = x_nhwc.shape
    P = params["w1"].shape[1]
    Cout = params["w3"].shape[1]
    assert Cin == Cout, "identity residual requires inplanes == planes * 4"
    if tile_h is None:
        tile_h = _pick_tile_h(H, W)
    assert H % tile_h == 0, "tile_h must divide H"

    # Lane-dense channel padding (multiples of 128). Padded channels stay
    # exactly zero through every stage (zero-padded weights, gamma=1, beta=0).
    Cp = _round_up(max(Cin, Cout), LANES)
    Pp = _round_up(P, LANES)

    xp = jnp.pad(x_nhwc, ((0, 0), (0, 0), (0, 0), (0, Cp - Cin)))

    def pad2(a, r, c):
        return jnp.pad(a, ((0, r - a.shape[0]), (0, c - a.shape[1])))

    w1 = pad2(params["w1"], Cp, Pp).astype(jnp.bfloat16)
    w2 = jnp.pad(params["w2"], ((0, 0), (0, 0), (0, Pp - P), (0, Pp - P)))
    w2 = w2.reshape(9 * Pp, Pp).astype(jnp.bfloat16)       # rows = (dh, dw, ci)
    w3 = pad2(params["w3"], Pp, Cp).astype(jnp.bfloat16)

    def pad_bn(g, b, c):
        g = jnp.pad(g, ((0, 0), (0, c - g.shape[1])), constant_values=1.0)
        b = jnp.pad(b, ((0, 0), (0, c - b.shape[1])))
        return g.astype(jnp.float32), b.astype(jnp.float32)

    g1, b1 = pad_bn(params["g1"], params["b1"], Pp)
    g2, b2 = pad_bn(params["g2"], params["b2"], Pp)
    g3, b3 = pad_bn(params["g3"], params["b3"], Cp)

    T = H // tile_h
    grid = (4, N, T)   # (phase, batch, row-tile); phase is the slowest axis

    def x_index(p, n, t):
        # x is only needed in phases 0 (conv1) and 3 (residual). During 1-2
        # keep the block index parked at the last phase-0 block so no
        # redundant HBM reads are issued at the phase transition.
        use = jnp.logical_or(p == 0, p == 3)
        return (jnp.where(use, n, N - 1), jnp.where(use, t, T - 1), 0, 0)

    def out_index(p, n, t):
        use = (p == 3).astype(jnp.int32)
        return (n * use, t * use, 0, 0)

    kernel = functools.partial(
        bottleneck_kernel, N=N, H=H, W=W, TH=tile_h, Cp=Cp, Pp=Pp)

    scratch_shapes = [
        pltpu.VMEM((N, H + 2, W, Pp), jnp.bfloat16),  # raw conv1 (row halo)
        pltpu.VMEM((N, H, W, Pp), jnp.bfloat16),      # raw conv2
        pltpu.VMEM((N, H, W, Cp), jnp.bfloat16),      # raw conv3
        pltpu.VMEM((2, Pp), jnp.float32),             # bn1 sum / sumsq
        pltpu.VMEM((2, Pp), jnp.float32),             # bn2 sum / sumsq
        pltpu.VMEM((2, Cp), jnp.float32),             # bn3 sum / sumsq
        pltpu.VMEM((2, Pp), jnp.float32),             # bn1 scale / shift
        pltpu.VMEM((2, Pp), jnp.float32),             # bn2 scale / shift
        pltpu.VMEM((2, Cp), jnp.float32),             # bn3 scale / shift
    ]

    out_shape = jax.ShapeDtypeStruct((N, H, W, Cp), x_nhwc.dtype)
    x_spec = pl.BlockSpec((1, tile_h, W, Cp), x_index)
    out_spec = pl.BlockSpec((1, tile_h, W, Cp), out_index)
    compiler_params = pltpu.CompilerParams(
        # BN statistics couple every (n, t) step through shared VMEM scratch,
        # so all grid axes must stay sequential ("arbitrary").
        dimension_semantics=("arbitrary", "arbitrary", "arbitrary"),
        vmem_limit_bytes=_vmem_limit_bytes())

    def launch(single_buffer_consts):
        pm = pl.Buffered(1) if single_buffer_consts else None

        def whole(shape):
            nd = len(shape)
            idx = lambda p, n, t, _nd=nd: (0,) * _nd
            if pm is None:
                return pl.BlockSpec(shape, idx)
            return pl.BlockSpec(shape, idx, pipeline_mode=pm)

        return pl.pallas_call(
            kernel,
            out_shape=out_shape,
            grid_spec=pltpu.PrefetchScalarGridSpec(
                num_scalar_prefetch=0,
                grid=grid,
                in_specs=[
                    x_spec,
                    whole(w1.shape), whole(g1.shape), whole(b1.shape),
                    whole(w2.shape), whole(g2.shape), whole(b2.shape),
                    whole(w3.shape), whole(g3.shape), whole(b3.shape),
                ],
                out_specs=out_spec,
                scratch_shapes=scratch_shapes,
            ),
            compiler_params=compiler_params,
        )(xp, w1, g1, b1, w2, g2, b2, w3, g3, b3)

    try:
        # Constant-index operands never change block index -> one buffer each.
        out = launch(single_buffer_consts=True)
    except Exception:
        # Fallback: default double-buffered pipelining of constant operands.
        out = launch(single_buffer_consts=False)
    return out[..., :Cout]


def bottleneck_ref(x_nhwc, params):
    """Pure-JAX reference mirroring the PyTorch forward (bf16 matmul inputs,
    f32 accumulation/BN, matching the kernel's precision policy)."""
    bf = jnp.bfloat16

    def bn(y, g, b):
        m = jnp.mean(y, axis=(0, 1, 2), keepdims=True)
        v = jnp.mean((y - m) ** 2, axis=(0, 1, 2), keepdims=True)
        return (y - m) * lax.rsqrt(v + EPS) * g + b

    t1 = jnp.einsum('nhwc,co->nhwo', x_nhwc.astype(bf), params["w1"].astype(bf),
                    preferred_element_type=jnp.float32)
    t1 = jnp.maximum(bn(t1, params["g1"], params["b1"]), 0.0)
    t2 = lax.conv_general_dilated(
        t1.astype(bf), params["w2"].astype(bf), window_strides=(1, 1),
        padding='SAME', dimension_numbers=('NHWC', 'HWIO', 'NHWC'),
        preferred_element_type=jnp.float32)
    t2 = jnp.maximum(bn(t2, params["g2"], params["b2"]), 0.0)
    t3 = jnp.einsum('nhwc,co->nhwo', t2.astype(bf), params["w3"].astype(bf),
                    preferred_element_type=jnp.float32)
    t3 = bn(t3, params["g3"], params["b3"])
    return jnp.maximum(t3 + x_nhwc, 0.0)


def make_params(key, inplanes, planes):
    expansion = 4
    outplanes = planes * expansion
    assert inplanes == outplanes, "downsample=None requires inplanes == planes*4"
    ks = jax.random.split(key, 9)
    return {
        # conv weights in matmul/HWIO layout: (Cin, Cout) / (3, 3, Cin, Cout)
        "w1": 0.1 * jax.random.normal(ks[0], (inplanes, planes), jnp.float32),
        "w2": 0.1 * jax.random.normal(ks[1], (3, 3, planes, planes), jnp.float32),
        "w3": 0.1 * jax.random.normal(ks[2], (planes, outplanes), jnp.float32),
        # BatchNorm affine params, (1, C) for broadcasting
        "g1": 1.0 + 0.1 * jax.random.normal(ks[3], (1, planes), jnp.float32),
        "b1": 0.1 * jax.random.normal(ks[4], (1, planes), jnp.float32),
        "g2": 1.0 + 0.1 * jax.random.normal(ks[5], (1, planes), jnp.float32),
        "b2": 0.1 * jax.random.normal(ks[6], (1, planes), jnp.float32),
        "g3": 1.0 + 0.1 * jax.random.normal(ks[7], (1, outplanes), jnp.float32),
        "b3": 0.1 * jax.random.normal(ks[8], (1, outplanes), jnp.float32),
    }


if __name__ == "__main__":
    key = jax.random.PRNGKey(0)
    k_x, k_p = jax.random.split(key)

    # Small shapes consistent with the module: planes=4 => inplanes=16 (NCHW).
    N, planes, H, W = 2, 4, 8, 8
    inplanes = planes * 4
    x_nchw = jax.random.normal(k_x, (N, inplanes, H, W), jnp.float32)
    params = make_params(k_p, inplanes, planes)

    # NCHW (PyTorch) -> NHWC (kernel layout)
    x_nhwc = jnp.transpose(x_nchw, (0, 2, 3, 1))

    out_nhwc = jax.block_until_ready(bottleneck_pallas(x_nhwc, params))

    # Verify against the pure-JAX reference of the PyTorch forward.
    ref_nhwc = bottleneck_ref(x_nhwc, params)
    assert out_nhwc.shape == (N, H, W, inplanes)
    max_err = float(jnp.max(jnp.abs(out_nhwc - ref_nhwc)))
    assert jnp.allclose(out_nhwc, ref_nhwc, rtol=3e-2, atol=3e-2), max_err

    # NHWC -> NCHW to match the PyTorch output convention.
    out_nchw = jnp.transpose(out_nhwc, (0, 3, 1, 2))
    jax.block_until_ready(out_nchw)
    print("KERNEL_OK")
</pallas_src>

<mosaic_0001>
module attributes {stable_mosaic.version = 11 : i64} {
  func.func @bottleneck_kernel(%arg0: i32, %arg1: i32, %arg2: i32, %arg3: memref<1x8x8x128xf32, #tpu.memory_space<vmem>>, %arg4: memref<128x128xbf16, #tpu.memory_space<vmem>>, %arg5: memref<1x128xf32, #tpu.memory_space<vmem>>, %arg6: memref<1x128xf32, #tpu.memory_space<vmem>>, %arg7: memref<1152x128xbf16, #tpu.memory_space<vmem>>, %arg8: memref<1x128xf32, #tpu.memory_space<vmem>>, %arg9: memref<1x128xf32, #tpu.memory_space<vmem>>, %arg10: memref<128x128xbf16, #tpu.memory_space<vmem>>, %arg11: memref<1x128xf32, #tpu.memory_space<vmem>>, %arg12: memref<1x128xf32, #tpu.memory_space<vmem>>, %arg13: memref<1x8x8x128xf32, #tpu.memory_space<vmem>>, %arg14: memref<2x10x8x128xbf16, #tpu.memory_space<vmem>>, %arg15: memref<2x8x8x128xbf16, #tpu.memory_space<vmem>>, %arg16: memref<2x8x8x128xbf16, #tpu.memory_space<vmem>>, %arg17: memref<2x128xf32, #tpu.memory_space<vmem>>, %arg18: memref<2x128xf32, #tpu.memory_space<vmem>>, %arg19: memref<2x128xf32, #tpu.memory_space<vmem>>, %arg20: memref<2x128xf32, #tpu.memory_space<vmem>>, %arg21: memref<2x128xf32, #tpu.memory_space<vmem>>, %arg22: memref<2x128xf32, #tpu.memory_space<vmem>>) attributes {dimension_semantics = [#tpu.dimension_semantics<arbitrary>, #tpu.dimension_semantics<arbitrary>, #tpu.dimension_semantics<arbitrary>], iteration_bounds = array<i64: 4, 2, 1>, scalar_prefetch = 0 : i64, scratch_operands = 9 : i64, tpu.core_type = #tpu.core_type<tc>, window_params = [{transform_indices = @transform_0, window_bounds = array<i64: 1, 8, 8, 128>}, {pipeline_mode = #tpu.pipeline_mode<synchronous>, transform_indices = @transform_1, window_bounds = array<i64: 128, 128>}, {pipeline_mode = #tpu.pipeline_mode<synchronous>, transform_indices = @transform_2, window_bounds = array<i64: 1, 128>}, {pipeline_mode = #tpu.pipeline_mode<synchronous>, transform_indices = @transform_3, window_bounds = array<i64: 1, 128>}, {pipeline_mode = #tpu.pipeline_mode<synchronous>, transform_indices = @transform_4, window_bounds = array<i64: 1152, 128>}, {pipeline_mode = #tpu.pipeline_mode<synchronous>, transform_indices = @transform_5, window_bounds = array<i64: 1, 128>}, {pipeline_mode = #tpu.pipeline_mode<synchronous>, transform_indices = @transform_6, window_bounds = array<i64: 1, 128>}, {pipeline_mode = #tpu.pipeline_mode<synchronous>, transform_indices = @transform_7, window_bounds = array<i64: 128, 128>}, {pipeline_mode = #tpu.pipeline_mode<synchronous>, transform_indices = @transform_8, window_bounds = array<i64: 1, 128>}, {pipeline_mode = #tpu.pipeline_mode<synchronous>, transform_indices = @transform_9, window_bounds = array<i64: 1, 128>}, {transform_indices = @transform_10, window_bounds = array<i64: 1, 8, 8, 128>}]} {
    %c0_i32 = arith.constant 0 : i32
    %0 = arith.cmpi eq, %arg1, %c0_i32 : i32
    %c0_i32_0 = arith.constant 0 : i32
    %1 = arith.cmpi eq, %arg2, %c0_i32_0 : i32
    %2 = arith.andi %0, %1 : i1
    %c8_i32 = arith.constant 8 : i32
    %3 = arith.muli %arg2, %c8_i32 : i32
    %c0_i32_1 = arith.constant 0 : i32
    %4 = arith.cmpi eq, %arg0, %c0_i32_1 : i32
    %5 = arith.extui %4 : i1 to i32
    %c0_i32_2 = arith.constant 0 : i32
    %6 = arith.cmpi ne, %5, %c0_i32_2 : i32
    scf.if %6 {
      %16 = arith.extui %2 : i1 to i32
      %c0_i32_6 = arith.constant 0 : i32
      %17 = arith.cmpi ne, %16, %c0_i32_6 : i32
      scf.if %17 {
        %cst_26 = arith.constant 0.000000e+00 : f32
        %43 = vector.broadcast %cst_26 : f32 to vector<2x128xf32>
        %c0_27 = arith.constant 0 : index
        %c0_28 = arith.constant 0 : index
        %44 = vector.load %arg17[%c0_27, %c0_28] : memref<2x128xf32, #tpu.memory_space<vmem>>, vector<2x128xf32>
        tpu.vector_store %arg17[%c0_27, %c0_28], %43 {strides = array<i32>} : memref<2x128xf32, #tpu.memory_space<vmem>>, vector<2x128xf32>,
      } else {
      }
      %c0_i32_7 = arith.constant 0 : i32
      %18 = arith.cmpi eq, %arg2, %c0_i32_7 : i32
      %19 = arith.extui %18 : i1 to i32
      %c0_i32_8 = arith.constant 0 : i32
      %20 = arith.cmpi ne, %19, %c0_i32_8 : i32
      scf.if %20 {
        %cst_26 = arith.constant 0.000000e+00 : bf16
        %43 = vector.broadcast %cst_26 : bf16 to vector<1x1x8x128xbf16>
        %44 = arith.index_cast %arg1 : i32 to index
        %c0_27 = arith.constant 0 : index
        %c0_28 = arith.constant 0 : index
        %c0_29 = arith.constant 0 : index
        %45 = vector.load %arg14[%44, %c0_27, %c0_28, %c0_29] : memref<2x10x8x128xbf16, #tpu.memory_space<vmem>>, vector<1x1x8x128xbf16>
        tpu.vector_store %arg14[%44, %c0_27, %c0_28, %c0_29], %43 {strides = array<i32>} : memref<2x10x8x128xbf16, #tpu.memory_space<vmem>>, vector<1x1x8x128xbf16>,
        %46 = arith.index_cast %arg1 : i32 to index
        %c9 = arith.constant 9 : index
        %c0_30 = arith.constant 0 : index
        %c0_31 = arith.constant 0 : index
        %47 = vector.load %arg14[%46, %c9, %c0_30, %c0_31] : memref<2x10x8x128xbf16, #tpu.memory_space<vmem>>, vector<1x1x8x128xbf16>
        tpu.vector_store %arg14[%46, %c9, %c0_30, %c0_31], %43 {strides = array<i32>} : memref<2x10x8x128xbf16, #tpu.memory_space<vmem>>, vector<1x1x8x128xbf16>,
      } else {
      }
      %c0 = arith.constant 0 : index
      %c0_9 = arith.constant 0 : index
      %c0_10 = arith.constant 0 : index
      %c0_11 = arith.constant 0 : index
      %21 = vector.load %arg3[%c0, %c0_9, %c0_10, %c0_11] : memref<1x8x8x128xf32, #tpu.memory_space<vmem>>, vector<1x8x8x128xf32>
      %22 = vector.shape_cast %21 : vector<1x8x8x128xf32> to vector<64x128xf32>
      %23 = arith.truncf %22 : vector<64x128xf32> to vector<64x128xbf16>
      %c0_12 = arith.constant 0 : index
      %c0_13 = arith.constant 0 : index
      %24 = vector.load %arg4[%c0_12, %c0_13] : memref<128x128xbf16, #tpu.memory_space<vmem>>, vector<128x128xbf16>
      %cst = arith.constant dense<0.000000e+00> : vector<64x128xf32>
      %25 = tpu.matmul %23, %24, %cst {dimension_numbers = #tpu.dot_dimension_numbers<[1], [0], [0], [1], [0, 0, 1, 1], [], []>} : vector<64x128xbf16>, vector<128x128xbf16>, vector<64x128xf32> -> vector<64x128xf32>
      %c0_14 = arith.constant 0 : index
      %c0_15 = arith.constant 0 : index
      %26 = vector.load %arg17[%c0_14, %c0_15] : memref<2x128xf32, #tpu.memory_space<vmem>>, vector<1x128xf32>
      %cst_16 = arith.constant dense<0.000000e+00> : vector<128xf32>
      %27 = vector.multi_reduction <add>, %25, %cst_16 [0] : vector<64x128xf32> to vector<128xf32>
      %28 = vector.shape_cast %27 : vector<128xf32> to vector<1x128xf32>
      %29 = arith.addf %26, %28 : vector<1x128xf32>
      %c0_17 = arith.constant 0 : index
      %c0_18 = arith.constant 0 : index
      %30 = vector.load %arg17[%c0_17, %c0_18] : memref<2x128xf32, #tpu.memory_space<vmem>>, vector<1x128xf32>
      tpu.vector_store %arg17[%c0_17, %c0_18], %29 {strides = array<i32>} : memref<2x128xf32, #tpu.memory_space<vmem>>, vector<1x128xf32>,
      %c1 = arith.constant 1 : index
      %c0_19 = arith.constant 0 : index
      %31 = vector.load %arg17[%c1, %c0_19] : memref<2x128xf32, #tpu.memory_space<vmem>>, vector<1x128xf32>
      %32 = arith.mulf %25, %25 : vector<64x128xf32>
      %cst_20 = arith.constant dense<0.000000e+00> : vector<128xf32>
      %33 = vector.multi_reduction <add>, %32, %cst_20 [0] : vector<64x128xf32> to vector<128xf32>
      %34 = vector.shape_cast %33 : vector<128xf32> to vector<1x128xf32>
      %35 = arith.addf %31, %34 : vector<1x128xf32>
      %c1_21 = arith.constant 1 : index
      %c0_22 = arith.constant 0 : index
      %36 = vector.load %arg17[%c1_21, %c0_22] : memref<2x128xf32, #tpu.memory_space<vmem>>, vector<1x128xf32>
      tpu.vector_store %arg17[%c1_21, %c0_22], %35 {strides = array<i32>} : memref<2x128xf32, #tpu.memory_space<vmem>>, vector<1x128xf32>,
      %37 = vector.shape_cast %25 : vector<64x128xf32> to vector<1x8x8x128xf32>
      %38 = arith.truncf %37 : vector<1x8x8x128xf32> to vector<1x8x8x128xbf16>
      %c1_i32_23 = arith.constant 1 : i32
      %39 = arith.addi %c1_i32_23, %3 : i32
      %40 = arith.index_cast %arg1 : i32 to index
      %41 = arith.index_cast %39 : i32 to index
      %c0_24 = arith.constant 0 : index
      %c0_25 = arith.constant 0 : index
      %42 = vector.load %arg14[%40, %41, %c0_24, %c0_25] : memref<2x10x8x128xbf16, #tpu.memory_space<vmem>>, vector<1x8x8x128xbf16>
      tpu.vector_store %arg14[%40, %41, %c0_24, %c0_25], %38 {strides = array<i32>} : memref<2x10x8x128xbf16, #tpu.memory_space<vmem>>, vector<1x8x8x128xbf16>,
    } else {
    }
    %c1_i32 = arith.constant 1 : i32
    %7 = arith.cmpi eq, %arg0, %c1_i32 : i32
    %8 = arith.extui %7 : i1 to i32
    %c0_i32_3 = arith.constant 0 : i32
    %9 = arith.cmpi ne, %8, %c0_i32_3 : i32
    scf.if %9 {
      %16 = arith.extui %2 : i1 to i32
      %c0_i32_6 = arith.constant 0 : i32
      %17 = arith.cmpi ne, %16, %c0_i32_6 : i32
      scf.if %17 {
        %cst_30 = arith.constant 0.000000e+00 : f32
        %85 = vector.broadcast %cst_30 : f32 to vector<2x128xf32>
        %c0_31 = arith.constant 0 : index
        %c0_32 = arith.constant 0 : index
        %86 = vector.load %arg18[%c0_31, %c0_32] : memref<2x128xf32, #tpu.memory_space<vmem>>, vector<2x128xf32>
        tpu.vector_store %arg18[%c0_31, %c0_32], %85 {strides = array<i32>} : memref<2x128xf32, #tpu.memory_space<vmem>>, vector<2x128xf32>,
        %c0_33 = arith.constant 0 : index
        %c0_34 = arith.constant 0 : index
        %87 = vector.load %arg17[%c0_33, %c0_34] : memref<2x128xf32, #tpu.memory_space<vmem>>, vector<1x128xf32>
        %cst_35 = arith.constant 7.812500e-03 : f32
        %88 = vector.broadcast %cst_35 : f32 to vector<1x128xf32>
        %89 = arith.mulf %87, %88 : vector<1x128xf32>
        %c1_36 = arith.constant 1 : index
        %c0_37 = arith.constant 0 : index
        %90 = vector.load %arg17[%c1_36, %c0_37] : memref<2x128xf32, #tpu.memory_space<vmem>>, vector<1x128xf32>
        %cst_38 = arith.constant 7.812500e-03 : f32
        %91 = vector.broadcast %cst_38 : f32 to vector<1x128xf32>
        %92 = arith.mulf %90, %91 : vector<1x128xf32>
        %93 = arith.mulf %89, %89 : vector<1x128xf32>
        %94 = arith.subf %92, %93 : vector<1x128xf32>
        %cst_39 = arith.constant 0.000000e+00 : f32
        %95 = vector.broadcast %cst_39 : f32 to vector<1x128xf32>
        %96 = arith.maximumf %94, %95 : vector<1x128xf32>
        %cst_40 = arith.constant 9.99999974E-6 : f32
        %97 = vector.broadcast %cst_40 : f32 to vector<1x128xf32>
        %98 = arith.addf %96, %97 : vector<1x128xf32>
        %99 = math.rsqrt %98 : vector<1x128xf32>
        %c0_41 = arith.constant 0 : index
        %c0_42 = arith.constant 0 : index
        %100 = vector.load %arg5[%c0_41, %c0_42] : memref<1x128xf32, #tpu.memory_space<vmem>>, vector<1x128xf32>
        %101 = arith.mulf %100, %99 : vector<1x128xf32>
        %c0_43 = arith.constant 0 : index
        %c0_44 = arith.constant 0 : index
        %102 = vector.load %arg6[%c0_43, %c0_44] : memref<1x128xf32, #tpu.memory_space<vmem>>, vector<1x128xf32>
        %103 = arith.mulf %89, %101 : vector<1x128xf32>
        %104 = arith.subf %102, %103 : vector<1x128xf32>
        %c0_45 = arith.constant 0 : index
        %c0_46 = arith.constant 0 : index
        %105 = vector.load %arg20[%c0_45, %c0_46] : memref<2x128xf32, #tpu.memory_space<vmem>>, vector<1x128xf32>
        tpu.vector_store %arg20[%c0_45, %c0_46], %101 {strides = array<i32>} : memref<2x128xf32, #tpu.memory_space<vmem>>, vector<1x128xf32>,
        %c1_47 = arith.constant 1 : index
        %c0_48 = arith.constant 0 : index
        %106 = vector.load %arg20[%c1_47, %c0_48] : memref<2x128xf32, #tpu.memory_space<vmem>>, vector<1x128xf32>
        tpu.vector_store %arg20[%c1_47, %c0_48], %104 {strides = array<i32>} : memref<2x128xf32, #tpu.memory_space<vmem>>, vector<1x128xf32>,
      } else {
      }
      %c0 = arith.constant 0 : index
      %c0_7 = arith.constant 0 : index
      %18 = vector.load %arg20[%c0, %c0_7] : memref<2x128xf32, #tpu.memory_space<vmem>>, vector<1x128xf32>
      %c1 = arith.constant 1 : index
      %c0_8 = arith.constant 0 : index
      %19 = vector.load %arg20[%c1, %c0_8] : memref<2x128xf32, #tpu.memory_space<vmem>>, vector<1x128xf32>
      %20 = arith.index_cast %arg1 : i32 to index
      %21 = arith.index_cast %3 : i32 to index
      %c0_9 = arith.constant 0 : index
      %c0_10 = arith.constant 0 : index
      %22 = vector.load %arg14[%20, %21, %c0_9, %c0_10] : memref<2x10x8x128xbf16, #tpu.memory_space<vmem>>, vector<1x10x8x128xbf16>
      %23 = vector.shape_cast %22 : vector<1x10x8x128xbf16> to vector<10x8x128xbf16>
      %24 = arith.extf %23 : vector<10x8x128xbf16> to vector<10x8x128xf32>
      %25 = vector.shape_cast %18 : vector<1x128xf32> to vector<1x1x128xf32>
      %26 = vector.broadcast %25 : vector<1x1x128xf32> to vector<10x8x128xf32>
      %27 = arith.mulf %24, %26 : vector<10x8x128xf32>
      %28 = vector.shape_cast %19 : vector<1x128xf32> to vector<1x1x128xf32>
      %29 = vector.broadcast %28 : vector<1x1x128xf32> to vector<10x8x128xf32>
      %30 = arith.addf %27, %29 : vector<10x8x128xf32>
      %cst = arith.constant 0.000000e+00 : f32
      %31 = vector.broadcast %cst : f32 to vector<10x8x128xf32>
      %32 = arith.maximumf %30, %31 : vector<10x8x128xf32>
      %33 = tpu.iota {dimensions = array<i32: 0>} : vector<10x1x1xi32>
      %34 = vector.broadcast %3 : i32 to vector<10x1x1xi32>
      %35 = arith.addi %33, %34 : vector<10x1x1xi32>
      %c1_i32_11 = arith.constant 1 : i32
      %36 = vector.broadcast %c1_i32_11 : i32 to vector<10x1x1xi32>
      %37 = arith.cmpi sge, %35, %36 : vector<10x1x1xi32>
      %c8_i32_12 = arith.constant 8 : i32
      %38 = vector.broadcast %c8_i32_12 : i32 to vector<10x1x1xi32>
      %39 = arith.cmpi sle, %35, %38 : vector<10x1x1xi32>
      %40 = arith.andi %37, %39 : vector<10x1x1xi1>
      %cst_13 = arith.constant 0.000000e+00 : f32
      %41 = vector.shape_cast %40 : vector<10x1x1xi1> to vector<10x1x1xi1>
      %42 = vector.broadcast %41 : vector<10x1x1xi1> to vector<10x8x128xi1>
      %43 = vector.broadcast %cst_13 : f32 to vector<10x8x128xf32>
      %44 = arith.select %42, %32, %43 : vector<10x8x128xi1>, vector<10x8x128xf32>
      %cst_14 = arith.constant 0.000000e+00 : f32
      %45 = vector.broadcast %cst_14 : f32 to vector<10x1x128xf32>
      %46 = tpu.concatenate %45, %44, %45 in 1 : vector<10x1x128xf32>, vector<10x8x128xf32>, vector<10x1x128xf32> -> vector<10x10x128xf32>
      %47 = arith.truncf %46 : vector<10x10x128xf32> to vector<10x10x128xbf16>
      %48 = vector.extract_strided_slice %47 {offsets = [0, 0, 0], sizes = [8, 8, 128], strides = [1, 1, 1]} : vector<10x10x128xbf16> to vector<8x8x128xbf16>
      %49 = vector.shape_cast %48 : vector<8x8x128xbf16> to vector<64x128xbf16>
      %50 = vector.extract_strided_slice %47 {offsets = [0, 1, 0], sizes = [8, 8, 128], strides = [1, 1, 1]} : vector<10x10x128xbf16> to vector<8x8x128xbf16>
      %51 = vector.shape_cast %50 : vector<8x8x128xbf16> to vector<64x128xbf16>
      %52 = vector.extract_strided_slice %47 {offsets = [0, 2, 0], sizes = [8, 8, 128], strides = [1, 1, 1]} : vector<10x10x128xbf16> to vector<8x8x128xbf16>
      %53 = vector.shape_cast %52 : vector<8x8x128xbf16> to vector<64x128xbf16>
      %54 = vector.extract_strided_slice %47 {offsets = [1, 0, 0], sizes = [8, 8, 128], strides = [1, 1, 1]} : vector<10x10x128xbf16> to vector<8x8x128xbf16>
      %55 = vector.shape_cast %54 : vector<8x8x128xbf16> to vector<64x128xbf16>
      %56 = vector.extract_strided_slice %47 {offsets = [1, 1, 0], sizes = [8, 8, 128], strides = [1, 1, 1]} : vector<10x10x128xbf16> to vector<8x8x128xbf16>
      %57 = vector.shape_cast %56 : vector<8x8x128xbf16> to vector<64x128xbf16>
      %58 = vector.extract_strided_slice %47 {offsets = [1, 2, 0], sizes = [8, 8, 128], strides = [1, 1, 1]} : vector<10x10x128xbf16> to vector<8x8x128xbf16>
      %59 = vector.shape_cast %58 : vector<8x8x128xbf16> to vector<64x128xbf16>
      %60 = vector.extract_strided_slice %47 {offsets = [2, 0, 0], sizes = [8, 8, 128], strides = [1, 1, 1]} : vector<10x10x128xbf16> to vector<8x8x128xbf16>
      %61 = vector.shape_cast %60 : vector<8x8x128xbf16> to vector<64x128xbf16>
      %62 = vector.extract_strided_slice %47 {offsets = [2, 1, 0], sizes = [8, 8, 128], strides = [1, 1, 1]} : vector<10x10x128xbf16> to vector<8x8x128xbf16>
      %63 = vector.shape_cast %62 : vector<8x8x128xbf16> to vector<64x128xbf16>
      %64 = vector.extract_strided_slice %47 {offsets = [2, 2, 0], sizes = [8, 8, 128], strides = [1, 1, 1]} : vector<10x10x128xbf16> to vector<8x8x128xbf16>
      %65 = vector.shape_cast %64 : vector<8x8x128xbf16> to vector<64x128xbf16>
      %66 = tpu.concatenate %49, %51, %53, %55, %57, %59, %61, %63, %65 in 1 : vector<64x128xbf16>, vector<64x128xbf16>, vector<64x128xbf16>, vector<64x128xbf16>, vector<64x128xbf16>, vector<64x128xbf16>, vector<64x128xbf16>, vector<64x128xbf16>, vector<64x128xbf16> -> vector<64x1152xbf16>
      %c0_15 = arith.constant 0 : index
      %c0_16 = arith.constant 0 : index
      %67 = vector.load %arg7[%c0_15, %c0_16] : memref<1152x128xbf16, #tpu.memory_space<vmem>>, vector<1152x128xbf16>
      %cst_17 = arith.constant dense<0.000000e+00> : vector<64x128xf32>
      %68 = tpu.matmul %66, %67, %cst_17 {dimension_numbers = #tpu.dot_dimension_numbers<[1], [0], [0], [1], [0, 0, 1, 1], [], []>} : vector<64x1152xbf16>, vector<1152x128xbf16>, vector<64x128xf32> -> vector<64x128xf32>
      %c0_18 = arith.constant 0 : index
      %c0_19 = arith.constant 0 : index
      %69 = vector.load %arg18[%c0_18, %c0_19] : memref<2x128xf32, #tpu.memory_space<vmem>>, vector<1x128xf32>
      %cst_20 = arith.constant dense<0.000000e+00> : vector<128xf32>
      %70 = vector.multi_reduction <add>, %68, %cst_20 [0] : vector<64x128xf32> to vector<128xf32>
      %71 = vector.shape_cast %70 : vector<128xf32> to vector<1x128xf32>
      %72 = arith.addf %69, %71 : vector<1x128xf32>
      %c0_21 = arith.constant 0 : index
      %c0_22 = arith.constant 0 : index
      %73 = vector.load %arg18[%c0_21, %c0_22] : memref<2x128xf32, #tpu.memory_space<vmem>>, vector<1x128xf32>
      tpu.vector_store %arg18[%c0_21, %c0_22], %72 {strides = array<i32>} : memref<2x128xf32, #tpu.memory_space<vmem>>, vector<1x128xf32>,
      %c1_23 = arith.constant 1 : index
      %c0_24 = arith.constant 0 : index
      %74 = vector.load %arg18[%c1_23, %c0_24] : memref<2x128xf32, #tpu.memory_space<vmem>>, vector<1x128xf32>
      %75 = arith.mulf %68, %68 : vector<64x128xf32>
      %cst_25 = arith.constant dense<0.000000e+00> : vector<128xf32>
      %76 = vector.multi_reduction <add>, %75, %cst_25 [0] : vector<64x128xf32> to vector<128xf32>
      %77 = vector.shape_cast %76 : vector<128xf32> to vector<1x128xf32>
      %78 = arith.addf %74, %77 : vector<1x128xf32>
      %c1_26 = arith.constant 1 : index
      %c0_27 = arith.constant 0 : index
      %79 = vector.load %arg18[%c1_26, %c0_27] : memref<2x128xf32, #tpu.memory_space<vmem>>, vector<1x128xf32>
      tpu.vector_store %arg18[%c1_26, %c0_27], %78 {strides = array<i32>} : memref<2x128xf32, #tpu.memory_space<vmem>>, vector<1x128xf32>,
      %80 = vector.shape_cast %68 : vector<64x128xf32> to vector<1x8x8x128xf32>
      %81 = arith.truncf %80 : vector<1x8x8x128xf32> to vector<1x8x8x128xbf16>
      %82 = arith.index_cast %arg1 : i32 to index
      %83 = arith.index_cast %3 : i32 to index
      %c0_28 = arith.constant 0 : index
      %c0_29 = arith.constant 0 : index
      %84 = vector.load %arg15[%82, %83, %c0_28, %c0_29] : memref<2x8x8x128xbf16, #tpu.memory_space<vmem>>, vector<1x8x8x128xbf16>
      tpu.vector_store %arg15[%82, %83, %c0_28, %c0_29], %81 {strides = array<i32>} : memref<2x8x8x128xbf16, #tpu.memory_space<vmem>>, vector<1x8x8x128xbf16>,
    } else {
    }
    %c2_i32 = arith.constant 2 : i32
    %10 = arith.cmpi eq, %arg0, %c2_i32 : i32
    %11 = arith.extui %10 : i1 to i32
    %c0_i32_4 = arith.constant 0 : i32
    %12 = arith.cmpi ne, %11, %c0_i32_4 : i32
    scf.if %12 {
      %16 = arith.extui %2 : i1 to i32
      %c0_i32_6 = arith.constant 0 : i32
      %17 = arith.cmpi ne, %16, %c0_i32_6 : i32
      scf.if %17 {
        %cst_26 = arith.constant 0.000000e+00 : f32
        %50 = vector.broadcast %cst_26 : f32 to vector<2x128xf32>
        %c0_27 = arith.constant 0 : index
        %c0_28 = arith.constant 0 : index
        %51 = vector.load %arg19[%c0_27, %c0_28] : memref<2x128xf32, #tpu.memory_space<vmem>>, vector<2x128xf32>
        tpu.vector_store %arg19[%c0_27, %c0_28], %50 {strides = array<i32>} : memref<2x128xf32, #tpu.memory_space<vmem>>, vector<2x128xf32>,
        %c0_29 = arith.constant 0 : index
        %c0_30 = arith.constant 0 : index
        %52 = vector.load %arg18[%c0_29, %c0_30] : memref<2x128xf32, #tpu.memory_space<vmem>>, vector<1x128xf32>
        %cst_31 = arith.constant 7.812500e-03 : f32
        %53 = vector.broadcast %cst_31 : f32 to vector<1x128xf32>
        %54 = arith.mulf %52, %53 : vector<1x128xf32>
        %c1_32 = arith.constant 1 : index
        %c0_33 = arith.constant 0 : index
        %55 = vector.load %arg18[%c1_32, %c0_33] : memref<2x128xf32, #tpu.memory_space<vmem>>, vector<1x128xf32>
        %cst_34 = arith.constant 7.812500e-03 : f32
        %56 = vector.broadcast %cst_34 : f32 to vector<1x128xf32>
        %57 = arith.mulf %55, %56 : vector<1x128xf32>
        %58 = arith.mulf %54, %54 : vector<1x128xf32>
        %59 = arith.subf %57, %58 : vector<1x128xf32>
        %cst_35 = arith.constant 0.000000e+00 : f32
        %60 = vector.broadcast %cst_35 : f32 to vector<1x128xf32>
        %61 = arith.maximumf %59, %60 : vector<1x128xf32>
        %cst_36 = arith.constant 9.99999974E-6 : f32
        %62 = vector.broadcast %cst_36 : f32 to vector<1x128xf32>
        %63 = arith.addf %61, %62 : vector<1x128xf32>
        %64 = math.rsqrt %63 : vector<1x128xf32>
        %c0_37 = arith.constant 0 : index
        %c0_38 = arith.constant 0 : index
        %65 = vector.load %arg8[%c0_37, %c0_38] : memref<1x128xf32, #tpu.memory_space<vmem>>, vector<1x128xf32>
        %66 = arith.mulf %65, %64 : vector<1x128xf32>
        %c0_39 = arith.constant 0 : index
        %c0_40 = arith.constant 0 : index
        %67 = vector.load %arg9[%c0_39, %c0_40] : memref<1x128xf32, #tpu.memory_space<vmem>>, vector<1x128xf32>
        %68 = arith.mulf %54, %66 : vector<1x128xf32>
        %69 = arith.subf %67, %68 : vector<1x128xf32>
        %c0_41 = arith.constant 0 : index
        %c0_42 = arith.constant 0 : index
        %70 = vector.load %arg21[%c0_41, %c0_42] : memref<2x128xf32, #tpu.memory_space<vmem>>, vector<1x128xf32>
        tpu.vector_store %arg21[%c0_41, %c0_42], %66 {strides = array<i32>} : memref<2x128xf32, #tpu.memory_space<vmem>>, vector<1x128xf32>,
        %c1_43 = arith.constant 1 : index
        %c0_44 = arith.constant 0 : index
        %71 = vector.load %arg21[%c1_43, %c0_44] : memref<2x128xf32, #tpu.memory_space<vmem>>, vector<1x128xf32>
        tpu.vector_store %arg21[%c1_43, %c0_44], %69 {strides = array<i32>} : memref<2x128xf32, #tpu.memory_space<vmem>>, vector<1x128xf32>,
      } else {
      }
      %18 = arith.index_cast %arg1 : i32 to index
      %19 = arith.index_cast %3 : i32 to index
      %c0 = arith.constant 0 : index
      %c0_7 = arith.constant 0 : index
      %20 = vector.load %arg15[%18, %19, %c0, %c0_7] : memref<2x8x8x128xbf16, #tpu.memory_space<vmem>>, vector<1x8x8x128xbf16>
      %21 = vector.shape_cast %20 : vector<1x8x8x128xbf16> to vector<64x128xbf16>
      %22 = arith.extf %21 : vector<64x128xbf16> to vector<64x128xf32>
      %c0_8 = arith.constant 0 : index
      %c0_9 = arith.constant 0 : index
      %23 = vector.load %arg21[%c0_8, %c0_9] : memref<2x128xf32, #tpu.memory_space<vmem>>, vector<1x128xf32>
      %24 = vector.broadcast %23 : vector<1x128xf32> to vector<64x128xf32>
      %25 = arith.mulf %22, %24 : vector<64x128xf32>
      %c1 = arith.constant 1 : index
      %c0_10 = arith.constant 0 : index
      %26 = vector.load %arg21[%c1, %c0_10] : memref<2x128xf32, #tpu.memory_space<vmem>>, vector<1x128xf32>
      %27 = vector.broadcast %26 : vector<1x128xf32> to vector<64x128xf32>
      %28 = arith.addf %25, %27 : vector<64x128xf32>
      %cst = arith.constant 0.000000e+00 : f32
      %29 = vector.broadcast %cst : f32 to vector<64x128xf32>
      %30 = arith.maximumf %28, %29 : vector<64x128xf32>
      %31 = arith.truncf %30 : vector<64x128xf32> to vector<64x128xbf16>
      %c0_11 = arith.constant 0 : index
      %c0_12 = arith.constant 0 : index
      %32 = vector.load %arg10[%c0_11, %c0_12] : memref<128x128xbf16, #tpu.memory_space<vmem>>, vector<128x128xbf16>
      %cst_13 = arith.constant dense<0.000000e+00> : vector<64x128xf32>
      %33 = tpu.matmul %31, %32, %cst_13 {dimension_numbers = #tpu.dot_dimension_numbers<[1], [0], [0], [1], [0, 0, 1, 1], [], []>} : vector<64x128xbf16>, vector<128x128xbf16>, vector<64x128xf32> -> vector<64x128xf32>
      %c0_14 = arith.constant 0 : index
      %c0_15 = arith.constant 0 : index
      %34 = vector.load %arg19[%c0_14, %c0_15] : memref<2x128xf32, #tpu.memory_space<vmem>>, vector<1x128xf32>
      %cst_16 = arith.constant dense<0.000000e+00> : vector<128xf32>
      %35 = vector.multi_reduction <add>, %33, %cst_16 [0] : vector<64x128xf32> to vector<128xf32>
      %36 = vector.shape_cast %35 : vector<128xf32> to vector<1x128xf32>
      %37 = arith.addf %34, %36 : vector<1x128xf32>
      %c0_17 = arith.constant 0 : index
      %c0_18 = arith.constant 0 : index
      %38 = vector.load %arg19[%c0_17, %c0_18] : memref<2x128xf32, #tpu.memory_space<vmem>>, vector<1x128xf32>
      tpu.vector_store %arg19[%c0_17, %c0_18], %37 {strides = array<i32>} : memref<2x128xf32, #tpu.memory_space<vmem>>, vector<1x128xf32>,
      %c1_19 = arith.constant 1 : index
      %c0_20 = arith.constant 0 : index
      %39 = vector.load %arg19[%c1_19, %c0_20] : memref<2x128xf32, #tpu.memory_space<vmem>>, vector<1x128xf32>
      %40 = arith.mulf %33, %33 : vector<64x128xf32>
      %cst_21 = arith.constant dense<0.000000e+00> : vector<128xf32>
      %41 = vector.multi_reduction <add>, %40, %cst_21 [0] : vector<64x128xf32> to vector<128xf32>
      %42 = vector.shape_cast %41 : vector<128xf32> to vector<1x128xf32>
      %43 = arith.addf %39, %42 : vector<1x128xf32>
      %c1_22 = arith.constant 1 : index
      %c0_23 = arith.constant 0 : index
      %44 = vector.load %arg19[%c1_22, %c0_23] : memref<2x128xf32, #tpu.memory_space<vmem>>, vector<1x128xf32>
      tpu.vector_store %arg19[%c1_22, %c0_23], %43 {strides = array<i32>} : memref<2x128xf32, #tpu.memory_space<vmem>>, vector<1x128xf32>,
      %45 = vector.shape_cast %33 : vector<64x128xf32> to vector<1x8x8x128xf32>
      %46 = arith.truncf %45 : vector<1x8x8x128xf32> to vector<1x8x8x128xbf16>
      %47 = arith.index_cast %arg1 : i32 to index
      %48 = arith.index_cast %3 : i32 to index
      %c0_24 = arith.constant 0 : index
      %c0_25 = arith.constant 0 : index
      %49 = vector.load %arg16[%47, %48, %c0_24, %c0_25] : memref<2x8x8x128xbf16, #tpu.memory_space<vmem>>, vector<1x8x8x128xbf16>
      tpu.vector_store %arg16[%47, %48, %c0_24, %c0_25], %46 {strides = array<i32>} : memref<2x8x8x128xbf16, #tpu.memory_space<vmem>>, vector<1x8x8x128xbf16>,
    } else {
    }
    %c3_i32 = arith.constant 3 : i32
    %13 = arith.cmpi eq, %arg0, %c3_i32 : i32
    %14 = arith.extui %13 : i1 to i32
    %c0_i32_5 = arith.constant 0 : i32
    %15 = arith.cmpi ne, %14, %c0_i32_5 : i32
    scf.if %15 {
      %16 = arith.extui %2 : i1 to i32
      %c0_i32_6 = arith.constant 0 : i32
      %17 = arith.cmpi ne, %16, %c0_i32_6 : i32
      scf.if %17 {
        %c0_19 = arith.constant 0 : index
        %c0_20 = arith.constant 0 : index
        %36 = vector.load %arg19[%c0_19, %c0_20] : memref<2x128xf32, #tpu.memory_space<vmem>>, vector<1x128xf32>
        %cst_21 = arith.constant 7.812500e-03 : f32
        %37 = vector.broadcast %cst_21 : f32 to vector<1x128xf32>
        %38 = arith.mulf %36, %37 : vector<1x128xf32>
        %c1_22 = arith.constant 1 : index
        %c0_23 = arith.constant 0 : index
        %39 = vector.load %arg19[%c1_22, %c0_23] : memref<2x128xf32, #tpu.memory_space<vmem>>, vector<1x128xf32>
        %cst_24 = arith.constant 7.812500e-03 : f32
        %40 = vector.broadcast %cst_24 : f32 to vector<1x128xf32>
        %41 = arith.mulf %39, %40 : vector<1x128xf32>
        %42 = arith.mulf %38, %38 : vector<1x128xf32>
        %43 = arith.subf %41, %42 : vector<1x128xf32>
        %cst_25 = arith.constant 0.000000e+00 : f32
        %44 = vector.broadcast %cst_25 : f32 to vector<1x128xf32>
        %45 = arith.maximumf %43, %44 : vector<1x128xf32>
        %cst_26 = arith.constant 9.99999974E-6 : f32
        %46 = vector.broadcast %cst_26 : f32 to vector<1x128xf32>
        %47 = arith.addf %45, %46 : vector<1x128xf32>
        %48 = math.rsqrt %47 : vector<1x128xf32>
        %c0_27 = arith.constant 0 : index
        %c0_28 = arith.constant 0 : index
        %49 = vector.load %arg11[%c0_27, %c0_28] : memref<1x128xf32, #tpu.memory_space<vmem>>, vector<1x128xf32>
        %50 = arith.mulf %49, %48 : vector<1x128xf32>
        %c0_29 = arith.constant 0 : index
        %c0_30 = arith.constant 0 : index
        %51 = vector.load %arg12[%c0_29, %c0_30] : memref<1x128xf32, #tpu.memory_space<vmem>>, vector<1x128xf32>
        %52 = arith.mulf %38, %50 : vector<1x128xf32>
        %53 = arith.subf %51, %52 : vector<1x128xf32>
        %c0_31 = arith.constant 0 : index
        %c0_32 = arith.constant 0 : index
        %54 = vector.load %arg22[%c0_31, %c0_32] : memref<2x128xf32, #tpu.memory_space<vmem>>, vector<1x128xf32>
        tpu.vector_store %arg22[%c0_31, %c0_32], %50 {strides = array<i32>} : memref<2x128xf32, #tpu.memory_space<vmem>>, vector<1x128xf32>,
        %c1_33 = arith.constant 1 : index
        %c0_34 = arith.constant 0 : index
        %55 = vector.load %arg22[%c1_33, %c0_34] : memref<2x128xf32, #tpu.memory_space<vmem>>, vector<1x128xf32>
        tpu.vector_store %arg22[%c1_33, %c0_34], %53 {strides = array<i32>} : memref<2x128xf32, #tpu.memory_space<vmem>>, vector<1x128xf32>,
      } else {
      }
      %18 = arith.index_cast %arg1 : i32 to index
      %19 = arith.index_cast %3 : i32 to index
      %c0 = arith.constant 0 : index
      %c0_7 = arith.constant 0 : index
      %20 = vector.load %arg16[%18, %19, %c0, %c0_7] : memref<2x8x8x128xbf16, #tpu.memory_space<vmem>>, vector<1x8x8x128xbf16>
      %21 = vector.shape_cast %20 : vector<1x8x8x128xbf16> to vector<64x128xbf16>
      %22 = arith.extf %21 : vector<64x128xbf16> to vector<64x128xf32>
      %c0_8 = arith.constant 0 : index
      %c0_9 = arith.constant 0 : index
      %c0_10 = arith.constant 0 : index
      %c0_11 = arith.constant 0 : index
      %23 = vector.load %arg3[%c0_8, %c0_9, %c0_10, %c0_11] : memref<1x8x8x128xf32, #tpu.memory_space<vmem>>, vector<1x8x8x128xf32>
      %24 = vector.shape_cast %23 : vector<1x8x8x128xf32> to vector<64x128xf32>
      %c0_12 = arith.constant 0 : index
      %c0_13 = arith.constant 0 : index
      %25 = vector.load %arg22[%c0_12, %c0_13] : memref<2x128xf32, #tpu.memory_space<vmem>>, vector<1x128xf32>
      %26 = vector.broadcast %25 : vector<1x128xf32> to vector<64x128xf32>
      %27 = arith.mulf %22, %26 : vector<64x128xf32>
      %c1 = arith.constant 1 : index
      %c0_14 = arith.constant 0 : index
      %28 = vector.load %arg22[%c1, %c0_14] : memref<2x128xf32, #tpu.memory_space<vmem>>, vector<1x128xf32>
      %29 = vector.broadcast %28 : vector<1x128xf32> to vector<64x128xf32>
      %30 = arith.addf %27, %29 : vector<64x128xf32>
      %31 = arith.addf %30, %24 : vector<64x128xf32>
      %cst = arith.constant 0.000000e+00 : f32
      %32 = vector.broadcast %cst : f32 to vector<64x128xf32>
      %33 = arith.maximumf %31, %32 : vector<64x128xf32>
      %34 = vector.shape_cast %33 : vector<64x128xf32> to vector<1x8x8x128xf32>
      %c0_15 = arith.constant 0 : index
      %c0_16 = arith.constant 0 : index
      %c0_17 = arith.constant 0 : index
      %c0_18 = arith.constant 0 : index
      %35 = vector.load %arg13[%c0_15, %c0_16, %c0_17, %c0_18] : memref<1x8x8x128xf32, #tpu.memory_space<vmem>>, vector<1x8x8x128xf32>
      tpu.vector_store %arg13[%c0_15, %c0_16, %c0_17, %c0_18], %34 {strides = array<i32>} : memref<1x8x8x128xf32, #tpu.memory_space<vmem>>, vector<1x8x8x128xf32>,
    } else {
    }
    return
  }
  func.func @transform_0(%arg0: i32, %arg1: i32, %arg2: i32) -> (i32, i32, i32, i32) {
    %c0_i32 = arith.constant 0 : i32
    %0 = arith.cmpi eq, %arg0, %c0_i32 : i32
    %c3_i32 = arith.constant 3 : i32
    %1 = arith.cmpi eq, %arg0, %c3_i32 : i32
    %2 = arith.ori %0, %1 : i1
    %c1_i32 = arith.constant 1 : i32
    %3 = arith.select %2, %arg1, %c1_i32 : i32
    %c0_i32_0 = arith.constant 0 : i32
    %4 = arith.select %2, %arg2, %c0_i32_0 : i32
    %c0_i32_1 = arith.constant 0 : i32
    %c0_i32_2 = arith.constant 0 : i32
    %c0_i32_3 = arith.constant 0 : i32
    return %3, %4, %c0_i32_1, %c0_i32_2 : i32, i32, i32, i32
  }
  func.func @transform_1(%arg0: i32, %arg1: i32, %arg2: i32) -> (i32, i32) {
    %c0_i32 = arith.constant 0 : i32
    %c0_i32_0 = arith.constant 0 : i32
    %c0_i32_1 = arith.constant 0 : i32
    return %c0_i32, %c0_i32_0 : i32, i32
  }
  func.func @transform_2(%arg0: i32, %arg1: i32, %arg2: i32) -> (i32, i32) {
    %c0_i32 = arith.constant 0 : i32
    %c0_i32_0 = arith.constant 0 : i32
    %c0_i32_1 = arith.constant 0 : i32
    return %c0_i32, %c0_i32_0 : i32, i32
  }
  func.func @transform_3(%arg0: i32, %arg1: i32, %arg2: i32) -> (i32, i32) {
    %c0_i32 = arith.constant 0 : i32
    %c0_i32_0 = arith.constant 0 : i32
    %c0_i32_1 = arith.constant 0 : i32
    return %c0_i32, %c0_i32_0 : i32, i32
  }
  func.func @transform_4(%arg0: i32, %arg1: i32, %arg2: i32) -> (i32, i32) {
    %c0_i32 = arith.constant 0 : i32
    %c0_i32_0 = arith.constant 0 : i32
    %c0_i32_1 = arith.constant 0 : i32
    return %c0_i32, %c0_i32_0 : i32, i32
  }
  func.func @transform_5(%arg0: i32, %arg1: i32, %arg2: i32) -> (i32, i32) {
    %c0_i32 = arith.constant 0 : i32
    %c0_i32_0 = arith.constant 0 : i32
    %c0_i32_1 = arith.constant 0 : i32
    return %c0_i32, %c0_i32_0 : i32, i32
  }
  func.func @transform_6(%arg0: i32, %arg1: i32, %arg2: i32) -> (i32, i32) {
    %c0_i32 = arith.constant 0 : i32
    %c0_i32_0 = arith.constant 0 : i32
    %c0_i32_1 = arith.constant 0 : i32
    return %c0_i32, %c0_i32_0 : i32, i32
  }
  func.func @transform_7(%arg0: i32, %arg1: i32, %arg2: i32) -> (i32, i32) {
    %c0_i32 = arith.constant 0 : i32
    %c0_i32_0 = arith.constant 0 : i32
    %c0_i32_1 = arith.constant 0 : i32
    return %c0_i32, %c0_i32_0 : i32, i32
  }
  func.func @transform_8(%arg0: i32, %arg1: i32, %arg2: i32) -> (i32, i32) {
    %c0_i32 = arith.constant 0 : i32
    %c0_i32_0 = arith.constant 0 : i32
    %c0_i32_1 = arith.constant 0 : i32
    return %c0_i32, %c0_i32_0 : i32, i32
  }
  func.func @transform_9(%arg0: i32, %arg1: i32, %arg2: i32) -> (i32, i32) {
    %c0_i32 = arith.constant 0 : i32
    %c0_i32_0 = arith.constant 0 : i32
    %c0_i32_1 = arith.constant 0 : i32
    return %c0_i32, %c0_i32_0 : i32, i32
  }
  func.func @transform_10(%arg0: i32, %arg1: i32, %arg2: i32) -> (i32, i32, i32, i32) {
    %c3_i32 = arith.constant 3 : i32
    %0 = arith.cmpi eq, %arg0, %c3_i32 : i32
    %1 = arith.extui %0 : i1 to i32
    %2 = arith.muli %arg1, %1 : i32
    %3 = arith.muli %arg2, %1 : i32
    %c0_i32 = arith.constant 0 : i32
    %c0_i32_0 = arith.constant 0 : i32
    %c0_i32_1 = arith.constant 0 : i32
    return %2, %3, %c0_i32, %c0_i32_0 : i32, i32, i32, i32
  }
}

module attributes {stable_mosaic.version = 11 : i64} {
  func.func @bottleneck_kernel(%arg0: i32, %arg1: i32, %arg2: i32, %arg3: memref<1x8x8x128xf32, #tpu.memory_space<vmem>>, %arg4: memref<128x128xbf16, #tpu.memory_space<vmem>>, %arg5: memref<1x128xf32, #tpu.memory_space<vmem>>, %arg6: memref<1x128xf32, #tpu.memory_space<vmem>>, %arg7: memref<1152x128xbf16, #tpu.memory_space<vmem>>, %arg8: memref<1x128xf32, #tpu.memory_space<vmem>>, %arg9: memref<1x128xf32, #tpu.memory_space<vmem>>, %arg10: memref<128x128xbf16, #tpu.memory_space<vmem>>, %arg11: memref<1x128xf32, #tpu.memory_space<vmem>>, %arg12: memref<1x128xf32, #tpu.memory_space<vmem>>, %arg13: memref<1x8x8x128xf32, #tpu.memory_space<vmem>>, %arg14: memref<2x10x8x128xbf16, #tpu.memory_space<vmem>>, %arg15: memref<2x8x8x128xbf16, #tpu.memory_space<vmem>>, %arg16: memref<2x8x8x128xbf16, #tpu.memory_space<vmem>>, %arg17: memref<2x128xf32, #tpu.memory_space<vmem>>, %arg18: memref<2x128xf32, #tpu.memory_space<vmem>>, %arg19: memref<2x128xf32, #tpu.memory_space<vmem>>, %arg20: memref<2x128xf32, #tpu.memory_space<vmem>>, %arg21: memref<2x128xf32, #tpu.memory_space<vmem>>, %arg22: memref<2x128xf32, #tpu.memory_space<vmem>>) attributes {dimension_semantics = [#tpu.dimension_semantics<arbitrary>, #tpu.dimension_semantics<arbitrary>, #tpu.dimension_semantics<arbitrary>], iteration_bounds = array<i64: 4, 2, 1>, scalar_prefetch = 0 : i64, scratch_operands = 9 : i64, tpu.core_type = #tpu.core_type<tc>, window_params = [{transform_indices = @transform_0, window_bounds = array<i64: 1, 8, 8, 128>}, {pipeline_mode = #tpu.pipeline_mode<synchronous>, transform_indices = @transform_1, window_bounds = array<i64: 128, 128>}, {pipeline_mode = #tpu.pipeline_mode<synchronous>, transform_indices = @transform_2, window_bounds = array<i64: 1, 128>}, {pipeline_mode = #tpu.pipeline_mode<synchronous>, transform_indices = @transform_3, window_bounds = array<i64: 1, 128>}, {pipeline_mode = #tpu.pipeline_mode<synchronous>, transform_indices = @transform_4, window_bounds = array<i64: 1152, 128>}, {pipeline_mode = #tpu.pipeline_mode<synchronous>, transform_indices = @transform_5, window_bounds = array<i64: 1, 128>}, {pipeline_mode = #tpu.pipeline_mode<synchronous>, transform_indices = @transform_6, window_bounds = array<i64: 1, 128>}, {pipeline_mode = #tpu.pipeline_mode<synchronous>, transform_indices = @transform_7, window_bounds = array<i64: 128, 128>}, {pipeline_mode = #tpu.pipeline_mode<synchronous>, transform_indices = @transform_8, window_bounds = array<i64: 1, 128>}, {pipeline_mode = #tpu.pipeline_mode<synchronous>, transform_indices = @transform_9, window_bounds = array<i64: 1, 128>}, {transform_indices = @transform_10, window_bounds = array<i64: 1, 8, 8, 128>}]} {
    %c0_i32 = arith.constant 0 : i32
    %0 = arith.cmpi eq, %arg1, %c0_i32 : i32
    %c0_i32_0 = arith.constant 0 : i32
    %1 = arith.cmpi eq, %arg2, %c0_i32_0 : i32
    %2 = arith.andi %0, %1 : i1
    %c8_i32 = arith.constant 8 : i32
    %3 = arith.muli %arg2, %c8_i32 : i32
    %c0_i32_1 = arith.constant 0 : i32
    %4 = arith.cmpi eq, %arg0, %c0_i32_1 : i32
    %5 = arith.extui %4 : i1 to i32
    %c0_i32_2 = arith.constant 0 : i32
    %6 = arith.cmpi ne, %5, %c0_i32_2 : i32
    scf.if %6 {
      %16 = arith.extui %2 : i1 to i32
      %c0_i32_6 = arith.constant 0 : i32
      %17 = arith.cmpi ne, %16, %c0_i32_6 : i32
      scf.if %17 {
        %cst_26 = arith.constant 0.000000e+00 : f32
        %43 = vector.broadcast %cst_26 : f32 to vector<2x128xf32>
        %c0_27 = arith.constant 0 : index
        %c0_28 = arith.constant 0 : index
        %44 = vector.load %arg17[%c0_27, %c0_28] : memref<2x128xf32, #tpu.memory_space<vmem>>, vector<2x128xf32>
        tpu.vector_store %arg17[%c0_27, %c0_28], %43 {strides = array<i32>} : memref<2x128xf32, #tpu.memory_space<vmem>>, vector<2x128xf32>,
      } else {
      }
      %c0_i32_7 = arith.constant 0 : i32
      %18 = arith.cmpi eq, %arg2, %c0_i32_7 : i32
      %19 = arith.extui %18 : i1 to i32
      %c0_i32_8 = arith.constant 0 : i32
      %20 = arith.cmpi ne, %19, %c0_i32_8 : i32
      scf.if %20 {
        %cst_26 = arith.constant 0.000000e+00 : bf16
        %43 = vector.broadcast %cst_26 : bf16 to vector<1x1x8x128xbf16>
        %44 = arith.index_cast %arg1 : i32 to index
        %c0_27 = arith.constant 0 : index
        %c0_28 = arith.constant 0 : index
        %c0_29 = arith.constant 0 : index
        %45 = vector.load %arg14[%44, %c0_27, %c0_28, %c0_29] : memref<2x10x8x128xbf16, #tpu.memory_space<vmem>>, vector<1x1x8x128xbf16>
        tpu.vector_store %arg14[%44, %c0_27, %c0_28, %c0_29], %43 {strides = array<i32>} : memref<2x10x8x128xbf16, #tpu.memory_space<vmem>>, vector<1x1x8x128xbf16>,
        %46 = arith.index_cast %arg1 : i32 to index
        %c9 = arith.constant 9 : index
        %c0_30 = arith.constant 0 : index
        %c0_31 = arith.constant 0 : index
        %47 = vector.load %arg14[%46, %c9, %c0_30, %c0_31] : memref<2x10x8x128xbf16, #tpu.memory_space<vmem>>, vector<1x1x8x128xbf16>
        tpu.vector_store %arg14[%46, %c9, %c0_30, %c0_31], %43 {strides = array<i32>} : memref<2x10x8x128xbf16, #tpu.memory_space<vmem>>, vector<1x1x8x128xbf16>,
      } else {
      }
      %c0 = arith.constant 0 : index
      %c0_9 = arith.constant 0 : index
      %c0_10 = arith.constant 0 : index
      %c0_11 = arith.constant 0 : index
      %21 = vector.load %arg3[%c0, %c0_9, %c0_10, %c0_11] : memref<1x8x8x128xf32, #tpu.memory_space<vmem>>, vector<1x8x8x128xf32>
      %22 = vector.shape_cast %21 : vector<1x8x8x128xf32> to vector<64x128xf32>
      %23 = arith.truncf %22 : vector<64x128xf32> to vector<64x128xbf16>
      %c0_12 = arith.constant 0 : index
      %c0_13 = arith.constant 0 : index
      %24 = vector.load %arg4[%c0_12, %c0_13] : memref<128x128xbf16, #tpu.memory_space<vmem>>, vector<128x128xbf16>
      %cst = arith.constant dense<0.000000e+00> : vector<64x128xf32>
      %25 = tpu.matmul %23, %24, %cst {dimension_numbers = #tpu.dot_dimension_numbers<[1], [0], [0], [1], [0, 0, 1, 1], [], []>} : vector<64x128xbf16>, vector<128x128xbf16>, vector<64x128xf32> -> vector<64x128xf32>
      %c0_14 = arith.constant 0 : index
      %c0_15 = arith.constant 0 : index
      %26 = vector.load %arg17[%c0_14, %c0_15] : memref<2x128xf32, #tpu.memory_space<vmem>>, vector<1x128xf32>
      %cst_16 = arith.constant dense<0.000000e+00> : vector<128xf32>
      %27 = vector.multi_reduction <add>, %25, %cst_16 [0] : vector<64x128xf32> to vector<128xf32>
      %28 = vector.shape_cast %27 : vector<128xf32> to vector<1x128xf32>
      %29 = arith.addf %26, %28 : vector<1x128xf32>
      %c0_17 = arith.constant 0 : index
      %c0_18 = arith.constant 0 : index
      %30 = vector.load %arg17[%c0_17, %c0_18] : memref<2x128xf32, #tpu.memory_space<vmem>>, vector<1x128xf32>
      tpu.vector_store %arg17[%c0_17, %c0_18], %29 {strides = array<i32>} : memref<2x128xf32, #tpu.memory_space<vmem>>, vector<1x128xf32>,
      %c1 = arith.constant 1 : index
      %c0_19 = arith.constant 0 : index
      %31 = vector.load %arg17[%c1, %c0_19] : memref<2x128xf32, #tpu.memory_space<vmem>>, vector<1x128xf32>
      %32 = arith.mulf %25, %25 : vector<64x128xf32>
      %cst_20 = arith.constant dense<0.000000e+00> : vector<128xf32>
      %33 = vector.multi_reduction <add>, %32, %cst_20 [0] : vector<64x128xf32> to vector<128xf32>
      %34 = vector.shape_cast %33 : vector<128xf32> to vector<1x128xf32>
      %35 = arith.addf %31, %34 : vector<1x128xf32>
      %c1_21 = arith.constant 1 : index
      %c0_22 = arith.constant 0 : index
      %36 = vector.load %arg17[%c1_21, %c0_22] : memref<2x128xf32, #tpu.memory_space<vmem>>, vector<1x128xf32>
      tpu.vector_store %arg17[%c1_21, %c0_22], %35 {strides = array<i32>} : memref<2x128xf32, #tpu.memory_space<vmem>>, vector<1x128xf32>,
      %37 = vector.shape_cast %25 : vector<64x128xf32> to vector<1x8x8x128xf32>
      %38 = arith.truncf %37 : vector<1x8x8x128xf32> to vector<1x8x8x128xbf16>
      %c1_i32_23 = arith.constant 1 : i32
      %39 = arith.addi %c1_i32_23, %3 : i32
      %40 = arith.index_cast %arg1 : i32 to index
      %41 = arith.index_cast %39 : i32 to index
      %c0_24 = arith.constant 0 : index
      %c0_25 = arith.constant 0 : index
      %42 = vector.load %arg14[%40, %41, %c0_24, %c0_25] : memref<2x10x8x128xbf16, #tpu.memory_space<vmem>>, vector<1x8x8x128xbf16>
      tpu.vector_store %arg14[%40, %41, %c0_24, %c0_25], %38 {strides = array<i32>} : memref<2x10x8x128xbf16, #tpu.memory_space<vmem>>, vector<1x8x8x128xbf16>,
    } else {
    }
    %c1_i32 = arith.constant 1 : i32
    %7 = arith.cmpi eq, %arg0, %c1_i32 : i32
    %8 = arith.extui %7 : i1 to i32
    %c0_i32_3 = arith.constant 0 : i32
    %9 = arith.cmpi ne, %8, %c0_i32_3 : i32
    scf.if %9 {
      %16 = arith.extui %2 : i1 to i32
      %c0_i32_6 = arith.constant 0 : i32
      %17 = arith.cmpi ne, %16, %c0_i32_6 : i32
      scf.if %17 {
        %cst_30 = arith.constant 0.000000e+00 : f32
        %85 = vector.broadcast %cst_30 : f32 to vector<2x128xf32>
        %c0_31 = arith.constant 0 : index
        %c0_32 = arith.constant 0 : index
        %86 = vector.load %arg18[%c0_31, %c0_32] : memref<2x128xf32, #tpu.memory_space<vmem>>, vector<2x128xf32>
        tpu.vector_store %arg18[%c0_31, %c0_32], %85 {strides = array<i32>} : memref<2x128xf32, #tpu.memory_space<vmem>>, vector<2x128xf32>,
        %c0_33 = arith.constant 0 : index
        %c0_34 = arith.constant 0 : index
        %87 = vector.load %arg17[%c0_33, %c0_34] : memref<2x128xf32, #tpu.memory_space<vmem>>, vector<1x128xf32>
        %cst_35 = arith.constant 7.812500e-03 : f32
        %88 = vector.broadcast %cst_35 : f32 to vector<1x128xf32>
        %89 = arith.mulf %87, %88 : vector<1x128xf32>
        %c1_36 = arith.constant 1 : index
        %c0_37 = arith.constant 0 : index
        %90 = vector.load %arg17[%c1_36, %c0_37] : memref<2x128xf32, #tpu.memory_space<vmem>>, vector<1x128xf32>
        %cst_38 = arith.constant 7.812500e-03 : f32
        %91 = vector.broadcast %cst_38 : f32 to vector<1x128xf32>
        %92 = arith.mulf %90, %91 : vector<1x128xf32>
        %93 = arith.mulf %89, %89 : vector<1x128xf32>
        %94 = arith.subf %92, %93 : vector<1x128xf32>
        %cst_39 = arith.constant 0.000000e+00 : f32
        %95 = vector.broadcast %cst_39 : f32 to vector<1x128xf32>
        %96 = arith.maximumf %94, %95 : vector<1x128xf32>
        %cst_40 = arith.constant 9.99999974E-6 : f32
        %97 = vector.broadcast %cst_40 : f32 to vector<1x128xf32>
        %98 = arith.addf %96, %97 : vector<1x128xf32>
        %99 = math.rsqrt %98 : vector<1x128xf32>
        %c0_41 = arith.constant 0 : index
        %c0_42 = arith.constant 0 : index
        %100 = vector.load %arg5[%c0_41, %c0_42] : memref<1x128xf32, #tpu.memory_space<vmem>>, vector<1x128xf32>
        %101 = arith.mulf %100, %99 : vector<1x128xf32>
        %c0_43 = arith.constant 0 : index
        %c0_44 = arith.constant 0 : index
        %102 = vector.load %arg6[%c0_43, %c0_44] : memref<1x128xf32, #tpu.memory_space<vmem>>, vector<1x128xf32>
        %103 = arith.mulf %89, %101 : vector<1x128xf32>
        %104 = arith.subf %102, %103 : vector<1x128xf32>
        %c0_45 = arith.constant 0 : index
        %c0_46 = arith.constant 0 : index
        %105 = vector.load %arg20[%c0_45, %c0_46] : memref<2x128xf32, #tpu.memory_space<vmem>>, vector<1x128xf32>
        tpu.vector_store %arg20[%c0_45, %c0_46], %101 {strides = array<i32>} : memref<2x128xf32, #tpu.memory_space<vmem>>, vector<1x128xf32>,
        %c1_47 = arith.constant 1 : index
        %c0_48 = arith.constant 0 : index
        %106 = vector.load %arg20[%c1_47, %c0_48] : memref<2x128xf32, #tpu.memory_space<vmem>>, vector<1x128xf32>
        tpu.vector_store %arg20[%c1_47, %c0_48], %104 {strides = array<i32>} : memref<2x128xf32, #tpu.memory_space<vmem>>, vector<1x128xf32>,
      } else {
      }
      %c0 = arith.constant 0 : index
      %c0_7 = arith.constant 0 : index
      %18 = vector.load %arg20[%c0, %c0_7] : memref<2x128xf32, #tpu.memory_space<vmem>>, vector<1x128xf32>
      %c1 = arith.constant 1 : index
      %c0_8 = arith.constant 0 : index
      %19 = vector.load %arg20[%c1, %c0_8] : memref<2x128xf32, #tpu.memory_space<vmem>>, vector<1x128xf32>
      %20 = arith.index_cast %arg1 : i32 to index
      %21 = arith.index_cast %3 : i32 to index
      %c0_9 = arith.constant 0 : index
      %c0_10 = arith.constant 0 : index
      %22 = vector.load %arg14[%20, %21, %c0_9, %c0_10] : memref<2x10x8x128xbf16, #tpu.memory_space<vmem>>, vector<1x10x8x128xbf16>
      %23 = vector.shape_cast %22 : vector<1x10x8x128xbf16> to vector<10x8x128xbf16>
      %24 = arith.extf %23 : vector<10x8x128xbf16> to vector<10x8x128xf32>
      %25 = vector.shape_cast %18 : vector<1x128xf32> to vector<1x1x128xf32>
      %26 = vector.broadcast %25 : vector<1x1x128xf32> to vector<10x8x128xf32>
      %27 = arith.mulf %24, %26 : vector<10x8x128xf32>
      %28 = vector.shape_cast %19 : vector<1x128xf32> to vector<1x1x128xf32>
      %29 = vector.broadcast %28 : vector<1x1x128xf32> to vector<10x8x128xf32>
      %30 = arith.addf %27, %29 : vector<10x8x128xf32>
      %cst = arith.constant 0.000000e+00 : f32
      %31 = vector.broadcast %cst : f32 to vector<10x8x128xf32>
      %32 = arith.maximumf %30, %31 : vector<10x8x128xf32>
      %33 = tpu.iota {dimensions = array<i32: 0>} : vector<10x1x1xi32>
      %34 = vector.broadcast %3 : i32 to vector<10x1x1xi32>
      %35 = arith.addi %33, %34 : vector<10x1x1xi32>
      %c1_i32_11 = arith.constant 1 : i32
      %36 = vector.broadcast %c1_i32_11 : i32 to vector<10x1x1xi32>
      %37 = arith.cmpi sge, %35, %36 : vector<10x1x1xi32>
      %c8_i32_12 = arith.constant 8 : i32
      %38 = vector.broadcast %c8_i32_12 : i32 to vector<10x1x1xi32>
      %39 = arith.cmpi sle, %35, %38 : vector<10x1x1xi32>
      %40 = arith.andi %37, %39 : vector<10x1x1xi1>
      %cst_13 = arith.constant 0.000000e+00 : f32
      %41 = vector.shape_cast %40 : vector<10x1x1xi1> to vector<10x1x1xi1>
      %42 = vector.broadcast %41 : vector<10x1x1xi1> to vector<10x8x128xi1>
      %43 = vector.broadcast %cst_13 : f32 to vector<10x8x128xf32>
      %44 = arith.select %42, %32, %43 : vector<10x8x128xi1>, vector<10x8x128xf32>
      %cst_14 = arith.constant 0.000000e+00 : f32
      %45 = vector.broadcast %cst_14 : f32 to vector<10x1x128xf32>
      %46 = tpu.concatenate %45, %44, %45 in 1 : vector<10x1x128xf32>, vector<10x8x128xf32>, vector<10x1x128xf32> -> vector<10x10x128xf32>
      %47 = arith.truncf %46 : vector<10x10x128xf32> to vector<10x10x128xbf16>
      %48 = vector.extract_strided_slice %47 {offsets = [0, 0, 0], sizes = [8, 8, 128], strides = [1, 1, 1]} : vector<10x10x128xbf16> to vector<8x8x128xbf16>
      %49 = vector.shape_cast %48 : vector<8x8x128xbf16> to vector<64x128xbf16>
      %50 = vector.extract_strided_slice %47 {offsets = [0, 1, 0], sizes = [8, 8, 128], strides = [1, 1, 1]} : vector<10x10x128xbf16> to vector<8x8x128xbf16>
      %51 = vector.shape_cast %50 : vector<8x8x128xbf16> to vector<64x128xbf16>
      %52 = vector.extract_strided_slice %47 {offsets = [0, 2, 0], sizes = [8, 8, 128], strides = [1, 1, 1]} : vector<10x10x128xbf16> to vector<8x8x128xbf16>
      %53 = vector.shape_cast %52 : vector<8x8x128xbf16> to vector<64x128xbf16>
      %54 = vector.extract_strided_slice %47 {offsets = [1, 0, 0], sizes = [8, 8, 128], strides = [1, 1, 1]} : vector<10x10x128xbf16> to vector<8x8x128xbf16>
      %55 = vector.shape_cast %54 : vector<8x8x128xbf16> to vector<64x128xbf16>
      %56 = vector.extract_strided_slice %47 {offsets = [1, 1, 0], sizes = [8, 8, 128], strides = [1, 1, 1]} : vector<10x10x128xbf16> to vector<8x8x128xbf16>
      %57 = vector.shape_cast %56 : vector<8x8x128xbf16> to vector<64x128xbf16>
      %58 = vector.extract_strided_slice %47 {offsets = [1, 2, 0], sizes = [8, 8, 128], strides = [1, 1, 1]} : vector<10x10x128xbf16> to vector<8x8x128xbf16>
      %59 = vector.shape_cast %58 : vector<8x8x128xbf16> to vector<64x128xbf16>
      %60 = vector.extract_strided_slice %47 {offsets = [2, 0, 0], sizes = [8, 8, 128], strides = [1, 1, 1]} : vector<10x10x128xbf16> to vector<8x8x128xbf16>
      %61 = vector.shape_cast %60 : vector<8x8x128xbf16> to vector<64x128xbf16>
      %62 = vector.extract_strided_slice %47 {offsets = [2, 1, 0], sizes = [8, 8, 128], strides = [1, 1, 1]} : vector<10x10x128xbf16> to vector<8x8x128xbf16>
      %63 = vector.shape_cast %62 : vector<8x8x128xbf16> to vector<64x128xbf16>
      %64 = vector.extract_strided_slice %47 {offsets = [2, 2, 0], sizes = [8, 8, 128], strides = [1, 1, 1]} : vector<10x10x128xbf16> to vector<8x8x128xbf16>
      %65 = vector.shape_cast %64 : vector<8x8x128xbf16> to vector<64x128xbf16>
      %66 = tpu.concatenate %49, %51, %53, %55, %57, %59, %61, %63, %65 in 1 : vector<64x128xbf16>, vector<64x128xbf16>, vector<64x128xbf16>, vector<64x128xbf16>, vector<64x128xbf16>, vector<64x128xbf16>, vector<64x128xbf16>, vector<64x128xbf16>, vector<64x128xbf16> -> vector<64x1152xbf16>
      %c0_15 = arith.constant 0 : index
      %c0_16 = arith.constant 0 : index
      %67 = vector.load %arg7[%c0_15, %c0_16] : memref<1152x128xbf16, #tpu.memory_space<vmem>>, vector<1152x128xbf16>
      %cst_17 = arith.constant dense<0.000000e+00> : vector<64x128xf32>
      %68 = tpu.matmul %66, %67, %cst_17 {dimension_numbers = #tpu.dot_dimension_numbers<[1], [0], [0], [1], [0, 0, 1, 1], [], []>} : vector<64x1152xbf16>, vector<1152x128xbf16>, vector<64x128xf32> -> vector<64x128xf32>
      %c0_18 = arith.constant 0 : index
      %c0_19 = arith.constant 0 : index
      %69 = vector.load %arg18[%c0_18, %c0_19] : memref<2x128xf32, #tpu.memory_space<vmem>>, vector<1x128xf32>
      %cst_20 = arith.constant dense<0.000000e+00> : vector<128xf32>
      %70 = vector.multi_reduction <add>, %68, %cst_20 [0] : vector<64x128xf32> to vector<128xf32>
      %71 = vector.shape_cast %70 : vector<128xf32> to vector<1x128xf32>
      %72 = arith.addf %69, %71 : vector<1x128xf32>
      %c0_21 = arith.constant 0 : index
      %c0_22 = arith.constant 0 : index
      %73 = vector.load %arg18[%c0_21, %c0_22] : memref<2x128xf32, #tpu.memory_space<vmem>>, vector<1x128xf32>
      tpu.vector_store %arg18[%c0_21, %c0_22], %72 {strides = array<i32>} : memref<2x128xf32, #tpu.memory_space<vmem>>, vector<1x128xf32>,
      %c1_23 = arith.constant 1 : index
      %c0_24 = arith.constant 0 : index
      %74 = vector.load %arg18[%c1_23, %c0_24] : memref<2x128xf32, #tpu.memory_space<vmem>>, vector<1x128xf32>
      %75 = arith.mulf %68, %68 : vector<64x128xf32>
      %cst_25 = arith.constant dense<0.000000e+00> : vector<128xf32>
      %76 = vector.multi_reduction <add>, %75, %cst_25 [0] : vector<64x128xf32> to vector<128xf32>
      %77 = vector.shape_cast %76 : vector<128xf32> to vector<1x128xf32>
      %78 = arith.addf %74, %77 : vector<1x128xf32>
      %c1_26 = arith.constant 1 : index
      %c0_27 = arith.constant 0 : index
      %79 = vector.load %arg18[%c1_26, %c0_27] : memref<2x128xf32, #tpu.memory_space<vmem>>, vector<1x128xf32>
      tpu.vector_store %arg18[%c1_26, %c0_27], %78 {strides = array<i32>} : memref<2x128xf32, #tpu.memory_space<vmem>>, vector<1x128xf32>,
      %80 = vector.shape_cast %68 : vector<64x128xf32> to vector<1x8x8x128xf32>
      %81 = arith.truncf %80 : vector<1x8x8x128xf32> to vector<1x8x8x128xbf16>
      %82 = arith.index_cast %arg1 : i32 to index
      %83 = arith.index_cast %3 : i32 to index
      %c0_28 = arith.constant 0 : index
      %c0_29 = arith.constant 0 : index
      %84 = vector.load %arg15[%82, %83, %c0_28, %c0_29] : memref<2x8x8x128xbf16, #tpu.memory_space<vmem>>, vector<1x8x8x128xbf16>
      tpu.vector_store %arg15[%82, %83, %c0_28, %c0_29], %81 {strides = array<i32>} : memref<2x8x8x128xbf16, #tpu.memory_space<vmem>>, vector<1x8x8x128xbf16>,
    } else {
    }
    %c2_i32 = arith.constant 2 : i32
    %10 = arith.cmpi eq, %arg0, %c2_i32 : i32
    %11 = arith.extui %10 : i1 to i32
    %c0_i32_4 = arith.constant 0 : i32
    %12 = arith.cmpi ne, %11, %c0_i32_4 : i32
    scf.if %12 {
      %16 = arith.extui %2 : i1 to i32
      %c0_i32_6 = arith.constant 0 : i32
      %17 = arith.cmpi ne, %16, %c0_i32_6 : i32
      scf.if %17 {
        %cst_26 = arith.constant 0.000000e+00 : f32
        %50 = vector.broadcast %cst_26 : f32 to vector<2x128xf32>
        %c0_27 = arith.constant 0 : index
        %c0_28 = arith.constant 0 : index
        %51 = vector.load %arg19[%c0_27, %c0_28] : memref<2x128xf32, #tpu.memory_space<vmem>>, vector<2x128xf32>
        tpu.vector_store %arg19[%c0_27, %c0_28], %50 {strides = array<i32>} : memref<2x128xf32, #tpu.memory_space<vmem>>, vector<2x128xf32>,
        %c0_29 = arith.constant 0 : index
        %c0_30 = arith.constant 0 : index
        %52 = vector.load %arg18[%c0_29, %c0_30] : memref<2x128xf32, #tpu.memory_space<vmem>>, vector<1x128xf32>
        %cst_31 = arith.constant 7.812500e-03 : f32
        %53 = vector.broadcast %cst_31 : f32 to vector<1x128xf32>
        %54 = arith.mulf %52, %53 : vector<1x128xf32>
        %c1_32 = arith.constant 1 : index
        %c0_33 = arith.constant 0 : index
        %55 = vector.load %arg18[%c1_32, %c0_33] : memref<2x128xf32, #tpu.memory_space<vmem>>, vector<1x128xf32>
        %cst_34 = arith.constant 7.812500e-03 : f32
        %56 = vector.broadcast %cst_34 : f32 to vector<1x128xf32>
        %57 = arith.mulf %55, %56 : vector<1x128xf32>
        %58 = arith.mulf %54, %54 : vector<1x128xf32>
        %59 = arith.subf %57, %58 : vector<1x128xf32>
        %cst_35 = arith.constant 0.000000e+00 : f32
        %60 = vector.broadcast %cst_35 : f32 to vector<1x128xf32>
        %61 = arith.maximumf %59, %60 : vector<1x128xf32>
        %cst_36 = arith.constant 9.99999974E-6 : f32
        %62 = vector.broadcast %cst_36 : f32 to vector<1x128xf32>
        %63 = arith.addf %61, %62 : vector<1x128xf32>
        %64 = math.rsqrt %63 : vector<1x128xf32>
        %c0_37 = arith.constant 0 : index
        %c0_38 = arith.constant 0 : index
        %65 = vector.load %arg8[%c0_37, %c0_38] : memref<1x128xf32, #tpu.memory_space<vmem>>, vector<1x128xf32>
        %66 = arith.mulf %65, %64 : vector<1x128xf32>
        %c0_39 = arith.constant 0 : index
        %c0_40 = arith.constant 0 : index
        %67 = vector.load %arg9[%c0_39, %c0_40] : memref<1x128xf32, #tpu.memory_space<vmem>>, vector<1x128xf32>
        %68 = arith.mulf %54, %66 : vector<1x128xf32>
        %69 = arith.subf %67, %68 : vector<1x128xf32>
        %c0_41 = arith.constant 0 : index
        %c0_42 = arith.constant 0 : index
        %70 = vector.load %arg21[%c0_41, %c0_42] : memref<2x128xf32, #tpu.memory_space<vmem>>, vector<1x128xf32>
        tpu.vector_store %arg21[%c0_41, %c0_42], %66 {strides = array<i32>} : memref<2x128xf32, #tpu.memory_space<vmem>>, vector<1x128xf32>,
        %c1_43 = arith.constant 1 : index
        %c0_44 = arith.constant 0 : index
        %71 = vector.load %arg21[%c1_43, %c0_44] : memref<2x128xf32, #tpu.memory_space<vmem>>, vector<1x128xf32>
        tpu.vector_store %arg21[%c1_43, %c0_44], %69 {strides = array<i32>} : memref<2x128xf32, #tpu.memory_space<vmem>>, vector<1x128xf32>,
      } else {
      }
      %18 = arith.index_cast %arg1 : i32 to index
      %19 = arith.index_cast %3 : i32 to index
      %c0 = arith.constant 0 : index
      %c0_7 = arith.constant 0 : index
      %20 = vector.load %arg15[%18, %19, %c0, %c0_7] : memref<2x8x8x128xbf16, #tpu.memory_space<vmem>>, vector<1x8x8x128xbf16>
      %21 = vector.shape_cast %20 : vector<1x8x8x128xbf16> to vector<64x128xbf16>
      %22 = arith.extf %21 : vector<64x128xbf16> to vector<64x128xf32>
      %c0_8 = arith.constant 0 : index
      %c0_9 = arith.constant 0 : index
      %23 = vector.load %arg21[%c0_8, %c0_9] : memref<2x128xf32, #tpu.memory_space<vmem>>, vector<1x128xf32>
      %24 = vector.broadcast %23 : vector<1x128xf32> to vector<64x128xf32>
      %25 = arith.mulf %22, %24 : vector<64x128xf32>
      %c1 = arith.constant 1 : index
      %c0_10 = arith.constant 0 : index
      %26 = vector.load %arg21[%c1, %c0_10] : memref<2x128xf32, #tpu.memory_space<vmem>>, vector<1x128xf32>
      %27 = vector.broadcast %26 : vector<1x128xf32> to vector<64x128xf32>
      %28 = arith.addf %25, %27 : vector<64x128xf32>
      %cst = arith.constant 0.000000e+00 : f32
      %29 = vector.broadcast %cst : f32 to vector<64x128xf32>
      %30 = arith.maximumf %28, %29 : vector<64x128xf32>
      %31 = arith.truncf %30 : vector<64x128xf32> to vector<64x128xbf16>
      %c0_11 = arith.constant 0 : index
      %c0_12 = arith.constant 0 : index
      %32 = vector.load %arg10[%c0_11, %c0_12] : memref<128x128xbf16, #tpu.memory_space<vmem>>, vector<128x128xbf16>
      %cst_13 = arith.constant dense<0.000000e+00> : vector<64x128xf32>
      %33 = tpu.matmul %31, %32, %cst_13 {dimension_numbers = #tpu.dot_dimension_numbers<[1], [0], [0], [1], [0, 0, 1, 1], [], []>} : vector<64x128xbf16>, vector<128x128xbf16>, vector<64x128xf32> -> vector<64x128xf32>
      %c0_14 = arith.constant 0 : index
      %c0_15 = arith.constant 0 : index
      %34 = vector.load %arg19[%c0_14, %c0_15] : memref<2x128xf32, #tpu.memory_space<vmem>>, vector<1x128xf32>
      %cst_16 = arith.constant dense<0.000000e+00> : vector<128xf32>
      %35 = vector.multi_reduction <add>, %33, %cst_16 [0] : vector<64x128xf32> to vector<128xf32>
      %36 = vector.shape_cast %35 : vector<128xf32> to vector<1x128xf32>
      %37 = arith.addf %34, %36 : vector<1x128xf32>
      %c0_17 = arith.constant 0 : index
      %c0_18 = arith.constant 0 : index
      %38 = vector.load %arg19[%c0_17, %c0_18] : memref<2x128xf32, #tpu.memory_space<vmem>>, vector<1x128xf32>
      tpu.vector_store %arg19[%c0_17, %c0_18], %37 {strides = array<i32>} : memref<2x128xf32, #tpu.memory_space<vmem>>, vector<1x128xf32>,
      %c1_19 = arith.constant 1 : index
      %c0_20 = arith.constant 0 : index
      %39 = vector.load %arg19[%c1_19, %c0_20] : memref<2x128xf32, #tpu.memory_space<vmem>>, vector<1x128xf32>
      %40 = arith.mulf %33, %33 : vector<64x128xf32>
      %cst_21 = arith.constant dense<0.000000e+00> : vector<128xf32>
      %41 = vector.multi_reduction <add>, %40, %cst_21 [0] : vector<64x128xf32> to vector<128xf32>
      %42 = vector.shape_cast %41 : vector<128xf32> to vector<1x128xf32>
      %43 = arith.addf %39, %42 : vector<1x128xf32>
      %c1_22 = arith.constant 1 : index
      %c0_23 = arith.constant 0 : index
      %44 = vector.load %arg19[%c1_22, %c0_23] : memref<2x128xf32, #tpu.memory_space<vmem>>, vector<1x128xf32>
      tpu.vector_store %arg19[%c1_22, %c0_23], %43 {strides = array<i32>} : memref<2x128xf32, #tpu.memory_space<vmem>>, vector<1x128xf32>,
      %45 = vector.shape_cast %33 : vector<64x128xf32> to vector<1x8x8x128xf32>
      %46 = arith.truncf %45 : vector<1x8x8x128xf32> to vector<1x8x8x128xbf16>
      %47 = arith.index_cast %arg1 : i32 to index
      %48 = arith.index_cast %3 : i32 to index
      %c0_24 = arith.constant 0 : index
      %c0_25 = arith.constant 0 : index
      %49 = vector.load %arg16[%47, %48, %c0_24, %c0_25] : memref<2x8x8x128xbf16, #tpu.memory_space<vmem>>, vector<1x8x8x128xbf16>
      tpu.vector_store %arg16[%47, %48, %c0_24, %c0_25], %46 {strides = array<i32>} : memref<2x8x8x128xbf16, #tpu.memory_space<vmem>>, vector<1x8x8x128xbf16>,
    } else {
    }
    %c3_i32 = arith.constant 3 : i32
    %13 = arith.cmpi eq, %arg0, %c3_i32 : i32
    %14 = arith.extui %13 : i1 to i32
    %c0_i32_5 = arith.constant 0 : i32
    %15 = arith.cmpi ne, %14, %c0_i32_5 : i32
    scf.if %15 {
      %16 = arith.extui %2 : i1 to i32
      %c0_i32_6 = arith.constant 0 : i32
      %17 = arith.cmpi ne, %16, %c0_i32_6 : i32
      scf.if %17 {
        %c0_19 = arith.constant 0 : index
        %c0_20 = arith.constant 0 : index
        %36 = vector.load %arg19[%c0_19, %c0_20] : memref<2x128xf32, #tpu.memory_space<vmem>>, vector<1x128xf32>
        %cst_21 = arith.constant 7.812500e-03 : f32
        %37 = vector.broadcast %cst_21 : f32 to vector<1x128xf32>
        %38 = arith.mulf %36, %37 : vector<1x128xf32>
        %c1_22 = arith.constant 1 : index
        %c0_23 = arith.constant 0 : index
        %39 = vector.load %arg19[%c1_22, %c0_23] : memref<2x128xf32, #tpu.memory_space<vmem>>, vector<1x128xf32>
        %cst_24 = arith.constant 7.812500e-03 : f32
        %40 = vector.broadcast %cst_24 : f32 to vector<1x128xf32>
        %41 = arith.mulf %39, %40 : vector<1x128xf32>
        %42 = arith.mulf %38, %38 : vector<1x128xf32>
        %43 = arith.subf %41, %42 : vector<1x128xf32>
        %cst_25 = arith.constant 0.000000e+00 : f32
        %44 = vector.broadcast %cst_25 : f32 to vector<1x128xf32>
        %45 = arith.maximumf %43, %44 : vector<1x128xf32>
        %cst_26 = arith.constant 9.99999974E-6 : f32
        %46 = vector.broadcast %cst_26 : f32 to vector<1x128xf32>
        %47 = arith.addf %45, %46 : vector<1x128xf32>
        %48 = math.rsqrt %47 : vector<1x128xf32>
        %c0_27 = arith.constant 0 : index
        %c0_28 = arith.constant 0 : index
        %49 = vector.load %arg11[%c0_27, %c0_28] : memref<1x128xf32, #tpu.memory_space<vmem>>, vector<1x128xf32>
        %50 = arith.mulf %49, %48 : vector<1x128xf32>
        %c0_29 = arith.constant 0 : index
        %c0_30 = arith.constant 0 : index
        %51 = vector.load %arg12[%c0_29, %c0_30] : memref<1x128xf32, #tpu.memory_space<vmem>>, vector<1x128xf32>
        %52 = arith.mulf %38, %50 : vector<1x128xf32>
        %53 = arith.subf %51, %52 : vector<1x128xf32>
        %c0_31 = arith.constant 0 : index
        %c0_32 = arith.constant 0 : index
        %54 = vector.load %arg22[%c0_31, %c0_32] : memref<2x128xf32, #tpu.memory_space<vmem>>, vector<1x128xf32>
        tpu.vector_store %arg22[%c0_31, %c0_32], %50 {strides = array<i32>} : memref<2x128xf32, #tpu.memory_space<vmem>>, vector<1x128xf32>,
        %c1_33 = arith.constant 1 : index
        %c0_34 = arith.constant 0 : index
        %55 = vector.load %arg22[%c1_33, %c0_34] : memref<2x128xf32, #tpu.memory_space<vmem>>, vector<1x128xf32>
        tpu.vector_store %arg22[%c1_33, %c0_34], %53 {strides = array<i32>} : memref<2x128xf32, #tpu.memory_space<vmem>>, vector<1x128xf32>,
      } else {
      }
      %18 = arith.index_cast %arg1 : i32 to index
      %19 = arith.index_cast %3 : i32 to index
      %c0 = arith.constant 0 : index
      %c0_7 = arith.constant 0 : index
      %20 = vector.load %arg16[%18, %19, %c0, %c0_7] : memref<2x8x8x128xbf16, #tpu.memory_space<vmem>>, vector<1x8x8x128xbf16>
      %21 = vector.shape_cast %20 : vector<1x8x8x128xbf16> to vector<64x128xbf16>
      %22 = arith.extf %21 : vector<64x128xbf16> to vector<64x128xf32>
      %c0_8 = arith.constant 0 : index
      %c0_9 = arith.constant 0 : index
      %c0_10 = arith.constant 0 : index
      %c0_11 = arith.constant 0 : index
      %23 = vector.load %arg3[%c0_8, %c0_9, %c0_10, %c0_11] : memref<1x8x8x128xf32, #tpu.memory_space<vmem>>, vector<1x8x8x128xf32>
      %24 = vector.shape_cast %23 : vector<1x8x8x128xf32> to vector<64x128xf32>
      %c0_12 = arith.constant 0 : index
      %c0_13 = arith.constant 0 : index
      %25 = vector.load %arg22[%c0_12, %c0_13] : memref<2x128xf32, #tpu.memory_space<vmem>>, vector<1x128xf32>
      %26 = vector.broadcast %25 : vector<1x128xf32> to vector<64x128xf32>
      %27 = arith.mulf %22, %26 : vector<64x128xf32>
      %c1 = arith.constant 1 : index
      %c0_14 = arith.constant 0 : index
      %28 = vector.load %arg22[%c1, %c0_14] : memref<2x128xf32, #tpu.memory_space<vmem>>, vector<1x128xf32>
      %29 = vector.broadcast %28 : vector<1x128xf32> to vector<64x128xf32>
      %30 = arith.addf %27, %29 : vector<64x128xf32>
      %31 = arith.addf %30, %24 : vector<64x128xf32>
      %cst = arith.constant 0.000000e+00 : f32
      %32 = vector.broadcast %cst : f32 to vector<64x128xf32>
      %33 = arith.maximumf %31, %32 : vector<64x128xf32>
      %34 = vector.shape_cast %33 : vector<64x128xf32> to vector<1x8x8x128xf32>
      %c0_15 = arith.constant 0 : index
      %c0_16 = arith.constant 0 : index
      %c0_17 = arith.constant 0 : index
      %c0_18 = arith.constant 0 : index
      %35 = vector.load %arg13[%c0_15, %c0_16, %c0_17, %c0_18] : memref<1x8x8x128xf32, #tpu.memory_space<vmem>>, vector<1x8x8x128xf32>
      tpu.vector_store %arg13[%c0_15, %c0_16, %c0_17, %c0_18], %34 {strides = array<i32>} : memref<1x8x8x128xf32, #tpu.memory_space<vmem>>, vector<1x8x8x128xf32>,
    } else {
    }
    return
  }
  func.func @transform_0(%arg0: i32, %arg1: i32, %arg2: i32) -> (i32, i32, i32, i32) {
    %c0_i32 = arith.constant 0 : i32
    %0 = arith.cmpi eq, %arg0, %c0_i32 : i32
    %c3_i32 = arith.constant 3 : i32
    %1 = arith.cmpi eq, %arg0, %c3_i32 : i32
    %2 = arith.ori %0, %1 : i1
    %c1_i32 = arith.constant 1 : i32
    %3 = arith.select %2, %arg1, %c1_i32 : i32
    %c0_i32_0 = arith.constant 0 : i32
    %4 = arith.select %2, %arg2, %c0_i32_0 : i32
    %c0_i32_1 = arith.constant 0 : i32
    %c0_i32_2 = arith.constant 0 : i32
    %c0_i32_3 = arith.constant 0 : i32
    return %3, %4, %c0_i32_1, %c0_i32_2 : i32, i32, i32, i32
  }
  func.func @transform_1(%arg0: i32, %arg1: i32, %arg2: i32) -> (i32, i32) {
    %c0_i32 = arith.constant 0 : i32
    %c0_i32_0 = arith.constant 0 : i32
    %c0_i32_1 = arith.constant 0 : i32
    return %c0_i32, %c0_i32_0 : i32, i32
  }
  func.func @transform_2(%arg0: i32, %arg1: i32, %arg2: i32) -> (i32, i32) {
    %c0_i32 = arith.constant 0 : i32
    %c0_i32_0 = arith.constant 0 : i32
    %c0_i32_1 = arith.constant 0 : i32
    return %c0_i32, %c0_i32_0 : i32, i32
  }
  func.func @transform_3(%arg0: i32, %arg1: i32, %arg2: i32) -> (i32, i32) {
    %c0_i32 = arith.constant 0 : i32
    %c0_i32_0 = arith.constant 0 : i32
    %c0_i32_1 = arith.constant 0 : i32
    return %c0_i32, %c0_i32_0 : i32, i32
  }
  func.func @transform_4(%arg0: i32, %arg1: i32, %arg2: i32) -> (i32, i32) {
    %c0_i32 = arith.constant 0 : i32
    %c0_i32_0 = arith.constant 0 : i32
    %c0_i32_1 = arith.constant 0 : i32
    return %c0_i32, %c0_i32_0 : i32, i32
  }
  func.func @transform_5(%arg0: i32, %arg1: i32, %arg2: i32) -> (i32, i32) {
    %c0_i32 = arith.constant 0 : i32
    %c0_i32_0 = arith.constant 0 : i32
    %c0_i32_1 = arith.constant 0 : i32
    return %c0_i32, %c0_i32_0 : i32, i32
  }
  func.func @transform_6(%arg0: i32, %arg1: i32, %arg2: i32) -> (i32, i32) {
    %c0_i32 = arith.constant 0 : i32
    %c0_i32_0 = arith.constant 0 : i32
    %c0_i32_1 = arith.constant 0 : i32
    return %c0_i32, %c0_i32_0 : i32, i32
  }
  func.func @transform_7(%arg0: i32, %arg1: i32, %arg2: i32) -> (i32, i32) {
    %c0_i32 = arith.constant 0 : i32
    %c0_i32_0 = arith.constant 0 : i32
    %c0_i32_1 = arith.constant 0 : i32
    return %c0_i32, %c0_i32_0 : i32, i32
  }
  func.func @transform_8(%arg0: i32, %arg1: i32, %arg2: i32) -> (i32, i32) {
    %c0_i32 = arith.constant 0 : i32
    %c0_i32_0 = arith.constant 0 : i32
    %c0_i32_1 = arith.constant 0 : i32
    return %c0_i32, %c0_i32_0 : i32, i32
  }
  func.func @transform_9(%arg0: i32, %arg1: i32, %arg2: i32) -> (i32, i32) {
    %c0_i32 = arith.constant 0 : i32
    %c0_i32_0 = arith.constant 0 : i32
    %c0_i32_1 = arith.constant 0 : i32
    return %c0_i32, %c0_i32_0 : i32, i32
  }
  func.func @transform_10(%arg0: i32, %arg1: i32, %arg2: i32) -> (i32, i32, i32, i32) {
    %c3_i32 = arith.constant 3 : i32
    %0 = arith.cmpi eq, %arg0, %c3_i32 : i32
    %1 = arith.extui %0 : i1 to i32
    %2 = arith.muli %arg1, %1 : i32
    %3 = arith.muli %arg2, %1 : i32
    %c0_i32 = arith.constant 0 : i32
    %c0_i32_0 = arith.constant 0 : i32
    %c0_i32_1 = arith.constant 0 : i32
    return %2, %3, %c0_i32, %c0_i32_0 : i32, i32, i32, i32
  }
}

</mosaic_0001>

<bundles_post_ra>
// kernel: tpu_custom_call.1
= control target key start
LH: loop header
LB: loop body
LE: loop exit
PB: predicated region body
PF: predicated region fallthrough
CT: control target
= control target key end

     0   :  { %s4737_s0 = inlined_call_operand.hbm [shape: f32[2,8,8,128], index: 0, kind: input, shape index: {}]   ;;  %s4738_s1 = inlined_call_operand.hbm [shape: bf16[128,128], index: 1, kind: input, shape index: {}]   ;;  %s4739_s2 = inlined_call_operand.vmem [shape: f32[1,128], index: 2, kind: input, shape index: {}]   ;;  %s4740_s3 = inlined_call_operand.vmem [shape: f32[1,128], index: 3, kind: input, shape index: {}]   ;;  %s4741_s4 = inlined_call_operand.hbm [shape: bf16[1152,128], index: 4, kind: input, shape index: {}]   ;;  %s4742_s5 = inlined_call_operand.vmem [shape: f32[1,128], index: 5, kind: input, shape index: {}]   ;;  %s4743_s6 = inlined_call_operand.vmem [shape: f32[1,128], index: 6, kind: input, shape index: {}]   ;;  %s4744_s7 = inlined_call_operand.hbm [shape: bf16[128,128], index: 7, kind: input, shape index: {}]   ;;  %s4745_s8 = inlined_call_operand.vmem [shape: f32[1,128], index: 8, kind: input, shape index: {}]   ;;  %s4746_s9 = inlined_call_operand.vmem [shape: f32[1,128], index: 9, kind: input, shape index: {}]   ;;  %s4747_s10 = inlined_call_operand.hbm [shape: f32[2,8,8,128], index: 10, kind: output, shape index: {}]  }
   0x1   :  { %4759 = sst [smem:[#allocation29_spill]] %s4738_s1 }
   0x2   :  { %4760 = sst [smem:[#allocation30_spill]] %s4739_s2 }
   0x3   :  { %4761 = sst [smem:[#allocation31_spill]] %s4740_s3 }
   0x4   :  { %4762 = sst [smem:[#allocation32_spill]] %s4741_s4 }
   0x5   :  { %4763 = sst [smem:[#allocation33_spill]] %s4742_s5 }
   0x6   :  { %4764 = sst [smem:[#allocation34_spill]] %s4743_s6 }
   0x7   :  { %4765 = sst [smem:[#allocation35_spill]] %s4744_s7 }
   0x8   :  { %4766 = sst [smem:[#allocation36_spill]] %s4745_s8 }
   0x9   :  { %4767 = sst [smem:[#allocation37_spill]] %s4746_s9 }
   0xa   :  { %4768 = sst [smem:[#allocation38_spill]] %s4747_s10 }
   0xb   :  { %15 = vsyncpa [#allocation12], 0 }
   0xc   :  { %17 = vsyncpa [#allocation12 + $0x1], 0 }
   0xd   :  { %18 = vsyncpa [#allocation15], 0 }
   0xe   :  { %19 = vsyncpa [#allocation18], 0 }
   0xf   :  { %20 = vsyncpa [#allocation13], 0 }
  0x10   :  { %22 = vsyncpa [#allocation13 + $0x1], 0  ;;  %s4026_s13 = smov 0   ;;  %s4028_s14 = smov 0  }
  0x11   :  { %s4030_s15 = smov 0   ;;  %s4032_s16 = smov 0  }
  0x12   :  { %s4034_s17 = smov 0   ;;  %s4036_s18 = smov 0  }
  0x13   :  { %s4038_s19 = smov 0   ;;  %s4040_s20 = smov 0  }
  0x14   :  { %s4042_s21 = smov 0   ;;  %s4044_s22 = smov 0  }
  0x15   :  { %s4046_s23 = smov 0  }
  0x16 LB: > { %4769 = sst [smem:[#allocation24_spill]] %s3913_s13  ;;  %s2743_s24 = sadd.s32 4294967295, %s3953_s23   ;;  %s3953_s23 = sphi %s4046_s23, %s28_s23   ;;  %s3949_s22 = sphi %s4044_s22, %s4824_s22   ;;  %s3945_s21 = sphi %s4042_s21, %s4823_s21   ;;  %s3941_s20 = sphi %s4040_s20, %s4822_s20   ;;  %s3937_s19 = sphi %s4038_s19, %s4821_s19   ;;  %s3933_s18 = sphi %s4036_s18, %s4820_s18   ;;  %s3929_s17 = sphi %s4034_s17, %s4819_s17   ;;  %s3925_s16 = sphi %s4032_s16, %s4818_s16   ;;  %s3921_s15 = sphi %s4030_s15, %s4817_s15   ;;  %s3917_s14 = sphi %s4028_s14, %s4816_s14   ;;  %s3913_s13 = sphi %s4026_s13, %s4815_s13  }
  0x17   : > { %4770 = sst [smem:[#allocation25_spill]] %s3941_s20  ;;  %s2744_s25 = sadd.s32 4294967294, %s3953_s23  }
  0x18   : > { %p79_p0 = scmp.ne.s32.totalorder %s3929_s17, %s3925_s16  ;;  %p4082_p1 = scmp.eq.s32.totalorder %s2743_s24, 0 }
  0x19   : > { %p301_p2 = scmp.ne.s32.totalorder %s3921_s15, %s3917_s14  ;;  %p302_p4 = scmp.eq.s32.totalorder %s2743_s24, 7 }
  0x1a   : > { %s4771_s26 = scalar_select %p4082_p1, 1, 0 }
  0x1b   : > { %p4091_p3 = por %p4082_p1, %p79_p0  ;;  %p307_p5 = scmp.ne.s32.totalorder %s3917_s14, %s3913_s13 }
  0x1c   : > { %p308_p6 = scmp.eq.s32.totalorder %s2744_s25, 7  ;;  %p4097_p7 = por %p302_p4, %p301_p2 }
  0x1d   : > { %s4772_s28 = scalar_select %p4091_p3, 1, 0 }
  0x1e   : > { %s4773_s29 = scalar_select %p4097_p7, 1, 0 }
  0x1f   : > { %p2745_p8 = scmp.ge.s32.totalorder %s3953_s23, 1  ;;  %p4102_p9 = por %p308_p6, %p307_p5 }
  0x20   : > { %4774 = sst [smem:[#allocation26_spill]] %s4773_s29  ;;  %p315_p10 = scmp.lt.s32.totalorder %s3953_s23, 9 }
  0x21   : > { %s4775_s30 = scalar_select %p4102_p9, 1, 0 }
  0x22   : > { %p4107_p11 = pnand %p2745_p8, %p315_p10  ;;  %s3955_s12 = smov [#allocation14]  }
  0x23   : > { %4776 = sst [smem:[#allocation27_spill]] %s4775_s30  ;;  %s327_s16 = sshll.u32 %s3955_s12, 4  ;;  %s4111_s16 = int_to_ptr.vmem [resolvable:$true] %s327_s16 }
  0x24   : > { %s4777_s11 = scalar_select %p4107_p11, 1, 0 }
  0x25   : > { %p3487_p12 = pneg %p4107_p11  ;;  %s3956_s25 = smov [#allocation16]  }
  0x26   : > { %s346_s27 = sshll.u32 %s3956_s25, 4  ;;  %s3957_s30 = smov [#allocation17]   ;;  %s4121_s27 = int_to_ptr.vmem [resolvable:$true] %s346_s27 }
  0x27   : > { %p4117_p13 = pnand %p3487_p12, %p4082_p1  ;;  %s4123_s13 = sshll.u32 %s3957_s30, 4  ;;  %s366_s13 = int_to_ptr.vmem [resolvable:$true] %s4123_s13 }
  0x28   : > { %s4779_s1 = sld [smem:[#allocation29_spill]] }
  0x29   : > { %p4133_p2 = pneg %p4117_p13 }
  0x2e   : > { %s3709_s12 = scalar_lea.hbm %s4779_s1, 1024 }
  0x2f   : > { %p3710_p0 = scmp.ne.s32.totalorder %s4779_s1, %s3709_s12  ;;  %p3716_p6 = scmp.lt.u32.totalorder %s3709_s12, %s4779_s1 }
  0x31   : > { %p3712_p4 = pnand %p4133_p2, %p3710_p0 }
  0x33   : > { %p3713_p5 = pneg %p3712_p4 }
  0x35   : > { %p3718_p8 = pnand %p3716_p6, %p3713_p5 }
  0x37   : > { %3721 = shalt.err (!%p3718_p8)
}
  0x38   : > { %s3722_s8 = scalar_lea.vmem %s4111_s16, 1024  ;;  %p3730_p7 = scmp.lt.s32.totalorder %s4111_s16, %s4111_s16 }
  0x39   : > { %p3723_p10 = scmp.ne.s32.totalorder %s4111_s16, %s3722_s8  ;;  %p3731_p1 = scmp.lt.s32.totalorder %s3722_s8, %s3722_s8 }
  0x3b   : > { %p3725_p12 = pnand %p3723_p10, %p4133_p2  ;;  %p3732_p0 = por %p3731_p1, %p3730_p7 }
  0x3d   : > { %p3726_p9 = pneg %p3725_p12 }
  0x3f   : > { %p3733_p4 = pnand %p3732_p0, %p3726_p9 }
  0x41   : > { %3736 = shalt.err (!%p3733_p4)
}
  0x42   : > { %s3958_s9 = smov 64   ;;  %s3959_s10 = smov 4  }
  0x43   : > { %3490 = dma.hbm_to_vmem [thread:$0]  (!%p4117_p13), %s4779_s1, 1024, %s4111_s16, [#allocation15], %s3958_s9, %s3958_s9, %s3959_s10  }
  0x44   : > { %s4781_s4 = sld [smem:[#allocation32_spill]] }
  0x4a   : > { %s3737_s8 = scalar_lea.hbm %s4781_s4, 9216 }
  0x4b   : > { %p3738_p1 = scmp.ne.s32.totalorder %s4781_s4, %s3737_s8  ;;  %p3744_p5 = scmp.lt.u32.totalorder %s3737_s8, %s4781_s4 }
  0x4d   : > { %p3740_p7 = pnand %p3738_p1, %p4133_p2 }
  0x4f   : > { %p3741_p9 = pneg %p3740_p7 }
  0x51   : > { %p3746_p6 = pnand %p3744_p5, %p3741_p9 }
  0x53   : > { %3749 = shalt.err (!%p3746_p6)
}
  0x54   : > { %s3750_s16 = scalar_lea.vmem %s4121_s27, 9216  ;;  %p3758_p0 = scmp.lt.s32.totalorder %s4121_s27, %s4121_s27 }
  0x55   : > { %p3751_p8 = scmp.ne.s32.totalorder %s4121_s27, %s3750_s16  ;;  %p3759_p4 = scmp.lt.s32.totalorder %s3750_s16, %s3750_s16 }
  0x57   : > { %p3753_p10 = pnand %p3751_p8, %p4133_p2  ;;  %p3760_p1 = por %p3759_p4, %p3758_p0 }
  0x59   : > { %p3754_p12 = pneg %p3753_p10 }
  0x5b   : > { %p3761_p7 = pnand %p3760_p1, %p3754_p12 }
  0x5d   : > { %3764 = shalt.err (!%p3761_p7)
}
  0x5e   : > { %3493 = dma.hbm_to_vmem [thread:$0]  (!%p4117_p13), %s4781_s4, 9216, %s4121_s27, [#allocation15], %s3958_s9, %s3958_s9, %s3959_s10  }
  0x5f   : > { %s4782_s7 = sld [smem:[#allocation35_spill]] }
  0x65   : > { %s3765_s29 = scalar_lea.hbm %s4782_s7, 1024 }
  0x66   : > { %p3766_p9 = scmp.ne.s32.totalorder %s4782_s7, %s3765_s29  ;;  %p3772_p8 = scmp.lt.u32.totalorder %s3765_s29, %s4782_s7 }
  0x68   : > { %p3768_p5 = pnand %p3766_p9, %p4133_p2 }
  0x6a   : > { %p3769_p6 = pneg %p3768_p5 }
  0x6c   : > { %p3774_p10 = pnand %p3772_p8, %p3769_p6 }
  0x6e   : > { %3777 = shalt.err (!%p3774_p10)
}
  0x6f   : > { %s3778_s16 = scalar_lea.vmem %s366_s13, 1024  ;;  %p3786_p1 = scmp.lt.s32.totalorder %s366_s13, %s366_s13 }
  0x70   : > { %p3779_p12 = scmp.ne.s32.totalorder %s366_s13, %s3778_s16  ;;  %p3787_p7 = scmp.lt.s32.totalorder %s3778_s16, %s3778_s16 }
  0x72   : > { %p3781_p0 = pnand %p3779_p12, %p4133_p2  ;;  %p3788_p3 = por %p3787_p7, %p3786_p1 }
  0x74   : > { %p3782_p4 = pneg %p3781_p0 }
  0x76   : > { %p3789_p11 = pnand %p3788_p3, %p3782_p4 }
  0x78   : > { %3792 = shalt.err (!%p3789_p11)
}
  0x79   : > { %3496 = dma.hbm_to_vmem [thread:$0]  (!%p4117_p13), %s4782_s7, 1024, %s366_s13, [#allocation18], %s3958_s9, %s3958_s9, %s3959_s10  }
  0x7a   : > { %s43_s6 = sadd.s32 1, %s3945_s21  ;;  %s47_s24 = sadd.s32 1, %s3949_s22 }
  0x7b   : > { %p45_p3 = scmp.ge.s32.totalorder %s43_s6, 2  ;;  %p51_p11 = scmp.eq.s32.totalorder %s3949_s22, 0 }
  0x7c   : > { %p52_p2 = scmp.eq.s32.totalorder %s3949_s22, 3  ;;  %s66_s3 = sadd.s32 1, %s3933_s18 }
  0x7d   : > { %s4826_s6 = smov (%p45_p3, %s43_s6), 0  ;;  %s4828_s24 = smov (!%p45_p3, %s47_s24), %s3949_s22 }
  0x7e   : > { %p53_p9 = por %p52_p2, %p51_p11  ;;  %p49_p5 = scmp.ge.s32.totalorder %s4828_s24, 4 }
  0x7f   : > { %p73_p6 = scmp.ne.s32.totalorder %s3933_s18, %s3929_s17  ;;  %p74_p13 = scmp.eq.s32.totalorder %s3953_s23, 0 }
  0x80   : > { %s54_s5 = scalar_select %p53_p9, %s3945_s21, 1 }
  0x81   : > { %s4830_s24 = smov (%p49_p5, %s4828_s24), 0  ;;  %p3508_p8 = scmp.lt.s32.totalorder %s3953_s23, 8 }
  0x82   : > { %4783 = sst [smem:[#allocation28_spill]] %s4830_s24  ;;  %p56_p10 = scmp.eq.s32.totalorder %s4830_s24, 0 }
  0x83   : > { %p57_p12 = scmp.eq.s32.totalorder %s4830_s24, 3  ;;  %p4224_p0 = por %p74_p13, %p73_p6 }
  0x84   : > { %s385_s9 = sand.u32 1, %s3933_s18   ;;  %s2940_s30 = sshll.u32 %s54_s5, 10 }
  0x85   : > { %p58_p4 = por %p57_p12, %p56_p10  ;;  %s2750_s12 = sshll.u32 %s385_s9, 6 }
  0x86   : > { %s279_s10 = scalar_select %p52_p2, 1, 0 }
  0x87   : > { %s59_s20 = scalar_select %p58_p4, %s4826_s6, 1 }
  0x88   : > { %s280_s29 = smul.u32 %s3945_s21, %s279_s10  ;;  %s4240_s4 = scalar_lea.hbm %s4737_s0, %s2940_s30 }
  0x89   : > { %s61_s25 = ssub.s32 %s54_s5, %s59_s20  ;;  %s389_s7 = scalar_lea.vmem [#allocation11], %s2750_s12 }
  0x8a   : > { %p64_p1 = scmp.eq.s32.totalorder %s61_s25, 0  ;;  %s403_s24 = sshll.u32 %s389_s7, 4  ;;  %s4250_s24 = int_to_ptr.vmem [resolvable:$true] %s403_s24 }
  0x8b   : > { %s283_s8 = scalar_select %p57_p12, 1, 0 }
  0x8c   : > { %s4234_s16 = scalar_select %p64_p1, %s3933_s18, %s66_s3  }
  0x8d   : > { %s284_s27 = smul.u32 %s283_s8, %s4826_s6  ;;  %p4246_p7 = pnand %p3508_p8, %p4224_p0 }
  0x8e   : > { %s4786_s1 = sadd.s32 1, %s3921_s15  ;;  %s4257_s20 = scalar_lea.sflag [#allocation12], %s385_s9 }
  0x8f   : > { %s286_s3 = ssub.s32 %s280_s29, %s284_s27  ;;  %s3793_s12 = scalar_lea.hbm %s4240_s4, 1024 }
  0x90   : > { %p289_p3 = scmp.eq.s32.totalorder %s286_s3, 0  ;;  %p3794_p11 = scmp.ne.s32.totalorder %s4240_s4, %s3793_s12 }
  0x91   : > { %p3795_p2 = pneg %p4246_p7  ;;  %s3798_s29 = scalar_lea.hbm %s4737_s0, 2048 }
  0x92   : > { %s4255_s5 = scalar_select %p289_p3, %s3921_s15, %s4786_s1  }
  0x93   : > { %p3796_p9 = pnand %p3795_p2, %p3794_p11  ;;  %p3799_p6 = scmp.lt.u32.totalorder %s4240_s4, %s4737_s0 }
  0x94   : > { %p3800_p13 = scmp.lt.u32.totalorder %s3798_s29, %s3793_s12  ;;  %p3802_p10 = scmp.lt.u32.totalorder %s3793_s12, %s4240_s4 }
  0x95   : > { %p3797_p5 = pneg %p3796_p9 }
  0x96   : > { %p3801_p8 = por %p3800_p13, %p3799_p6 }
  0x98   : > { %p3803_p12 = por %p3802_p10, %p3801_p8 }
  0x9a   : > { %p3804_p0 = pnand %p3803_p12, %p3797_p5 }
  0x9c   : > { %3807 = shalt.err (!%p3804_p0)
}
  0x9d   : > { %s3808_s9 = scalar_lea.vmem %s4250_s24, 1024  ;;  %s3960_s8 = smov [#allocation11]  }
  0x9e   : > { %p3809_p4 = scmp.ne.s32.totalorder %s4250_s24, %s3808_s9  ;;  %s3813_s27 = sshll.u32 %s3960_s8, 4  ;;  %s3814_s27 = int_to_ptr.vmem [resolvable:$false] %s3813_s27 }
  0x9f   : > { %s3815_s2 = scalar_lea.vmem %s3814_s27, 2048  ;;  %p3816_p11 = scmp.lt.s32.totalorder %s4250_s24, %s3814_s27 }
  0xa0   : > { %p3811_p1 = pnand %p3809_p4, %p3795_p2  ;;  %p3817_p9 = scmp.lt.s32.totalorder %s3815_s2, %s3808_s9 }
  0xa2   : > { %p3812_p3 = pneg %p3811_p1  ;;  %p3818_p6 = por %p3817_p9, %p3816_p11 }
  0xa4   : > { %p3819_p13 = pnand %p3818_p6, %p3812_p3 }
  0xa6   : > { %3822 = shalt.err (!%p3819_p13)
}
  0xa7   : > { %s3961_s3 = smov 128   ;;  %s3962_s1 = smov 8  }
  0xa8   : > { %3500 = dma.hbm_to_vmem [thread:$0]  (!%p4246_p7), %s4240_s4, 1024, %s4250_s24, %s4257_s20, %s3961_s3, %s3961_s3, %s3962_s1  }
  0xa9   : > { %p4787_p2 = scmp.ne.s32.totalorder %s4777_s11, 0 }
  0xaa   : > { %s417_s12 = sand.u32 (!%p4787_p2), 1, %s3929_s17   ;;  %p4788_p5 = scmp.ne.s32.totalorder (!%p4787_p2), %s4772_s28, 0 }
  0xab   : > { %415 = sbr.rel (%p4787_p2) target bundleno = 1306 (0x51a), region = 60  ;;  %s2754_s7 = sshll.u32 (!%p4787_p2), %s417_s12, 6 }
  0xac   : > { %s418_s13 = scalar_lea.sflag (!%p4787_p2), [#allocation12], %s417_s12  ;;  %s4288_s29 = scalar_lea.vmem (!%p4787_p2), [#allocation11], %s2754_s7 }
  0xb2   : > { %3896 = dma.done.wait (%p4788_p5), %s418_s13, 1024  }
  0xb3   : > { %3898 = vsyncadd (%p4788_p5), %s418_s13, 4294966272  ;;  %p4789_p8 = scmp.ne.s32.totalorder %s4771_s26, 0 }
  0xb5   : > { %3900 = dma.done.wait (%p4789_p8), [#allocation15], 10240  }
  0xb6   : > { %3902 = vsyncadd (%p4789_p8), [#allocation15], 4294957056 }
  0xb7   : > { %3904 = dma.done.wait (%p4789_p8), [#allocation18], 1024  }
  0xb8   : > { %3906 = vsyncadd (%p4789_p8), [#allocation18], 4294966272  ;;  %s467_s4 = sand.u32 1, %s3917_s14   ;;  %p482_p7 = scmp.eq.s32.totalorder %s3937_s19, 0 }
  0xb9   : > { %s2758_s28 = sshll.u32 %s467_s4, 6  ;;  %s4790_s24 = sld [smem:[#allocation25_spill]] }
  0xba   : > { %s4306_s11 = scalar_lea.vmem [#allocation19], %s2758_s28 }
  0xbf   : > { %p2760_p10 = scmp.ne.s32.totalorder %s4790_s24, 0 }
  0xc1   : > { %490 = sbr.rel (%p2760_p10) target bundleno = 486 (0x1e6), region = 80 }
  0xc8   : > { %492 = sbr.rel (!%p482_p7) target bundleno = 207 (0xcf), region = 84  ;;  %v3963_v0 = vmov (%p482_p7), 0.0  }
  0xc9   : > { %493 = vst [vmem:[#allocation5] sm:$0x3] (%p482_p7), %v3963_v0 }
  0xcf PF: > { %v3615_v1 = vld [vmem:[#allocation14] sm:$0xff]   ;;  %v3616_v2 = vld [vmem:[#allocation14 + $0x8] sm:$0xff]   ;;  %v3617_v3 = vld [vmem:[#allocation14 + $0x10] sm:$0xff]   ;;  %s2942_s26 = smul.u32 40, %s3937_s19  ;;  %v3964_v21 = vmov 0  }
  0xd0   : > { %3351 = vmatprep.subr.bf16.mxu0 %v3615_v1  ;;  %3423 = vmatprep.subr.bf16.mxu1 %v3615_v1  ;;  %v3618_v4 = vld [vmem:[#allocation14 + $0x18] sm:$0xff]   ;;  %v505_v5 = vld [vmem:[%s4288_s29] sm:$0xff]  ;;  %v506_v6 = vld [vmem:[%s4288_s29 + $0x8] sm:$0xff] }
  0xd1   : > { %3352 = vmatpush3.bf16.msra.mxu0 %v3615_v1  ;;  %3431 = vmatpush3.bf16.msra.mxu1 %v3615_v1  ;;  %v513_v7 = vpack.c.bf16 %v506_v6, %v505_v5  ;;  %v509_v8 = vld [vmem:[%s4288_s29 + $0x20] sm:$0xff]  ;;  %v510_v9 = vld [vmem:[%s4288_s29 + $0x28] sm:$0xff]  ;;  %v3621_v13 = vld [vmem:[#allocation14 + $0x30] sm:$0xff]   ;;  %s499_s10 = scalar_lea.vmem [#allocation2], %s2942_s26 }
  0xd2   : > { %3353 = vmatprep.subr.bf16.mxu0 %v3616_v2  ;;  %3424 = vmatprep.subr.bf16.mxu1 %v3616_v2  ;;  %v515_v10 = vpack.c.bf16 %v510_v9, %v509_v8  ;;  %v3619_v11 = vld [vmem:[#allocation14 + $0x20] sm:$0xff]   ;;  %v3620_v12 = vld [vmem:[#allocation14 + $0x28] sm:$0xff]   ;;  %v3622_v14 = vld [vmem:[#allocation14 + $0x38] sm:$0xff]   ;;  %500 = vst [vmem:[%s499_s10] sm:$0xf] %v3964_v21 }
  0xd3   : > { %3367 = vmatprep.mubr.bf16.mxu0 %v513_v7  ;;  %v507_v15 = vld [vmem:[%s4288_s29 + $0x10] sm:$0xff]  ;;  %v508_v16 = vld [vmem:[%s4288_s29 + $0x18] sm:$0xff]  ;;  %2763 = vst [vmem:[%s499_s10 + $0x24] sm:$0xf] %v3964_v21 }
  0xd4   : > { %3371 = vmatprep.mubr.bf16.mxu1 %v515_v10  ;;  %v511_v17 = vld [vmem:[%s4288_s29 + $0x30] sm:$0xff]  ;;  %v512_v18 = vld [vmem:[%s4288_s29 + $0x38] sm:$0xff]  ;;  %v514_v19 = vpack.c.bf16 %v508_v16, %v507_v15 }
  0xd5   : > { %3354 = vmatpush3.bf16.msra.mxu0 %v3616_v2  ;;  %3432 = vmatpush3.bf16.msra.mxu1 %v3616_v2  ;;  %v516_v20 = vpack.c.bf16 %v512_v18, %v511_v17  ;;  %v646_v2 = vld [vmem:[#allocation5] sm:$0x1]  ;;  %v662_v5 = vld [vmem:[#allocation5 + $0x1] sm:$0x1] }
  0xd6   : > { %3355 = vmatprep.subr.bf16.mxu0 %v3617_v3  ;;  %3425 = vmatprep.subr.bf16.mxu1 %v3617_v3 }
  0xd9   : > { %3356 = vmatpush3.bf16.msra.mxu0 %v3617_v3  ;;  %3433 = vmatpush3.bf16.msra.mxu1 %v3617_v3 }
  0xda   : > { %3357 = vmatprep.subr.bf16.mxu0 %v3618_v4  ;;  %3426 = vmatprep.subr.bf16.mxu1 %v3618_v4 }
  0xdd   : > { %3358 = vmatpush3.bf16.msra.mxu0 %v3618_v4  ;;  %3434 = vmatpush3.bf16.msra.mxu1 %v3618_v4 }
  0xde   : > { %3359 = vmatprep.subr.bf16.mxu0 %v3619_v11  ;;  %3427 = vmatprep.subr.bf16.mxu1 %v3619_v11 }
  0xe1   : > { %3360 = vmatpush3.bf16.msra.mxu0 %v3619_v11  ;;  %3435 = vmatpush3.bf16.msra.mxu1 %v3619_v11 }
  0xe2   : > { %3361 = vmatprep.subr.bf16.mxu0 %v3620_v12  ;;  %3428 = vmatprep.subr.bf16.mxu1 %v3620_v12 }
  0xe5   : > { %3362 = vmatpush3.bf16.msra.mxu0 %v3620_v12  ;;  %3436 = vmatpush3.bf16.msra.mxu1 %v3620_v12 }
  0xe6   : > { %3363 = vmatprep.subr.bf16.mxu0 %v3621_v13  ;;  %3429 = vmatprep.subr.bf16.mxu1 %v3621_v13 }
  0xe9   : > { %3364 = vmatpush3.bf16.msra.mxu0 %v3621_v13  ;;  %3437 = vmatpush3.bf16.msra.mxu1 %v3621_v13 }
  0xea   : > { %3365 = vmatprep.subr.bf16.mxu0 %v3622_v14  ;;  %3430 = vmatprep.subr.bf16.mxu1 %v3622_v14 }
  0xed   : > { %3366 = vmatpush3.bf16.msra.mxu0 %v3622_v14  ;;  %3438 = vmatpush3.bf16.msra.mxu1 %v3622_v14 }
  0xf0   : > { %3368 = vmatmul.mubr.bf16.vlgmr.msra.gmra.mrb[0].mxu0 %v514_v19  ;;  %3372 = vmatmul.mubr.bf16.vlgmr.msra.gmra.mrb[0].mxu1 %v516_v20 }
 0x1c3   : > { %v3369_v22 = vpop.f32.mrb[0].mxu0  ;;  %v3373_v23 = vpop.f32.mrb[0].mxu1 }
 0x1c4   : > { %v615_v24 = vpop.f32.mrb[1].mxu0  ;;  %v631_v25 = vpop.f32.mrb[1].mxu1  ;;  %v665_v38 = vmul.f32 %v3369_v22, %v3369_v22  ;;  %v669_v50 = vmul.f32 %v3373_v23, %v3373_v23 }
 0x1c5   : > { %v686_v26 = vpack.c.bf16 %v615_v24, %v615_v24  ;;  %v3370_v27 = vpop.f32.mrb[2].mxu0  ;;  %v3374_v28 = vpop.f32.mrb[2].mxu1  ;;  %v663_v33 = vmul.f32 %v615_v24, %v615_v24  ;;  %v667_v42 = vmul.f32 %v631_v25, %v631_v25 }
 0x1c6   : > { %v3046_v29 = vpack.c.bf16 %v631_v25, %v3370_v27  ;;  %v618_v30 = vpop.f32.mrb[3].mxu0  ;;  %v693_v31 = vpack.c.bf16 %v3374_v28, %v3374_v28  ;;  %v634_v32 = vpop.f32.mrb[3].mxu1  ;;  %v666_v41 = vmul.f32 %v3370_v27, %v3370_v27  ;;  %v670_v53 = vmul.f32 %v3374_v28, %v3374_v28 }
 0x1c7   : > { %2773 = vst [vmem:[%s499_s10 + $0x4] sm:$0xf] %v686_v26  ;;  %v647_v34 = vadd.f32 %v618_v30, %v615_v24  ;;  %v664_v35 = vmul.f32 %v618_v30, %v618_v30  ;;  %v3041_v36 = vpack.c.bf16 %v3369_v22, %v618_v30  ;;  %v3051_v37 = vpack.c.bf16 %v3373_v23, %v634_v32 }
 0x1c8   : > { %3138 = vst [vmem:[%s499_s10 + $0x10] sm:$0xff] %v3046_v29   ;;  %2780 = vst [vmem:[%s499_s10 + $0x20] sm:$0xf] %v693_v31  ;;  %v668_v48 = vmul.f32 %v634_v32, %v634_v32 }
 0x1c9   : > { %v648_v39 = vadd.f32 %v3369_v22, %v647_v34  ;;  %v671_v40 = vadd.f32 %v664_v35, %v663_v33  ;;  %3137 = vst [vmem:[%s499_s10 + $0x8] sm:$0xff] %v3041_v36   ;;  %3139 = vst [vmem:[%s499_s10 + $0x18] sm:$0xff] %v3051_v37  }
 0x1cb   : > { %v672_v43 = vadd.f32 %v671_v40, %v665_v38  ;;  %v649_v44 = vadd.f32 %v3370_v27, %v648_v39 }
 0x1cd   : > { %v650_v45 = vadd.f32 %v649_v44, %v631_v25  ;;  %v673_v46 = vadd.f32 %v672_v43, %v666_v41 }
 0x1cf   : > { %v651_v47 = vadd.f32 %v650_v45, %v634_v32  ;;  %v674_v49 = vadd.f32 %v673_v46, %v667_v42 }
 0x1d1   : > { %v652_v51 = vadd.f32 %v3373_v23, %v651_v47  ;;  %v675_v52 = vadd.f32 %v674_v49, %v668_v48 }
 0x1d3   : > { %v653_v54 = vadd.f32 %v3374_v28, %v652_v51  ;;  %v676_v55 = vadd.f32 %v675_v52, %v669_v50 }
 0x1d5   : > { %v654_v56 = vrot.slane %v653_v54, 4  ;;  %v677_v57 = vadd.f32 %v676_v55, %v670_v53 }
 0x1d7   : > { %v655_v58 = vadd.f32 %v654_v56, %v653_v54  ;;  %v678_v59 = vrot.slane %v677_v57, 4 }
 0x1d9   : > { %v656_v60 = vrot.slane %v655_v58, 2  ;;  %v679_v61 = vadd.f32 %v678_v59, %v677_v57 }
 0x1db   : > { %v657_v62 = vadd.f32 %v656_v60, %v655_v58  ;;  %v680_v63 = vrot.slane %v679_v61, 2 }
 0x1dd   : > { %v658_v0 = vrot.slane %v657_v62, 1  ;;  %v681_v1 = vadd.f32 %v680_v63, %v679_v61 }
 0x1df   : > { %v659_v3 = vadd.f32 %v658_v0, %v657_v62  ;;  %v682_v4 = vrot.slane %v681_v1, 1 }
 0x1e1   : > { %v660_v6 = vadd.f32 %v659_v3, %v646_v2  ;;  %v683_v7 = vadd.f32 %v682_v4, %v681_v1 }
 0x1e3   : > { %661 = vst [vmem:[#allocation5] sm:$0x1] %v660_v6  ;;  %v684_v8 = vadd.f32 %v683_v7, %v662_v5 }
 0x1e5   : > { %685 = vst [vmem:[#allocation5 + $0x1] sm:$0x1] %v684_v8 }
 0x1e6 PF: > { %s4791_s20 = sld [smem:[#allocation25_spill]] }
 0x1ec   : > { %p2781_p12 = scmp.ne.s32.totalorder %s4791_s20, 1 }
 0x1ee   : > { %710 = sbr.rel (%p2781_p12) target bundleno = 888 (0x378), region = 92 }
 0x1f5   : > { %712 = sbr.rel (!%p482_p7) target bundleno = 530 (0x212), region = 96  ;;  %v714_v9 = vld [vmem:[#allocation5] sm:$0x1] (%p482_p7)  ;;  %v716_v10 = vld [vmem:[#allocation5 + $0x1] sm:$0x1] (%p482_p7)  ;;  %v3965_v11 = vmov (%p482_p7), 0.0  }
 0x1f6   : > { %713 = vst [vmem:[#allocation6] sm:$0x3] (%p482_p7), %v3965_v11  ;;  %v715_v12 = vmul.f32 (%p482_p7), 0.0078125, %v714_v9  ;;  %v717_v13 = vmul.f32 (%p482_p7), 0.0078125, %v716_v10  ;;  %s4792_s9 = sld [smem:[#allocation30_spill]] (%p482_p7)  ;;  %s4793_s2 = sld [smem:[#allocation31_spill]] (%p482_p7) }
 0x1f8   : > { %v718_v14 = vmul.f32 (%p482_p7), %v715_v12, %v715_v12 }
 0x1fa   : > { %v719_v15 = vsub.f32 (%p482_p7), %v717_v13, %v718_v14 }
 0x1fc   : > { %v720_v16 = vmax.f32 %v719_v15, 0.0  ;;  %v723_v18 = vld [vmem:[%s4792_s9] sm:$0x1] }
 0x1fd   : > { %v725_v21 = vld [vmem:[%s4793_s2] sm:$0x1] }
 0x1fe   : > { %v721_v17 = vadd.f32 1e-05, %v720_v16 }
 0x200   : > { %3623 = vrsqrt.f32 %v721_v17 }
 0x20a   : > { %v3624_v19 = vpop.eup %3623 }
 0x20b   : > { %v724_v20 = vmul.f32 %v3624_v19, %v723_v18 }
 0x20d   : > { %728 = vst [vmem:[#allocation8] sm:$0x1] %v724_v20  ;;  %v726_v22 = vmul.f32 %v724_v20, %v715_v12 }
 0x20f   : > { %v727_v23 = vsub.f32 %v725_v21, %v726_v22 }
 0x211   : > { %729 = vst [vmem:[#allocation8 + $0x1] sm:$0x1] %v727_v23 }
 0x212 PF: > { %v3625_v24 = vld [vmem:[#allocation16 + $0x40] sm:$0xff]   ;;  %v3629_v28 = vld [vmem:[#allocation16 + $0x48] sm:$0xff]   ;;  %v3633_v32 = vld [vmem:[#allocation16 + $0x50] sm:$0xff]   ;;  %v3966_v46 = vmov 0.0   ;;  %vm894_vm0 = vcmask 1040384   ;;  %s2943_s3 = smul.u32 40, %s3937_s19 }
 0x213   : > { %v3626_v25 = vld [vmem:[#allocation16 + $0xc0] sm:$0xff]   ;;  %3167 = vmatprep.subr.bf16.mxu0 %v3625_v24  ;;  %v3630_v29 = vld [vmem:[#allocation16 + $0xc8] sm:$0xff]   ;;  %v3634_v33 = vld [vmem:[#allocation16 + $0xd0] sm:$0xff]   ;;  %v4329_v47 = vrot.slane %v3966_v46, 7  ;;  %vm965_vm1 = vsmask.f32 3328 }
 0x214   : > { %v3627_v26 = vld [vmem:[#allocation16] sm:$0xff]   ;;  %3207 = vmatprep.subr.bf16.mxu1 %v3626_v25  ;;  %v3631_v30 = vld [vmem:[#allocation16 + $0x8] sm:$0xff]   ;;  %v3635_v34 = vld [vmem:[#allocation16 + $0x10] sm:$0xff]   ;;  %s4340_s1 = scalar_lea.vmem [#allocation2], %s2943_s3  ;;  %vm1080_vm2 = vcmask 1042432   ;;  %vm1081_vm3 = vcmask 1046532  }
 0x215   : > { %v3628_v27 = vld [vmem:[#allocation16 + $0x80] sm:$0xff]   ;;  %3168 = vmatpush3.bf16.msra.mxu0 %v3627_v26  ;;  %v3632_v31 = vld [vmem:[#allocation16 + $0x88] sm:$0xff]   ;;  %v3636_v35 = vld [vmem:[#allocation16 + $0x90] sm:$0xff]   ;;  %v895_v52 = vsel %vm894_vm0, 0.0, %v4329_v47  ;;  %v905_v60 = vsel %vm894_vm0, %v4329_v47, 0.0  ;;  %s3033_s12 = sshll.u32 %s3937_s19, 5 }
 0x216   : > { %3208 = vmatpush3.bf16.msra.mxu1 %v3628_v27  ;;  %3169 = vmatprep.subr.bf16.mxu0 %v3629_v28  ;;  %v3637_v36 = vld [vmem:[#allocation16 + $0x58] sm:$0xff]   ;;  %v3641_v40 = vld [vmem:[#allocation16 + $0x60] sm:$0xff]   ;;  %v3645_v44 = vld [vmem:[#allocation16 + $0x68] sm:$0xff]   ;;  %v4334_v56 = vpack.c.bf16 %v895_v52, %v895_v52  ;;  %v2945_v6 = vpack.c.bf16 %v905_v60, %v905_v60  ;;  %vm966_vm5 = vsmask.f32 7440  ;;  %s2187_s7 = scalar_lea.vmem [#allocation3], %s3033_s12 }
 0x217   : > { %3209 = vmatprep.subr.bf16.mxu1 %v3630_v29  ;;  %v3638_v37 = vld [vmem:[#allocation16 + $0xd8] sm:$0xff]   ;;  %v3642_v41 = vld [vmem:[#allocation16 + $0xe0] sm:$0xff]   ;;  %v3646_v45 = vld [vmem:[#allocation16 + $0xe8] sm:$0xff]  }
 0x218   : > { %v3639_v38 = vld [vmem:[#allocation16 + $0x18] sm:$0xff]   ;;  %v3643_v42 = vld [vmem:[#allocation16 + $0x20] sm:$0xff]   ;;  %v3647_v48 = vld [vmem:[#allocation16 + $0x28] sm:$0xff]   ;;  %v969_v63 = vshrl.u32 %v4334_v56, 16  ;;  %v972_v0 = vshll.u32 %v4334_v56, 16  ;;  %v978_v15 = vshll.u32 %v2945_v6, 16 }
 0x219   : > { %3170 = vmatpush3.bf16.msra.mxu0 %v3631_v30  ;;  %v3640_v39 = vld [vmem:[#allocation16 + $0x98] sm:$0xff]   ;;  %v3644_v43 = vld [vmem:[#allocation16 + $0xa0] sm:$0xff]   ;;  %v3648_v49 = vld [vmem:[#allocation16 + $0xa8] sm:$0xff]  }
 0x21a   : > { %3210 = vmatpush3.bf16.msra.mxu1 %v3632_v31  ;;  %3171 = vmatprep.subr.bf16.mxu0 %v3633_v32  ;;  %v3649_v50 = vld [vmem:[#allocation16 + $0x70] sm:$0xff]   ;;  %v3653_v55 = vld [vmem:[#allocation16 + $0x78] sm:$0xff]   ;;  %v737_v62 = vld [vmem:[%s4340_s1 + $0x4] ss:$28 sps:$4 sm:$0xff]   ;;  %v971_v9 = vrot.slane %v969_v63, 4  ;;  %v974_v10 = vrot.slane %v972_v0, 5 }
 0x21b   : > { %3211 = vmatprep.subr.bf16.mxu1 %v3634_v33  ;;  %v3650_v51 = vld [vmem:[#allocation16 + $0xf0] sm:$0xff]   ;;  %v3654_v57 = vld [vmem:[#allocation16 + $0xf8] sm:$0xff]   ;;  %v747_v2 = vunpack.c.l.bf16 %v737_v62  ;;  %v3657_v3 = vld [vmem:[#allocation16 + $0x140] sm:$0xff]   ;;  %v754_v12 = vunpack.c.h.bf16 %v737_v62  ;;  %v980_v23 = vrot.slane %v978_v15, 5 }
 0x21c   : > { %v3651_v53 = vld [vmem:[#allocation16 + $0x30] sm:$0xff]   ;;  %v3655_v58 = vld [vmem:[#allocation16 + $0x38] sm:$0xff]   ;;  %v3658_v11 = vld [vmem:[#allocation16 + $0x1c0] sm:$0xff]   ;;  %v975_v19 = vor.u32 %v974_v10, %v971_v9 }
 0x21d   : > { %3172 = vmatpush3.bf16.msra.mxu0 %v3635_v34  ;;  %v3652_v54 = vld [vmem:[#allocation16 + $0xb0] sm:$0xff]   ;;  %v3656_v59 = vld [vmem:[#allocation16 + $0xb8] sm:$0xff]   ;;  %vm2973_vm4 = vmneg %vm894_vm0 }
 0x21e   : > { %3212 = vmatpush3.bf16.msra.mxu1 %v3636_v35  ;;  %3173 = vmatprep.subr.bf16.mxu0 %v3637_v36  ;;  %v4338_v61 = vld [vmem:[#allocation8] ss:$0 sm:$0xff]  ;;  %v3140_v1 = vld [vmem:[%s4340_s1 + $0x8] sm:$0xff]   ;;  %v4346_v4 = vld [vmem:[#allocation8 + $0x1] ss:$0 sm:$0xff]  ;;  %v976_v30 = vrot.slane %v975_v19, 4 }
 0x21f   : > { %3213 = vmatprep.subr.bf16.mxu1 %v3638_v37  ;;  %v3055_v5 = vunpack.c.l.bf16 %v3140_v1  ;;  %v761_v7 = vmul.f32 %v4338_v61, %v747_v2  ;;  %v3056_v17 = vunpack.c.h.bf16 %v3140_v1  ;;  %v768_v20 = vmul.f32 %v4338_v61, %v754_v12  ;;  %vm4370_vm6 = vmpackc.low %vm2973_vm4, %vm2973_vm4  ;;  %v3660_v60 = vld [vmem:[#allocation16 + $0x180] sm:$0xff]   ;;  %v3664_v15 = vld [vmem:[#allocation16 + $0x188] sm:$0xff]  }
 0x220   : > { %v2801_v35 = vrot.slane %v4334_v56, 9  ;;  %vm4379_vm7 = vmor %vm965_vm1, %vm966_vm5 }
 0x221   : > { %3174 = vmatpush3.bf16.msra.mxu0 %v3639_v38  ;;  %v762_v8 = vmul.f32 %v3055_v5, %v4338_v61  ;;  %v775_v13 = vadd.f32 %v4346_v4, %v761_v7  ;;  %v763_v26 = vmul.f32 %v3056_v17, %v4338_v61  ;;  %v782_v31 = vadd.f32 %v4346_v4, %v768_v20  ;;  %vm4392_vm8 = vmor %vm1080_vm2, %vm1081_vm3 }
 0x222   : > { %3214 = vmatpush3.bf16.msra.mxu1 %v3640_v39  ;;  %3175 = vmatprep.subr.bf16.mxu0 %v3641_v40  ;;  %v3694_v40 = vld [vmem:[#allocation16 + $0x228] sm:$0xff]  }
 0x223   : > { %3215 = vmatprep.subr.bf16.mxu1 %v3642_v41  ;;  %v776_v14 = vadd.f32 %v4346_v4, %v762_v8  ;;  %v785_v16 = vmax.f32 %v775_v13, 0.0 }
 0x225   : > { %3176 = vmatpush3.bf16.msra.mxu0 %v3643_v42  ;;  %v786_v18 = vmax.f32 %v776_v14, 0.0  ;;  %v4353_v21 = vrot.slane %v785_v16, 7  ;;  %v3661_v14 = vld [vmem:[#allocation16 + $0x148] sm:$0xff]  }
 0x226   : > { %3216 = vmatpush3.bf16.msra.mxu1 %v3644_v43  ;;  %3177 = vmatprep.subr.bf16.mxu0 %v3645_v44  ;;  %v1085_v43 = vrot.slane %v2945_v6, 5  ;;  %v777_v44 = vadd.f32 %v4346_v4, %v763_v26  ;;  %v3659_v6 = vld [vmem:[#allocation16 + $0x100] sm:$0xff]  }
 0x227   : > { %3217 = vmatprep.subr.bf16.mxu1 %v3646_v45  ;;  %v4355_v22 = vrot.slane %v786_v18, 7  ;;  %v896_v24 = vsel %vm894_vm0, 0.0, %v4353_v21  ;;  %v906_v25 = vsel %vm894_vm0, %v4353_v21, 0.0  ;;  %v2976_v9 = vpack.c.bf16 %v4353_v21, %v4329_v47 }
 0x228   : > { %v2946_v28 = vpack.c.bf16 %v896_v24, %v896_v24  ;;  %v2947_v29 = vpack.c.bf16 %v906_v25, %v906_v25  ;;  %v787_v62 = vmax.f32 %v777_v44, 0.0  ;;  %v3666_v24 = vld [vmem:[#allocation16 + $0x1d0] sm:$0xff]  }
 0x229   : > { %3178 = vmatpush3.bf16.msra.mxu0 %v3647_v48  ;;  %v897_v27 = vsel %vm894_vm0, 0.0, %v4355_v22  ;;  %v907_v32 = vsel %vm894_vm0, %v4355_v22, 0.0  ;;  %v2996_v39 = vpack.c.bf16 %v4355_v22, %v4353_v21 }
 0x22a   : > { %3218 = vmatpush3.bf16.msra.mxu1 %v3648_v49  ;;  %3179 = vmatprep.subr.bf16.mxu0 %v3649_v50  ;;  %v4368_v33 = vpack.c.bf16 %v897_v27, %v897_v27  ;;  %v983_v36 = vshrl.u32 %v2946_v28, 16  ;;  %v986_v37 = vshll.u32 %v2946_v28, 16  ;;  %v992_v38 = vshll.u32 %v2947_v29, 16  ;;  %v4432_v27 = vld [vmem:[%s4340_s1 + $0x18] sm:$0xff]  }
 0x22b   : > { %3219 = vmatprep.subr.bf16.mxu1 %v3650_v51  ;;  %v4386_v45 = vpack.c.bf16 %v907_v32, %v907_v32  ;;  %2997 = vmatprep.mubr.msk.bf16.mxu1 %vm4370_vm6, %v2996_v39  ;;  %v792_v50 = vmax.f32 %v782_v31, 0.0  ;;  %v4412_v7 = vrot.slane %v787_v62, 7  ;;  %v3663_v32 = vld [vmem:[#allocation16 + $0x108] sm:$0xff]  }
 0x22c   : > { %v997_v41 = vshrl.u32 %v4368_v33, 16  ;;  %v1000_v42 = vshll.u32 %v4368_v33, 16  ;;  %v985_v46 = vrot.slane %v983_v36, 4  ;;  %v988_v48 = vrot.slane %v986_v37, 5 }
 0x22d   : > { %3180 = vmatpush3.bf16.msra.mxu0 %v3651_v53  ;;  %v3141_v53 = vld [vmem:[%s4340_s1 + $0x10] sm:$0xff]   ;;  %v994_v56 = vrot.slane %v992_v38, 5  ;;  %v1006_v1 = vshll.u32 %v4386_v45, 16  ;;  %v898_v16 = vsel %vm894_vm0, 0.0, %v4412_v7  ;;  %v908_v17 = vsel %vm894_vm0, %v4412_v7, 0.0 }
 0x22e   : > { %3220 = vmatpush3.bf16.msra.mxu1 %v3652_v54  ;;  %3181 = vmatprep.subr.bf16.mxu0 %v3653_v55  ;;  %v999_v51 = vrot.slane %v997_v41, 4  ;;  %v1002_v52 = vrot.slane %v1000_v42, 5  ;;  %v4399_v54 = vsel %vm4379_vm7, %v976_v30, %v980_v23  ;;  %v989_v55 = vor.u32 %v988_v48, %v985_v46  ;;  %v3668_v46 = vld [vmem:[#allocation16 + $0x190] sm:$0xff]  }
 0x22f   : > { %3221 = vmatprep.subr.bf16.mxu1 %v3654_v57  ;;  %v4403_v57 = vsel %vm4392_vm8, %v2801_v35, %v1085_v43  ;;  %v3059_v2 = vunpack.c.l.bf16 %v3141_v53  ;;  %v3060_v18 = vunpack.c.h.bf16 %v3141_v53  ;;  %v1008_v20 = vrot.slane %v1006_v1, 5  ;;  %v3665_v43 = vld [vmem:[#allocation16 + $0x150] sm:$0xff]   ;;  %v3669_v1 = vld [vmem:[#allocation16 + $0x158] sm:$0xff]  }
 0x230   : > { %v990_v63 = vrot.slane %v989_v55, 4  ;;  %v1003_v0 = vor.u32 %v1002_v52, %v999_v51  ;;  %v2950_v21 = vpack.c.bf16 %v898_v16, %v898_v16  ;;  %v2951_v23 = vpack.c.bf16 %v908_v17, %v908_v17 }
 0x231   : > { %3182 = vmatpush3.bf16.msra.mxu0 %v3655_v58  ;;  %v2802_v58 = vrot.slane %v2946_v28, 9  ;;  %v764_v12 = vmul.f32 %v3059_v2, %v4338_v61  ;;  %v2803_v26 = vrot.slane %v4368_v33, 9  ;;  %v1093_v31 = vrot.slane %v4386_v45, 5 }
 0x232   : > { %3222 = vmatpush3.bf16.msra.mxu1 %v3656_v59  ;;  %3247 = vmatprep.subr.bf16.mxu0 %v3657_v3  ;;  %v1089_v59 = vrot.slane %v2947_v29, 5  ;;  %v4406_v3 = vrot.slane %v792_v50, 7  ;;  %v4416_v8 = vsel %vm4379_vm7, %v990_v63, %v994_v56  ;;  %v1004_v19 = vrot.slane %v1003_v0, 4  ;;  %v3670_v56 = vld [vmem:[#allocation16 + $0x1d8] sm:$0xff]  }
 0x233   : > { %3287 = vmatprep.subr.bf16.mxu1 %v3658_v11  ;;  %v3662_v11 = vld [vmem:[#allocation16 + $0x1c8] sm:$0xff]   ;;  %v2819_v13 = vcombine.low %v4399_v54, %v4416_v8  ;;  %v778_v25 = vadd.f32 %v4346_v4, %v764_v12  ;;  %v1011_v28 = vshrl.u32 %v2950_v21, 16  ;;  %v1014_v29 = vshll.u32 %v2950_v21, 16  ;;  %v3672_v12 = vld [vmem:[#allocation16 + $0x198] sm:$0xff]  }
 0x234   : > { %v4410_v5 = vsel %vm4392_vm8, %v2802_v58, %v1089_v59  ;;  %v1020_v30 = vshll.u32 %v2951_v23, 16  ;;  %v2804_v36 = vrot.slane %v2950_v21, 9  ;;  %v1097_v37 = vrot.slane %v2951_v23, 5  ;;  %v3667_v59 = vld [vmem:[#allocation16 + $0x110] sm:$0xff]  }
 0x235   : > { %v2823_v10 = vcombine.low %v4403_v57, %v4410_v5  ;;  %1843 = vmatprep.mubr.bf16.mxu0 %v2819_v13  ;;  %v788_v35 = vmax.f32 %v778_v25, 0.0  ;;  %v765_v38 = vmul.f32 %v3060_v18, %v4338_v61  ;;  %v4440_v33 = vsel %vm894_vm0, 0.0, %v4406_v3 }
 0x236   : > { %2977 = vmatmul.mubr.msk.bf16.vlgmr.msra.gmra.mrb[0].mxu0 %vm4370_vm6, %v2976_v9  ;;  %v1013_v39 = vrot.slane %v1011_v28, 4  ;;  %v1016_v41 = vrot.slane %v1014_v29, 5  ;;  %v4444_v42 = vsel %vm4392_vm8, %v2803_v26, %v1093_v31  ;;  %v4450_v45 = vsel %vm4392_vm8, %v2804_v36, %v1097_v37  ;;  %v3676_v31 = vld [vmem:[#allocation16 + $0x1a0] sm:$0xff]  }
 0x237   : > { %1909 = vmatmul.mubr.bf16.vlgmr.msra.gmra.mrb[0].mxu1 %v2823_v10  ;;  %3248 = vmatpush3.bf16.msra.mxu0 %v3659_v6  ;;  %v4446_v44 = vrot.slane %v788_v35, 7  ;;  %v779_v48 = vadd.f32 %v4346_v4, %v765_v38  ;;  %v3063_v50 = vunpack.c.l.bf16 %v4432_v27  ;;  %v4456_v51 = vsel %vm4379_vm7, %v1004_v19, %v1008_v20  ;;  %v3673_v19 = vld [vmem:[#allocation16 + $0x160] sm:$0xff]  }
 0x238   : > { %3288 = vmatpush3.bf16.msra.mxu1 %v3660_v60  ;;  %3249 = vmatprep.subr.bf16.mxu0 %v3661_v14  ;;  %v1017_v52 = vor.u32 %v1016_v41, %v1013_v39  ;;  %v1022_v53 = vrot.slane %v1020_v30, 5  ;;  %v4460_v55 = vcombine.low %v4444_v42, %v4450_v45  ;;  %v4473_v10 = vpack.c.bf16 %v4412_v7, %v4355_v22  ;;  %v3674_v22 = vld [vmem:[#allocation16 + $0x1e0] sm:$0xff]   ;;  %v3677_v39 = vld [vmem:[#allocation16 + $0x168] sm:$0xff]  }
 0x239   : > { %3289 = vmatprep.subr.bf16.mxu1 %v3662_v11  ;;  %v3001_v58 = vpack.c.bf16 %v4446_v44, %v4412_v7  ;;  %v789_v60 = vmax.f32 %v779_v48, 0.0  ;;  %v899_v62 = vsel %vm894_vm0, 0.0, %v4446_v44  ;;  %v909_v63 = vsel %vm894_vm0, %v4446_v44, 0.0  ;;  %v3671_v11 = vld [vmem:[#allocation16 + $0x118] sm:$0xff]   ;;  %v3675_v30 = vld [vmem:[#allocation16 + $0x120] sm:$0xff]   ;;  %v3678_v41 = vld [vmem:[#allocation16 + $0x1e8] sm:$0xff]  }
 0x23a   : > { %v1018_v0 = vrot.slane %v1017_v52, 4  ;;  %v2952_v2 = vpack.c.bf16 %v899_v62, %v899_v62  ;;  %v2953_v6 = vpack.c.bf16 %v909_v63, %v909_v63  ;;  %v766_v9 = vmul.f32 %v3063_v50, %v4338_v61  ;;  %v3680_v52 = vld [vmem:[#allocation16 + $0x1a8] sm:$0xff]  }
 0x23b   : > { %3250 = vmatpush3.bf16.msra.mxu0 %v3663_v32  ;;  %3002 = vmatprep.mubr.msk.bf16.mxu1 %vm4370_vm6, %v3001_v58  ;;  %v4475_v13 = vrot.slane %v789_v60, 7  ;;  %v3064_v14 = vunpack.c.h.bf16 %v4432_v27 }
 0x23c   : > { %3290 = vmatpush3.bf16.msra.mxu1 %v3664_v15  ;;  %3251 = vmatprep.subr.bf16.mxu0 %v3665_v43  ;;  %v4480_v15 = vsel %vm4379_vm7, %v1018_v0, %v1022_v53  ;;  %v1025_v16 = vshrl.u32 %v2952_v2, 16  ;;  %v1028_v17 = vshll.u32 %v2952_v2, 16  ;;  %v1034_v18 = vshll.u32 %v2953_v6, 16  ;;  %v3682_v0 = vld [vmem:[#allocation16 + $0x1f0] sm:$0xff]  }
 0x23d   : > { %3291 = vmatprep.subr.bf16.mxu1 %v3666_v24  ;;  %v4485_v7 = vcombine.low %v4456_v51, %v4480_v15  ;;  %v900_v20 = vsel %vm894_vm0, 0.0, %v4475_v13  ;;  %v910_v21 = vsel %vm894_vm0, %v4475_v13, 0.0  ;;  %v780_v23 = vadd.f32 %v4346_v4, %v766_v9 }
 0x23e   : > { %v2954_v24 = vpack.c.bf16 %v900_v20, %v900_v20  ;;  %v2955_v25 = vpack.c.bf16 %v910_v21, %v910_v21  ;;  %v1027_v26 = vrot.slane %v1025_v16, 4  ;;  %v1030_v27 = vrot.slane %v1028_v17, 5  ;;  %v3681_v16 = vld [vmem:[#allocation16 + $0x170] sm:$0xff]  }
 0x23f   : > { %1917 = vmatmul.mubr.bf16.gmra.mrb[4].mxu1 %v4460_v55  ;;  %3252 = vmatpush3.bf16.msra.mxu0 %v3667_v59  ;;  %v790_v28 = vmax.f32 %v780_v23, 0.0  ;;  %v2805_v29 = vrot.slane %v2952_v2, 9  ;;  %v767_v32 = vmul.f32 %v3064_v14, %v4338_v61  ;;  %v1036_v61 = vrot.slane %v1034_v18, 5 }
 0x240   : > { %3292 = vmatpush3.bf16.msra.mxu1 %v3668_v46  ;;  %3253 = vmatprep.subr.bf16.mxu0 %v3669_v1  ;;  %v1031_v35 = vor.u32 %v1030_v27, %v1027_v26  ;;  %v1039_v36 = vshrl.u32 %v2954_v24, 16  ;;  %v1042_v37 = vshll.u32 %v2954_v24, 16  ;;  %v1048_v38 = vshll.u32 %v2955_v25, 16 }
 0x241   : > { %3293 = vmatprep.subr.bf16.mxu1 %v3670_v56  ;;  %1851 = vmatprep.mubr.bf16.mxu0 %v4485_v7  ;;  %v4497_v43 = vrot.slane %v790_v28, 7  ;;  %v1101_v46 = vrot.slane %v2953_v6, 5  ;;  %v2806_v48 = vrot.slane %v2954_v24, 9  ;;  %v1105_v50 = vrot.slane %v2955_v25, 5  ;;  %v3686_v24 = vld [vmem:[#allocation16 + $0x1f8] sm:$0xff]  }
 0x242   : > { %2982 = vmatmul.mubr.msk.bf16.gmra.mrb[4].mxu0 %vm4370_vm6, %v4473_v10  ;;  %v1032_v53 = vrot.slane %v1031_v35, 4  ;;  %v1041_v56 = vrot.slane %v1039_v36, 4  ;;  %v1044_v58 = vrot.slane %v1042_v37, 5  ;;  %v781_v63 = vadd.f32 %v4346_v4, %v767_v32  ;;  %v3683_v35 = vld [vmem:[#allocation16 + $0x130] sm:$0xff]  }
 0x243   : > { %3254 = vmatpush3.bf16.msra.mxu0 %v3671_v11  ;;  %v3006_v59 = vpack.c.bf16 %v4497_v43, %v4475_v13  ;;  %v4503_v60 = vsel %vm4392_vm8, %v2805_v29, %v1101_v46  ;;  %v4507_v62 = vsel %vm4392_vm8, %v2806_v48, %v1105_v50  ;;  %v1050_v2 = vrot.slane %v1048_v38, 5  ;;  %v3679_v11 = vld [vmem:[#allocation16 + $0x128] sm:$0xff]   ;;  %v3687_v46 = vld [vmem:[#allocation16 + $0x138] sm:$0xff]  }
 0x244   : > { %3294 = vmatpush3.bf16.msra.mxu1 %v3672_v12  ;;  %3255 = vmatprep.subr.bf16.mxu0 %v3673_v19  ;;  %v1045_v1 = vor.u32 %v1044_v58, %v1041_v56  ;;  %v4512_v6 = vcombine.low %v4503_v60, %v4507_v62  ;;  %v901_v9 = vsel %vm894_vm0, 0.0, %v4497_v43  ;;  %v791_v12 = vmax.f32 %v781_v63, 0.0 }
 0x245   : > { %3295 = vmatprep.subr.bf16.mxu1 %v3674_v22  ;;  %3007 = vmatprep.mubr.msk.bf16.mxu1 %vm4370_vm6, %v3006_v59  ;;  %v911_v4 = vsel %vm894_vm0, %v4497_v43, 0.0  ;;  %v2956_v14 = vpack.c.bf16 %v901_v9, %v901_v9  ;;  %v4522_v17 = vsel %vm4379_vm7, %v1032_v53, %v1036_v61  ;;  %v3684_v22 = vld [vmem:[#allocation16 + $0x1b0] sm:$0xff]   ;;  %v4531_v26 = vpack.c.bf16 %v4475_v13, %v4446_v44  ;;  %v3685_v44 = vld [vmem:[#allocation16 + $0x178] sm:$0xff]   ;;  %v3689_v61 = vld [vmem:[#allocation16 + $0x200] sm:$0xff]  }
 0x246   : > { %v1046_v18 = vrot.slane %v1045_v1, 4  ;;  %v2957_v19 = vpack.c.bf16 %v911_v4, %v911_v4  ;;  %v881_v20 = vrot.slane %v791_v12, 7  ;;  %v3688_v13 = vld [vmem:[#allocation16 + $0x1b8] sm:$0xff]  }
 0x247   : > { %3256 = vmatpush3.bf16.msra.mxu0 %v3675_v30  ;;  %1925 = vmatmul.mubr.bf16.gmra.mrb[8].mxu1 %v4512_v6  ;;  %v1053_v21 = vshrl.u32 %v2956_v14, 16  ;;  %v1056_v23 = vshll.u32 %v2956_v14, 16  ;;  %v2807_v27 = vrot.slane %v2956_v14, 9 }
 0x248   : > { %3296 = vmatpush3.bf16.msra.mxu1 %v3676_v31  ;;  %3257 = vmatprep.subr.bf16.mxu0 %v3677_v39  ;;  %v4527_v25 = vsel %vm4379_vm7, %v1046_v18, %v1050_v2  ;;  %v1109_v28 = vrot.slane %v2957_v19, 5  ;;  %v902_v30 = vsel %vm894_vm0, 0.0, %v881_v20  ;;  %v912_v31 = vsel %vm894_vm0, %v881_v20, 0.0 }
 0x249   : > { %3297 = vmatprep.subr.bf16.mxu1 %v3678_v41  ;;  %v2821_v29 = vcombine.low %v4522_v17, %v4527_v25  ;;  %v1055_v32 = vrot.slane %v1053_v21, 4  ;;  %v2958_v36 = vpack.c.bf16 %v902_v30, %v902_v30  ;;  %v2959_v37 = vpack.c.bf16 %v912_v31, %v912_v31  ;;  %v3690_v31 = vld [vmem:[#allocation16 + $0x208] sm:$0xff]  }
 0x24a   : > { %v1058_v38 = vrot.slane %v1056_v23, 5  ;;  %v1062_v39 = vshll.u32 %v2957_v19, 16  ;;  %v3011_v41 = vpack.c.bf16 %v4406_v3, %v881_v20  ;;  %v4545_v56 = vsel %vm4392_vm8, %v2807_v27, %v1109_v28 }
 0x24b   : > { %3258 = vmatpush3.bf16.msra.mxu0 %v3679_v11  ;;  %1859 = vmatprep.mubr.bf16.mxu0 %v2821_v29  ;;  %v1067_v50 = vshrl.u32 %v2958_v36, 16  ;;  %v1076_v53 = vshll.u32 %v2959_v37, 16  ;;  %v2808_v58 = vrot.slane %v2958_v36, 9  ;;  %v1113_v59 = vrot.slane %v2959_v37, 5  ;;  %v3692_v37 = vld [vmem:[#allocation16 + $0x218] sm:$0xff]  }
 0x24c   : > { %3298 = vmatpush3.bf16.msra.mxu1 %v3680_v52  ;;  %3259 = vmatprep.subr.bf16.mxu0 %v3681_v16  ;;  %v1059_v48 = vor.u32 %v1058_v38, %v1055_v32  ;;  %v1070_v52 = vshll.u32 %v2958_v36, 16  ;;  %v4553_v11 = vpack.c.bf16 %v4440_v33, %v4440_v33  ;;  %v2991_v21 = vpack.c.bf16 %v881_v20, %v4497_v43 }
 0x24d   : > { %3299 = vmatprep.subr.bf16.mxu1 %v3682_v0  ;;  %2987 = vmatmul.mubr.msk.bf16.gmra.mrb[8].mxu0 %vm4370_vm6, %v4531_v26  ;;  %v1064_v0 = vrot.slane %v1062_v39, 5  ;;  %v1069_v1 = vrot.slane %v1067_v50, 4  ;;  %v4549_v9 = vsel %vm4392_vm8, %v2808_v58, %v1113_v59  ;;  %v1078_v4 = vrot.slane %v1076_v53, 5  ;;  %v3696_v39 = vld [vmem:[#allocation16 + $0x238] sm:$0xff]  }
 0x24e   : > { %3012 = vmatprep.mubr.msk.bf16.mxu1 %vm4370_vm6, %v3011_v41  ;;  %v1060_v63 = vrot.slane %v1059_v48, 4  ;;  %v1072_v2 = vrot.slane %v1070_v52, 5  ;;  %v4557_v14 = vcombine.low %v4545_v56, %v4549_v9  ;;  %v1121_v33 = vshrl.u32 %v4553_v11, 16 }
 0x24f   : > { %3260 = vmatpush3.bf16.msra.mxu0 %v3683_v35  ;;  %v1124_v19 = vshll.u32 %v4553_v11, 16  ;;  %v913_v23 = vsel %vm894_vm0, %v4406_v3, 0.0  ;;  %v2835_v27 = vcombine.low %v4410_v5, %v4444_v42  ;;  %v2831_v5 = vcombine.low %v4416_v8, %v4456_v51  ;;  %v3691_v42 = vld [vmem:[#allocation16 + $0x210] sm:$0xff]   ;;  %v3693_v51 = vld [vmem:[#allocation16 + $0x220] sm:$0xff]  }
 0x250   : > { %3300 = vmatpush3.bf16.msra.mxu1 %v3684_v22  ;;  %3261 = vmatprep.subr.bf16.mxu0 %v3685_v44  ;;  %v1073_v12 = vor.u32 %v1072_v2, %v1069_v1  ;;  %v4561_v16 = vsel %vm4379_vm7, %v1060_v63, %v1064_v0  ;;  %v1123_v28 = vrot.slane %v1121_v33, 4  ;;  %v2836_v32 = vcombine.low %v4450_v45, %v4503_v60 }
 0x251   : > { %3301 = vmatprep.subr.bf16.mxu1 %v3686_v24  ;;  %1933 = vmatmul.mubr.bf16.gmra.mrb[12].mxu1 %v4557_v14  ;;  %v1126_v30 = vrot.slane %v1124_v19, 5  ;;  %v2832_v45 = vcombine.low %v4480_v15, %v4522_v17  ;;  %v2811_v60 = vrot.slane %v4553_v11, 9  ;;  %v3031_v38 = vpack.c.bf16 %v4329_v47, %v4406_v3 }
 0x252   : > { %v1074_v18 = vrot.slane %v1073_v12, 4  ;;  %2038 = vmatprep.mubr.bf16.mxu1 %v4485_v7  ;;  %v2961_v7 = vpack.c.bf16 %v913_v23, %v913_v23 }
 0x253   : > { %3262 = vmatpush3.bf16.msra.mxu0 %v3687_v46  ;;  %v1127_v43 = vor.u32 %v1126_v30, %v1123_v28 }
 0x254   : > { %3302 = vmatpush3.bf16.msra.mxu1 %v3688_v13  ;;  %3375 = vmatprep.subr.bf16.mxu0 %v3689_v61  ;;  %v4569_v22 = vsel %vm4379_vm7, %v1074_v18, %v1078_v4  ;;  %v1130_v20 = vshll.u32 %v2961_v7, 16 }
 0x255   : > { %3439 = vmatprep.subr.bf16.mxu1 %v3689_v61  ;;  %v2822_v24 = vcombine.low %v4561_v16, %v4569_v22  ;;  %v1128_v35 = vrot.slane %v1127_v43, 4 }
 0x256   : > { %v1132_v36 = vrot.slane %v1130_v20, 5 }
 0x257   : > { %1867 = vmatprep.mubr.bf16.mxu0 %v2822_v24 }
 0x258   : > { %2992 = vmatmul.mubr.msk.bf16.gmra.mrb[12].mxu0 %vm4370_vm6, %v2991_v21  ;;  %v1133_v8 = vsel %vm4379_vm7, %v1128_v35, %v1132_v36 }
 0x259   : > { %1973 = vmatprep.mubr.bf16.mxu0 %v2835_v27  ;;  %3017 = vmatmul.mubr.msk.bf16.vlgmr.msra.gmra.mrb[16].mxu1 %vm4370_vm6, %v4473_v10  ;;  %v2837_v10 = vcombine.low %v4507_v62, %v4545_v56  ;;  %v2833_v62 = vcombine.low %v4527_v25, %v4561_v16  ;;  %v2834_v49 = vcombine.low %v4569_v22, %v1133_v8 }
 0x25a   : > { %3447 = vmatpush3.bf16.msra.mxu1 %v3689_v61  ;;  %2046 = vmatprep.mubr.bf16.mxu1 %v2821_v29  ;;  %v1136_v29 = vrot.slane %v2961_v7, 5 }
 0x25b   : > { %3440 = vmatprep.subr.bf16.mxu1 %v3690_v31 }
 0x25c   : > { %v1137_v15 = vsel %vm4392_vm8, %v2811_v60, %v1136_v29 }
 0x25d   : > { %v2838_v17 = vcombine.low %v4549_v9, %v1137_v15  ;;  %v2841_v25 = vcombine.low %v1137_v15, %v4403_v57 }
 0x25e   : > { %3448 = vmatpush3.bf16.msra.mxu1 %v3690_v31 }
 0x25f   : > { %3441 = vmatprep.subr.bf16.mxu1 %v3691_v42 }
 0x260   : > { %1974 = vmatmul.mubr.bf16.vlgmr.msra.gmra.mrb[16].mxu0 %v2831_v5 }
 0x261   : > { %3376 = vmatpush3.bf16.msra.mxu0 %v3689_v61  ;;  %1981 = vmatprep.mubr.bf16.mxu0 %v2836_v32 }
 0x262   : > { %3377 = vmatprep.subr.bf16.mxu0 %v3690_v31  ;;  %3022 = vmatmul.mubr.msk.bf16.gmra.mrb[20].mxu1 %vm4370_vm6, %v4531_v26  ;;  %v2840_v26 = vcombine.low %v1133_v8, %v4399_v54  ;;  %v3695_v54 = vld [vmem:[#allocation16 + $0x230] sm:$0xff]  }
 0x263   : > { %3449 = vmatpush3.bf16.msra.mxu1 %v3691_v42  ;;  %2054 = vmatprep.mubr.bf16.mxu1 %v2822_v24 }
 0x264   : > { %3442 = vmatprep.subr.bf16.mxu1 %v3692_v37 }
 0x265   : > { %3378 = vmatpush3.bf16.msra.mxu0 %v3690_v31 }
 0x266   : > { %3379 = vmatprep.subr.bf16.mxu0 %v3691_v42 }
 0x267   : > { %3450 = vmatpush3.bf16.msra.mxu1 %v3692_v37 }
 0x268   : > { %1982 = vmatmul.mubr.bf16.gmra.mrb[20].mxu0 %v2832_v45  ;;  %3443 = vmatprep.subr.bf16.mxu1 %v3693_v51 }
 0x269   : > { %3380 = vmatpush3.bf16.msra.mxu0 %v3691_v42  ;;  %1989 = vmatprep.mubr.bf16.mxu0 %v2837_v10 }
 0x26a   : > { %3381 = vmatprep.subr.bf16.mxu0 %v3692_v37  ;;  %3027 = vmatmul.mubr.msk.bf16.gmra.mrb[24].mxu1 %vm4370_vm6, %v2991_v21 }
 0x26b   : > { %3451 = vmatpush3.bf16.msra.mxu1 %v3693_v51  ;;  %2062 = vmatprep.mubr.bf16.mxu1 %v2840_v26 }
 0x26c   : > { %3444 = vmatprep.subr.bf16.mxu1 %v3694_v40 }
 0x26d   : > { %3382 = vmatpush3.bf16.msra.mxu0 %v3692_v37 }
 0x26e   : > { %3383 = vmatprep.subr.bf16.mxu0 %v3693_v51 }
 0x26f   : > { %3452 = vmatpush3.bf16.msra.mxu1 %v3694_v40 }
 0x270   : > { %1990 = vmatmul.mubr.bf16.gmra.mrb[24].mxu0 %v2833_v62  ;;  %3445 = vmatprep.subr.bf16.mxu1 %v3695_v54 }
 0x271   : > { %3384 = vmatpush3.bf16.msra.mxu0 %v3693_v51  ;;  %1997 = vmatprep.mubr.bf16.mxu0 %v2838_v17 }
 0x272   : > { %3385 = vmatprep.subr.bf16.mxu0 %v3694_v40  ;;  %3032 = vmatmul.mubr.msk.bf16.gmra.mrb[28].mxu1 %vm4370_vm6, %v3031_v38 }
 0x273   : > { %3453 = vmatpush3.bf16.msra.mxu1 %v3695_v54  ;;  %3395 = vmatprep.mubr.bf16.mxu1 %v4557_v14 }
 0x274   : > { %3446 = vmatprep.subr.bf16.mxu1 %v3696_v39 }
 0x275   : > { %3386 = vmatpush3.bf16.msra.mxu0 %v3694_v40 }
 0x276   : > { %3387 = vmatprep.subr.bf16.mxu0 %v3695_v54 }
 0x277   : > { %3454 = vmatpush3.bf16.msra.mxu1 %v3696_v39 }
 0x278   : > { %1998 = vmatmul.mubr.bf16.gmra.mrb[28].mxu0 %v2834_v49 }
 0x279   : > { %3388 = vmatpush3.bf16.msra.mxu0 %v3695_v54  ;;  %3391 = vmatprep.mubr.bf16.mxu0 %v4460_v55 }
 0x27a   : > { %3389 = vmatprep.subr.bf16.mxu0 %v3696_v39  ;;  %3396 = vmatmul.mubr.bf16.vlgmr.msra.gmra.mrb[32].mxu1 %v2841_v25 }
 0x27d   : > { %3390 = vmatpush3.bf16.msra.mxu0 %v3696_v39 }
 0x280   : > { %3392 = vmatmul.mubr.bf16.vlgmr.msra.gmra.mrb[32].mxu0 %v4512_v6 }
 0x309   : > { %v3183_v3 = vpop.f32.mrb[0].mxu0 }
 0x30a   : > { %v3223_v47 = vpop.f32.mrb[0].mxu1  ;;  %v3184_v41 = vpop.f32.mrb[1].mxu0 }
 0x30b   : > { %v3224_v34 = vpop.f32.mrb[1].mxu1  ;;  %v3185_v48 = vadd.f32 %v3184_v41, %v3183_v3  ;;  %v3186_v57 = vpop.f32.mrb[2].mxu0 }
 0x30c   : > { %v3225_v44 = vadd.f32 %v3224_v34, %v3223_v47  ;;  %v3226_v13 = vpop.f32.mrb[2].mxu1  ;;  %v3187_v52 = vpop.f32.mrb[3].mxu0 }
 0x30d   : > { %v3227_v46 = vpop.f32.mrb[3].mxu1  ;;  %v3188_v61 = vadd.f32 %v3187_v52, %v3186_v57 }
 0x30e   : > { %v3228_v50 = vadd.f32 %v3227_v46, %v3226_v13  ;;  %v1911_v53 = vadd.f32 %v3225_v44, %v3185_v48 }
 0x310   : > { %v1914_v56 = vadd.f32 %v3228_v50, %v3188_v61 }
 0x312   : > { %v3229_v55 = vpop.f32.mrb[4].mxu1 }
 0x313   : > { %v3230_v58 = vpop.f32.mrb[5].mxu1 }
 0x314   : > { %v3231_v59 = vadd.f32 %v3230_v58, %v3229_v55  ;;  %v3232_v63 = vpop.f32.mrb[6].mxu1 }
 0x315   : > { %v3233_v0 = vpop.f32.mrb[7].mxu1  ;;  %v3189_v6 = vpop.f32.mrb[4].mxu0 }
 0x316   : > { %v3234_v1 = vadd.f32 %v3233_v0, %v3232_v63  ;;  %v3190_v2 = vpop.f32.mrb[5].mxu0 }
 0x317   : > { %v3191_v9 = vadd.f32 %v3190_v2, %v3189_v6  ;;  %v3192_v11 = vpop.f32.mrb[6].mxu0 }
 0x318   : > { %v3193_v12 = vpop.f32.mrb[7].mxu0 }
 0x319   : > { %v1919_v4 = vadd.f32 %v3231_v59, %v3191_v9  ;;  %v3194_v14 = vadd.f32 %v3193_v12, %v3192_v11 }
 0x31a   : > { %v3235_v18 = vpop.f32.mrb[8].mxu1 }
 0x31b   : > { %v4614_v16 = vadd.f32 %v3234_v1, %v3194_v14  ;;  %v3236_v33 = vpop.f32.mrb[9].mxu1 }
 0x31c   : > { %v3237_v19 = vadd.f32 %v3236_v33, %v3235_v18  ;;  %v3238_v22 = vpop.f32.mrb[10].mxu1 }
 0x31d   : > { %v3239_v21 = vpop.f32.mrb[11].mxu1 }
 0x31e   : > { %v3240_v23 = vadd.f32 %v3239_v21, %v3238_v22 }
 0x320   : > { %v3195_v24 = vpop.f32.mrb[8].mxu0 }
 0x321   : > { %v3196_v27 = vpop.f32.mrb[9].mxu0 }
 0x322   : > { %v3197_v7 = vadd.f32 %v3196_v27, %v3195_v24  ;;  %v3198_v28 = vpop.f32.mrb[10].mxu0 }
 0x323   : > { %v3199_v30 = vpop.f32.mrb[11].mxu0 }
 0x324   : > { %v1927_v31 = vadd.f32 %v3237_v19, %v3197_v7  ;;  %v3200_v43 = vadd.f32 %v3199_v30, %v3198_v28  ;;  %v3241_v5 = vpop.f32.mrb[12].mxu1 }
 0x325   : > { %v3242_v42 = vpop.f32.mrb[13].mxu1 }
 0x326   : > { %v4616_v20 = vadd.f32 %v3240_v23, %v3200_v43  ;;  %v3243_v32 = vadd.f32 %v3242_v42, %v3241_v5  ;;  %v3244_v35 = vpop.f32.mrb[14].mxu1 }
 0x327   : > { %v3245_v36 = vpop.f32.mrb[15].mxu1 }
 0x328   : > { %v3246_v37 = vadd.f32 %v3245_v36, %v3244_v35 }
 0x32b   : > { %v3201_v8 = vpop.f32.mrb[12].mxu0 }
 0x32c   : > { %v3202_v45 = vpop.f32.mrb[13].mxu0  ;;  %v3303_v60 = vpop.f32.mrb[16].mxu1 }
 0x32d   : > { %v3203_v51 = vadd.f32 %v3202_v45, %v3201_v8  ;;  %v3204_v10 = vpop.f32.mrb[14].mxu0  ;;  %v3304_v26 = vpop.f32.mrb[17].mxu1 }
 0x32e   : > { %v3205_v29 = vpop.f32.mrb[15].mxu0  ;;  %v3305_v62 = vadd.f32 %v3304_v26, %v3303_v60  ;;  %v3306_v54 = vpop.f32.mrb[18].mxu1 }
 0x32f   : > { %v1935_v40 = vadd.f32 %v3243_v32, %v3203_v51  ;;  %v3206_v15 = vadd.f32 %v3205_v29, %v3204_v10  ;;  %v3307_v17 = vpop.f32.mrb[19].mxu1 }
 0x330   : > { %v3308_v39 = vadd.f32 %v3307_v17, %v3306_v54 }
 0x331   : > { %v4618_v38 = vadd.f32 %v3246_v37, %v3206_v15 }
 0x333   : > { %v3263_v49 = vpop.f32.mrb[16].mxu0 }
 0x334   : > { %v3264_v25 = vpop.f32.mrb[17].mxu0 }
 0x335   : > { %v3265_v47 = vadd.f32 %v3264_v25, %v3263_v49  ;;  %v3266_v34 = vpop.f32.mrb[18].mxu0  ;;  %v3309_v3 = vpop.f32.mrb[20].mxu1 }
 0x336   : > { %v3267_v44 = vpop.f32.mrb[19].mxu0  ;;  %v3310_v13 = vpop.f32.mrb[21].mxu1 }
 0x337   : > { %v1976_v41 = vadd.f32 %v3265_v47, %v1911_v53  ;;  %v3268_v46 = vadd.f32 %v3267_v44, %v3266_v34  ;;  %v3311_v48 = vadd.f32 %v3310_v13, %v3309_v3  ;;  %v3312_v57 = vpop.f32.mrb[22].mxu1 }
 0x338   : > { %v3313_v50 = vpop.f32.mrb[23].mxu1 }
 0x339   : > { %v1979_v52 = vadd.f32 %v3268_v46, %v1914_v56  ;;  %v3314_v61 = vadd.f32 %v3313_v50, %v3312_v57  ;;  %v2041_v55 = vadd.f32 %v3305_v62, %v1976_v41 }
 0x33b   : > { %v3269_v58 = vpop.f32.mrb[20].mxu0  ;;  %v2044_v59 = vadd.f32 %v3308_v39, %v1979_v52 }
 0x33c   : > { %v3270_v63 = vpop.f32.mrb[21].mxu0 }
 0x33d   : > { %v3271_v0 = vadd.f32 %v3270_v63, %v3269_v58  ;;  %v3272_v6 = vpop.f32.mrb[22].mxu0  ;;  %v3315_v1 = vpop.f32.mrb[24].mxu1 }
 0x33e   : > { %v3273_v2 = vpop.f32.mrb[23].mxu0  ;;  %v3316_v9 = vpop.f32.mrb[25].mxu1 }
 0x33f   : > { %v1984_v11 = vadd.f32 %v3271_v0, %v1919_v4  ;;  %v3274_v12 = vadd.f32 %v3273_v2, %v3272_v6  ;;  %v3317_v14 = vadd.f32 %v3316_v9, %v3315_v1  ;;  %v3318_v18 = vpop.f32.mrb[26].mxu1 }
 0x340   : > { %v3319_v53 = vpop.f32.mrb[27].mxu1 }
 0x341   : > { %v1987_v33 = vadd.f32 %v3274_v12, %v4614_v16  ;;  %v3320_v19 = vadd.f32 %v3319_v53, %v3318_v18  ;;  %v2049_v22 = vadd.f32 %v3311_v48, %v1984_v11 }
 0x343   : > { %v3275_v56 = vpop.f32.mrb[24].mxu0  ;;  %v2052_v21 = vadd.f32 %v3314_v61, %v1987_v33 }
 0x344   : > { %v3276_v23 = vpop.f32.mrb[25].mxu0 }
 0x345   : > { %v3277_v24 = vadd.f32 %v3276_v23, %v3275_v56  ;;  %v3278_v27 = vpop.f32.mrb[26].mxu0  ;;  %v3321_v7 = vpop.f32.mrb[28].mxu1 }
 0x346   : > { %v3279_v28 = vpop.f32.mrb[27].mxu0  ;;  %v3322_v30 = vpop.f32.mrb[29].mxu1 }
 0x347   : > { %v1992_v43 = vadd.f32 %v3277_v24, %v1927_v31  ;;  %v3280_v5 = vadd.f32 %v3279_v28, %v3278_v27  ;;  %v3323_v42 = vadd.f32 %v3322_v30, %v3321_v7  ;;  %v3324_v4 = vpop.f32.mrb[30].mxu1 }
 0x348   : > { %v3325_v32 = vpop.f32.mrb[31].mxu1 }
 0x349   : > { %v1995_v35 = vadd.f32 %v3280_v5, %v4616_v20  ;;  %v3326_v36 = vadd.f32 %v3325_v32, %v3324_v4  ;;  %v2057_v16 = vadd.f32 %v3317_v14, %v1992_v43 }
 0x34b   : > { %v3281_v37 = vpop.f32.mrb[28].mxu0  ;;  %v2060_v8 = vadd.f32 %v3320_v19, %v1995_v35 }
 0x34c   : > { %v3282_v45 = vpop.f32.mrb[29].mxu0 }
 0x34d   : > { %v3283_v51 = vadd.f32 %v3282_v45, %v3281_v37  ;;  %v3284_v10 = vpop.f32.mrb[30].mxu0  ;;  %v3397_v60 = vpop.f32.mrb[32].mxu1 }
 0x34e   : > { %v3285_v29 = vpop.f32.mrb[31].mxu0  ;;  %v2121_v26 = vpop.f32.mrb[33].mxu1 }
 0x34f   : > { %v2000_v15 = vadd.f32 %v3283_v51, %v1935_v40  ;;  %v3286_v62 = vadd.f32 %v3285_v29, %v3284_v10  ;;  %v2122_v31 = vadd.f32 %v2121_v26, %v2057_v16  ;;  %v3398_v54 = vpop.f32.mrb[34].mxu1 }
 0x350   : > { %v2124_v17 = vpop.f32.mrb[35].mxu1 }
 0x351   : > { %v2003_v39 = vadd.f32 %v3286_v62, %v4618_v38  ;;  %v2065_v49 = vadd.f32 %v3323_v42, %v2000_v15  ;;  %v2125_v20 = vadd.f32 %v2124_v17, %v2060_v8  ;;  %v2157_v12 = vmul.f32 %v2122_v31, %v2122_v31  ;;  %v2152_v8 = vld [vmem:[#allocation6 + $0x1] sm:$0x1] }
 0x353   : > { %v3393_v25 = vpop.f32.mrb[32].mxu0  ;;  %v2130_v47 = vadd.f32 %v3397_v60, %v2065_v49  ;;  %v2068_v34 = vadd.f32 %v3326_v36, %v2003_v39  ;;  %v3078_v3 = vpack.c.bf16 %v2125_v20, %v2122_v31  ;;  %v2158_v33 = vmul.f32 %v2125_v20, %v2125_v20  ;;  %v2136_v36 = vld [vmem:[#allocation6] sm:$0x1] }
 0x354   : > { %v2114_v44 = vadd.f32 %v3393_v25, %v2049_v22  ;;  %v2105_v13 = vpop.f32.mrb[33].mxu0 }
 0x355   : > { %v2106_v41 = vadd.f32 %v2105_v13, %v2041_v55  ;;  %v3394_v46 = vpop.f32.mrb[34].mxu0  ;;  %v2133_v48 = vadd.f32 %v3398_v54, %v2068_v34  ;;  %3144 = vst [vmem:[%s2187_s7 + $0x10] sm:$0xff] %v3078_v3   ;;  %v2159_v19 = vmul.f32 %v2130_v47, %v2130_v47 }
 0x356   : > { %v2117_v40 = vadd.f32 %v3394_v46, %v2052_v21  ;;  %v2108_v57 = vpop.f32.mrb[35].mxu0  ;;  %v2155_v6 = vmul.f32 %v2114_v44, %v2114_v44 }
 0x357   : > { %v3083_v50 = vpack.c.bf16 %v2133_v48, %v2130_v47  ;;  %v2109_v52 = vadd.f32 %v2108_v57, %v2044_v59  ;;  %v2153_v58 = vmul.f32 %v2106_v41, %v2106_v41  ;;  %v2160_v21 = vmul.f32 %v2133_v48, %v2133_v48 }
 0x358   : > { %v3073_v61 = vpack.c.bf16 %v2117_v40, %v2114_v44  ;;  %v2156_v55 = vmul.f32 %v2117_v40, %v2117_v40 }
 0x359   : > { %3145 = vst [vmem:[%s2187_s7 + $0x18] sm:$0xff] %v3083_v50   ;;  %v2137_v38 = vadd.f32 %v2109_v52, %v2106_v41  ;;  %v2154_v63 = vmul.f32 %v2109_v52, %v2109_v52  ;;  %v3068_v0 = vpack.c.bf16 %v2109_v52, %v2106_v41 }
 0x35a   : > { %3143 = vst [vmem:[%s2187_s7 + $0x8] sm:$0xff] %v3073_v61  }
 0x35b   : > { %v2138_v1 = vadd.f32 %v2137_v38, %v2114_v44  ;;  %v2161_v2 = vadd.f32 %v2154_v63, %v2153_v58  ;;  %3069 = vst [vmem:[%s2187_s7] sm:$0xff] %v3068_v0  }
 0x35d   : > { %v2162_v9 = vadd.f32 %v2161_v2, %v2155_v6  ;;  %v2139_v11 = vadd.f32 %v2138_v1, %v2117_v40 }
 0x35f   : > { %v2140_v14 = vadd.f32 %v2139_v11, %v2122_v31  ;;  %v2163_v18 = vadd.f32 %v2162_v9, %v2156_v55 }
 0x361   : > { %v2141_v53 = vadd.f32 %v2140_v14, %v2125_v20  ;;  %v2164_v59 = vadd.f32 %v2163_v18, %v2157_v12 }
 0x363   : > { %v2142_v22 = vadd.f32 %v2141_v53, %v2130_v47  ;;  %v2165_v56 = vadd.f32 %v2164_v59, %v2158_v33 }
 0x365   : > { %v2143_v23 = vadd.f32 %v2142_v22, %v2133_v48  ;;  %v2166_v24 = vadd.f32 %v2165_v56, %v2159_v19 }
 0x367   : > { %v2144_v27 = vrot.slane %v2143_v23, 4  ;;  %v2167_v7 = vadd.f32 %v2166_v24, %v2160_v21 }
 0x369   : > { %v2145_v28 = vadd.f32 %v2144_v27, %v2143_v23  ;;  %v2168_v30 = vrot.slane %v2167_v7, 4 }
 0x36b   : > { %v2146_v43 = vrot.slane %v2145_v28, 2  ;;  %v2169_v5 = vadd.f32 %v2168_v30, %v2167_v7 }
 0x36d   : > { %v2147_v42 = vadd.f32 %v2146_v43, %v2145_v28  ;;  %v2170_v4 = vrot.slane %v2169_v5, 2 }
 0x36f   : > { %v2148_v32 = vrot.slane %v2147_v42, 1  ;;  %v2171_v35 = vadd.f32 %v2170_v4, %v2169_v5 }
 0x371   : > { %v2149_v16 = vadd.f32 %v2148_v32, %v2147_v42  ;;  %v2172_v37 = vrot.slane %v2171_v35, 1 }
 0x373   : > { %v2150_v45 = vadd.f32 %v2149_v16, %v2136_v36  ;;  %v2173_v51 = vadd.f32 %v2172_v37, %v2171_v35 }
 0x375   : > { %2151 = vst [vmem:[#allocation6] sm:$0x1] %v2150_v45  ;;  %v2174_v10 = vadd.f32 %v2173_v51, %v2152_v8 }
 0x377   : > { %2175 = vst [vmem:[#allocation6 + $0x1] sm:$0x1] %v2174_v10 }
 0x378 PF: > { %s4800_s13 = sld [smem:[#allocation25_spill]] }
 0x37e   : > { %p2916_p0 = scmp.ne.s32.totalorder %s4800_s13, 2 }
 0x380   : > { %2199 = sbr.rel (%p2916_p0) target bundleno = 1211 (0x4bb), region = 100 }
 0x387   : > { %2201 = sbr.rel (!%p482_p7) target bundleno = 932 (0x3a4), region = 104  ;;  %v2203_v60 = vld [vmem:[#allocation6] sm:$0x1] (%p482_p7)  ;;  %v2205_v29 = vld [vmem:[#allocation6 + $0x1] sm:$0x1] (%p482_p7)  ;;  %v3967_v26 = vmov (%p482_p7), 0.0  }
 0x388   : > { %2202 = vst [vmem:[#allocation7] sm:$0x3] (%p482_p7), %v3967_v26  ;;  %v2204_v15 = vmul.f32 (%p482_p7), 0.0078125, %v2203_v60  ;;  %v2206_v62 = vmul.f32 (%p482_p7), 0.0078125, %v2205_v29  ;;  %s4801_s26 = sld [smem:[#allocation33_spill]] (%p482_p7)  ;;  %s4802_s25 = sld [smem:[#allocation34_spill]] (%p482_p7) }
 0x38a   : > { %v2207_v31 = vmul.f32 (%p482_p7), %v2204_v15, %v2204_v15 }
 0x38c   : > { %v2208_v54 = vsub.f32 (%p482_p7), %v2206_v62, %v2207_v31 }
 0x38e   : > { %v2209_v17 = vmax.f32 %v2208_v54, 0.0  ;;  %v2212_v49 = vld [vmem:[%s4801_s26] sm:$0x1] }
 0x38f   : > { %v2214_v47 = vld [vmem:[%s4802_s25] sm:$0x1] }
 0x390   : > { %v2210_v39 = vadd.f32 1e-05, %v2209_v17 }
 0x392   : > { %3697 = vrsqrt.f32 %v2210_v39 }
 0x39c   : > { %v3698_v20 = vpop.eup %3697 }
 0x39d   : > { %v2213_v25 = vmul.f32 %v3698_v20, %v2212_v49 }
 0x39f   : > { %2217 = vst [vmem:[#allocation9] sm:$0x1] %v2213_v25  ;;  %v2215_v34 = vmul.f32 %v2213_v25, %v2204_v15 }
 0x3a1   : > { %v2216_v3 = vsub.f32 %v2214_v47, %v2215_v34 }
 0x3a3   : > { %2218 = vst [vmem:[#allocation9 + $0x1] sm:$0x1] %v2216_v3 }
 0x3a4 PF: > { %v3699_v44 = vld [vmem:[#allocation17] sm:$0xff]   ;;  %v3700_v13 = vld [vmem:[#allocation17 + $0x8] sm:$0xff]   ;;  %s3034_s30 = sshll.u32 %s3937_s19, 5  ;;  %v3701_v41 = vld [vmem:[#allocation17 + $0x10] sm:$0xff]  }
 0x3a5   : > { %3399 = vmatprep.subr.bf16.mxu0 %v3699_v44  ;;  %3455 = vmatprep.subr.bf16.mxu1 %v3699_v44  ;;  %v3702_v46 = vld [vmem:[#allocation17 + $0x18] sm:$0xff]   ;;  %s2222_s9 = scalar_lea.vmem [#allocation3], %s3034_s30  ;;  %v3703_v2 = vld [vmem:[#allocation17 + $0x20] sm:$0xff]   ;;  %v3704_v21 = vld [vmem:[#allocation17 + $0x28] sm:$0xff]   ;;  %s2455_s8 = scalar_lea.vmem [#allocation4], %s3034_s30 }
 0x3a6   : > { %3400 = vmatpush3.bf16.msra.mxu0 %v3699_v44  ;;  %3463 = vmatpush3.bf16.msra.mxu1 %v3699_v44  ;;  %v3086_v48 = vld [vmem:[%s2222_s9] sm:$0xff]   ;;  %v2919_v40 = vld [vmem:[#allocation9] ss:$0 sm:$0xff]  ;;  %v3147_v52 = vld [vmem:[%s2222_s9 + $0x10] sm:$0xff]  }
 0x3a7   : > { %3401 = vmatprep.subr.bf16.mxu0 %v3700_v13  ;;  %3456 = vmatprep.subr.bf16.mxu1 %v3700_v13  ;;  %v3087_v57 = vunpack.c.l.bf16 %v3086_v48  ;;  %v3088_v50 = vunpack.c.h.bf16 %v3086_v48  ;;  %v3146_v58 = vld [vmem:[%s2222_s9 + $0x8] sm:$0xff]   ;;  %v3095_v38 = vunpack.c.l.bf16 %v3147_v52  ;;  %v3096_v63 = vunpack.c.h.bf16 %v3147_v52  ;;  %v3148_v1 = vld [vmem:[%s2222_s9 + $0x18] sm:$0xff]  }
 0x3a8   : > { %v3091_v12 = vunpack.c.l.bf16 %v3146_v58  ;;  %v3092_v18 = vunpack.c.h.bf16 %v3146_v58  ;;  %v3099_v33 = vunpack.c.l.bf16 %v3148_v1  ;;  %v3100_v59 = vunpack.c.h.bf16 %v3148_v1  ;;  %v3705_v42 = vld [vmem:[#allocation17 + $0x30] sm:$0xff]   ;;  %v3706_v16 = vld [vmem:[#allocation17 + $0x38] sm:$0xff]  }
 0x3a9   : > { %v2244_v0 = vmul.f32 %v3087_v57, %v2919_v40  ;;  %v2245_v6 = vmul.f32 %v3088_v50, %v2919_v40  ;;  %v2248_v55 = vmul.f32 %v3095_v38, %v2919_v40  ;;  %v2249_v14 = vmul.f32 %v3096_v63, %v2919_v40 }
 0x3aa   : > { %3402 = vmatpush3.bf16.msra.mxu0 %v3700_v13  ;;  %3464 = vmatpush3.bf16.msra.mxu1 %v3700_v13  ;;  %v2920_v61 = vld [vmem:[#allocation9 + $0x1] ss:$0 sm:$0xff]  ;;  %v2246_v7 = vmul.f32 %v3091_v12, %v2919_v40  ;;  %v2247_v28 = vmul.f32 %v3092_v18, %v2919_v40  ;;  %v2250_v30 = vmul.f32 %v3099_v33, %v2919_v40 }
 0x3ab   : > { %3403 = vmatprep.subr.bf16.mxu0 %v3701_v41  ;;  %3457 = vmatprep.subr.bf16.mxu1 %v3701_v41  ;;  %v2257_v9 = vadd.f32 %v2920_v61, %v2244_v0  ;;  %v2258_v11 = vadd.f32 %v2920_v61, %v2245_v6  ;;  %v2261_v53 = vadd.f32 %v2920_v61, %v2248_v55 }
 0x3ac   : > { %v2262_v56 = vadd.f32 %v2920_v61, %v2249_v14  ;;  %v2251_v43 = vmul.f32 %v3100_v59, %v2919_v40  ;;  %v2259_v4 = vadd.f32 %v2920_v61, %v2246_v7  ;;  %v2260_v32 = vadd.f32 %v2920_v61, %v2247_v28 }
 0x3ad   : > { %v2265_v19 = vmax.f32 %v2257_v9, 0.0  ;;  %v2266_v22 = vmax.f32 %v2258_v11, 0.0  ;;  %v2269_v23 = vmax.f32 %v2261_v53, 0.0  ;;  %v2263_v35 = vadd.f32 %v2920_v61, %v2250_v30 }
 0x3ae   : > { %3404 = vmatpush3.bf16.msra.mxu0 %v3701_v41  ;;  %3465 = vmatpush3.bf16.msra.mxu1 %v3701_v41  ;;  %v2270_v27 = vmax.f32 %v2262_v56, 0.0  ;;  %v2264_v36 = vadd.f32 %v2920_v61, %v2251_v43  ;;  %v2267_v37 = vmax.f32 %v2259_v4, 0.0  ;;  %v2268_v8 = vmax.f32 %v2260_v32, 0.0 }
 0x3af   : > { %3405 = vmatprep.subr.bf16.mxu0 %v3702_v46  ;;  %3458 = vmatprep.subr.bf16.mxu1 %v3702_v46  ;;  %v2273_v24 = vpack.c.bf16 %v2266_v22, %v2265_v19  ;;  %v2271_v45 = vmax.f32 %v2263_v35, 0.0 }
 0x3b0   : > { %v2275_v5 = vpack.c.bf16 %v2270_v27, %v2269_v23  ;;  %v2272_v51 = vmax.f32 %v2264_v36, 0.0  ;;  %v2274_v10 = vpack.c.bf16 %v2268_v8, %v2267_v37  ;;  %v2422_v27 = vld [vmem:[#allocation7 + $0x1] sm:$0x1] }
 0x3b1   : > { %3415 = vmatprep.mubr.bf16.mxu0 %v2273_v24 }
 0x3b2   : > { %3406 = vmatpush3.bf16.msra.mxu0 %v3702_v46  ;;  %3466 = vmatpush3.bf16.msra.mxu1 %v3702_v46  ;;  %v2276_v60 = vpack.c.bf16 %v2272_v51, %v2271_v45 }
 0x3b3   : > { %3407 = vmatprep.subr.bf16.mxu0 %v3703_v2  ;;  %3459 = vmatprep.subr.bf16.mxu1 %v3703_v2 }
 0x3b4   : > { %3419 = vmatprep.mubr.bf16.mxu1 %v2275_v5 }
 0x3b6   : > { %3408 = vmatpush3.bf16.msra.mxu0 %v3703_v2  ;;  %3467 = vmatpush3.bf16.msra.mxu1 %v3703_v2 }
 0x3b7   : > { %3409 = vmatprep.subr.bf16.mxu0 %v3704_v21  ;;  %3460 = vmatprep.subr.bf16.mxu1 %v3704_v21 }
 0x3ba   : > { %3410 = vmatpush3.bf16.msra.mxu0 %v3704_v21  ;;  %3468 = vmatpush3.bf16.msra.mxu1 %v3704_v21  ;;  %v2406_v21 = vld [vmem:[#allocation7] sm:$0x1] }
 0x3bb   : > { %3411 = vmatprep.subr.bf16.mxu0 %v3705_v42  ;;  %3461 = vmatprep.subr.bf16.mxu1 %v3705_v42 }
 0x3be   : > { %3412 = vmatpush3.bf16.msra.mxu0 %v3705_v42  ;;  %3469 = vmatpush3.bf16.msra.mxu1 %v3705_v42 }
 0x3bf   : > { %3413 = vmatprep.subr.bf16.mxu0 %v3706_v16  ;;  %3462 = vmatprep.subr.bf16.mxu1 %v3706_v16 }
 0x3c2   : > { %3414 = vmatpush3.bf16.msra.mxu0 %v3706_v16  ;;  %3470 = vmatpush3.bf16.msra.mxu1 %v3706_v16 }
 0x3c5   : > { %3416 = vmatmul.mubr.bf16.vlgmr.msra.gmra.mrb[0].mxu0 %v2274_v10  ;;  %3420 = vmatmul.mubr.bf16.vlgmr.msra.gmra.mrb[0].mxu1 %v2276_v60 }
 0x498   : > { %v3417_v29 = vpop.f32.mrb[0].mxu0  ;;  %v3421_v26 = vpop.f32.mrb[0].mxu1 }
 0x499   : > { %v2375_v15 = vpop.f32.mrb[1].mxu0  ;;  %v2391_v62 = vpop.f32.mrb[1].mxu1  ;;  %v2425_v13 = vmul.f32 %v3417_v29, %v3417_v29  ;;  %v2429_v0 = vmul.f32 %v3421_v26, %v3421_v26 }
 0x49a   : > { %v3418_v31 = vpop.f32.mrb[2].mxu0  ;;  %v3422_v54 = vpop.f32.mrb[2].mxu1  ;;  %v2423_v25 = vmul.f32 %v2375_v15, %v2375_v15  ;;  %v2427_v50 = vmul.f32 %v2391_v62, %v2391_v62 }
 0x49b   : > { %v3109_v17 = vpack.c.bf16 %v3418_v31, %v3417_v29  ;;  %v2378_v39 = vpop.f32.mrb[3].mxu0  ;;  %v3119_v49 = vpack.c.bf16 %v3422_v54, %v3421_v26  ;;  %v2394_v20 = vpop.f32.mrb[3].mxu1  ;;  %v2426_v48 = vmul.f32 %v3418_v31, %v3418_v31  ;;  %v2430_v2 = vmul.f32 %v3422_v54, %v3422_v54 }
 0x49c   : > { %v2407_v47 = vadd.f32 %v2378_v39, %v2375_v15  ;;  %v2424_v34 = vmul.f32 %v2378_v39, %v2378_v39  ;;  %v3104_v3 = vpack.c.bf16 %v2378_v39, %v2375_v15  ;;  %v3114_v44 = vpack.c.bf16 %v2394_v20, %v2391_v62 }
 0x49d   : > { %3149 = vst [vmem:[%s2455_s8 + $0x8] sm:$0xff] %v3109_v17   ;;  %3151 = vst [vmem:[%s2455_s8 + $0x18] sm:$0xff] %v3119_v49   ;;  %v2428_v63 = vmul.f32 %v2394_v20, %v2394_v20 }
 0x49e   : > { %v2408_v41 = vadd.f32 %v3417_v29, %v2407_v47  ;;  %v2431_v46 = vadd.f32 %v2424_v34, %v2423_v25  ;;  %3105 = vst [vmem:[%s2455_s8] sm:$0xff] %v3104_v3   ;;  %3150 = vst [vmem:[%s2455_s8 + $0x10] sm:$0xff] %v3114_v44  }
 0x4a0   : > { %v2432_v40 = vadd.f32 %v2431_v46, %v2425_v13  ;;  %v2409_v57 = vadd.f32 %v3418_v31, %v2408_v41 }
 0x4a2   : > { %v2410_v52 = vadd.f32 %v2409_v57, %v2391_v62  ;;  %v2433_v61 = vadd.f32 %v2432_v40, %v2426_v48 }
 0x4a4   : > { %v2434_v58 = vadd.f32 %v2433_v61, %v2427_v50  ;;  %v2411_v38 = vadd.f32 %v2410_v52, %v2394_v20 }
 0x4a6   : > { %v2412_v6 = vadd.f32 %v3421_v26, %v2411_v38  ;;  %v2435_v1 = vadd.f32 %v2434_v58, %v2428_v63 }
 0x4a8   : > { %v2413_v55 = vadd.f32 %v3422_v54, %v2412_v6  ;;  %v2436_v9 = vadd.f32 %v2435_v1, %v2429_v0 }
 0x4aa   : > { %v2414_v11 = vrot.slane %v2413_v55, 4  ;;  %v2437_v12 = vadd.f32 %v2436_v9, %v2430_v2 }
 0x4ac   : > { %v2415_v14 = vadd.f32 %v2414_v11, %v2413_v55  ;;  %v2438_v18 = vrot.slane %v2437_v12, 4 }
 0x4ae   : > { %v2416_v53 = vrot.slane %v2415_v14, 2  ;;  %v2439_v33 = vadd.f32 %v2438_v18, %v2437_v12 }
 0x4b0   : > { %v2417_v59 = vadd.f32 %v2416_v53, %v2415_v14  ;;  %v2440_v19 = vrot.slane %v2439_v33, 2 }
 0x4b2   : > { %v2418_v22 = vrot.slane %v2417_v59, 1  ;;  %v2441_v56 = vadd.f32 %v2440_v19, %v2439_v33 }
 0x4b4   : > { %v2419_v23 = vadd.f32 %v2418_v22, %v2417_v59  ;;  %v2442_v24 = vrot.slane %v2441_v56, 1 }
 0x4b6   : > { %v2420_v7 = vadd.f32 %v2419_v23, %v2406_v21  ;;  %v2443_v28 = vadd.f32 %v2442_v24, %v2441_v56 }
 0x4b8   : > { %2421 = vst [vmem:[#allocation7] sm:$0x1] %v2420_v7  ;;  %v2444_v30 = vadd.f32 %v2443_v28, %v2422_v27 }
 0x4ba   : > { %2445 = vst [vmem:[#allocation7 + $0x1] sm:$0x1] %v2444_v30 }
 0x4bb PF: > { %s4803_s27 = sld [smem:[#allocation25_spill]] }
 0x4c1   : > { %p2930_p4 = scmp.ne.s32.totalorder %s4803_s27, 3 }
 0x4c3   : > { %2467 = sbr.rel (%p2930_p4) target bundleno = 1272 (0x4f8), region = 108 }
 0x4ca   : > { %2469 = sbr.rel (!%p482_p7) target bundleno = 1255 (0x4e7), region = 112  ;;  %v2470_v43 = vld [vmem:[#allocation7] sm:$0x1] (%p482_p7)  ;;  %v2472_v5 = vld [vmem:[#allocation7 + $0x1] sm:$0x1] (%p482_p7)  ;;  %s4804_s1 = sld [smem:[#allocation36_spill]] (%p482_p7) }
 0x4cb   : > { %v2471_v42 = vmul.f32 (%p482_p7), 0.0078125, %v2470_v43  ;;  %v2473_v4 = vmul.f32 (%p482_p7), 0.0078125, %v2472_v5  ;;  %s4805_s13 = sld [smem:[#allocation37_spill]] (%p482_p7) }
 0x4cd   : > { %v2474_v32 = vmul.f32 (%p482_p7), %v2471_v42, %v2471_v42 }
 0x4cf   : > { %v2475_v35 = vsub.f32 (%p482_p7), %v2473_v4, %v2474_v32 }
 0x4d0   : > { %v2479_v37 = vld [vmem:[%s4804_s1] sm:$0x1] (%p482_p7) }
 0x4d1   : > { %v2476_v36 = vmax.f32 %v2475_v35, 0.0  ;;  %v2481_v51 = vld [vmem:[%s4805_s13] sm:$0x1] }
 0x4d3   : > { %v2477_v16 = vadd.f32 1e-05, %v2476_v36 }
 0x4d5   : > { %3707 = vrsqrt.f32 %v2477_v16 }
 0x4df   : > { %v3708_v8 = vpop.eup %3707 }
 0x4e0   : > { %v2480_v45 = vmul.f32 %v3708_v8, %v2479_v37 }
 0x4e2   : > { %2484 = vst [vmem:[#allocation10] sm:$0x1] %v2480_v45  ;;  %v2482_v10 = vmul.f32 %v2480_v45, %v2471_v42 }
 0x4e4   : > { %v2483_v60 = vsub.f32 %v2481_v51, %v2482_v10 }
 0x4e6   : > { %2485 = vst [vmem:[#allocation10 + $0x1] sm:$0x1] %v2483_v60 }
 0x4e7 PF: > { %s3036_s28 = sshll.u32 %s3937_s19, 5  ;;  %v2506_v44 = vld [vmem:[%s4288_s29] sm:$0xff]  ;;  %v2507_v41 = vld [vmem:[%s4288_s29 + $0x8] sm:$0xff]  ;;  %v2508_v57 = vld [vmem:[%s4288_s29 + $0x10] sm:$0xff] }
 0x4e8   : > { %s2489_s24 = scalar_lea.vmem [#allocation4], %s3036_s28  ;;  %v2509_v50 = vld [vmem:[%s4288_s29 + $0x18] sm:$0xff]  ;;  %v2510_v52 = vld [vmem:[%s4288_s29 + $0x20] sm:$0xff]  ;;  %v2511_v55 = vld [vmem:[%s4288_s29 + $0x28] sm:$0xff] }
 0x4e9   : > { %v2933_v29 = vld [vmem:[#allocation10] ss:$0 sm:$0xff]  ;;  %v3122_v26 = vld [vmem:[%s2489_s24] sm:$0xff]   ;;  %v3152_v15 = vld [vmem:[%s2489_s24 + $0x8] sm:$0xff]  }
 0x4ea   : > { %v3153_v62 = vld [vmem:[%s2489_s24 + $0x10] sm:$0xff]   ;;  %v3123_v31 = vunpack.c.l.bf16 %v3122_v26  ;;  %v3124_v54 = vunpack.c.h.bf16 %v3122_v26  ;;  %v3127_v17 = vunpack.c.l.bf16 %v3152_v15  ;;  %v3128_v39 = vunpack.c.h.bf16 %v3152_v15  ;;  %v3154_v49 = vld [vmem:[%s2489_s24 + $0x18] sm:$0xff]  }
 0x4eb   : > { %v3131_v25 = vunpack.c.l.bf16 %v3153_v62  ;;  %v3132_v47 = vunpack.c.h.bf16 %v3153_v62  ;;  %v3135_v34 = vunpack.c.l.bf16 %v3154_v49  ;;  %v3136_v3 = vunpack.c.h.bf16 %v3154_v49  ;;  %v2512_v9 = vld [vmem:[%s4288_s29 + $0x30] sm:$0xff]  ;;  %v2513_v11 = vld [vmem:[%s4288_s29 + $0x38] sm:$0xff] }
 0x4ec   : > { %v2519_v13 = vmul.f32 %v3123_v31, %v2933_v29  ;;  %v2520_v46 = vmul.f32 %v3124_v54, %v2933_v29  ;;  %v2521_v48 = vmul.f32 %v3127_v17, %v2933_v29  ;;  %v2522_v40 = vmul.f32 %v3128_v39, %v2933_v29 }
 0x4ed   : > { %v2934_v20 = vld [vmem:[#allocation10 + $0x1] ss:$0 sm:$0xff]  ;;  %v2523_v61 = vmul.f32 %v3131_v25, %v2933_v29  ;;  %v2524_v58 = vmul.f32 %v3132_v47, %v2933_v29  ;;  %v2525_v38 = vmul.f32 %v3135_v34, %v2933_v29  ;;  %v2526_v63 = vmul.f32 %v3136_v3, %v2933_v29 }
 0x4ee   : > { %v2532_v0 = vadd.f32 %v2934_v20, %v2519_v13  ;;  %v2533_v6 = vadd.f32 %v2934_v20, %v2520_v46  ;;  %v2534_v1 = vadd.f32 %v2934_v20, %v2521_v48  ;;  %v2535_v2 = vadd.f32 %v2934_v20, %v2522_v40 }
 0x4ef   : > { %v2536_v12 = vadd.f32 %v2934_v20, %v2523_v61  ;;  %v2537_v14 = vadd.f32 %v2934_v20, %v2524_v58  ;;  %v2538_v18 = vadd.f32 %v2934_v20, %v2525_v38  ;;  %v2539_v53 = vadd.f32 %v2934_v20, %v2526_v63 }
 0x4f0   : > { %v2540_v33 = vadd.f32 %v2532_v0, %v2506_v44  ;;  %v2541_v59 = vadd.f32 %v2533_v6, %v2507_v41  ;;  %v2542_v19 = vadd.f32 %v2534_v1, %v2508_v57  ;;  %v2543_v22 = vadd.f32 %v2535_v2, %v2509_v50 }
 0x4f1   : > { %v2544_v56 = vadd.f32 %v2536_v12, %v2510_v52  ;;  %v2545_v21 = vadd.f32 %v2537_v14, %v2511_v55  ;;  %v2546_v23 = vadd.f32 %v2538_v18, %v2512_v9  ;;  %v2547_v24 = vadd.f32 %v2539_v53, %v2513_v11 }
 0x4f2   : > { %v2548_v27 = vmax.f32 %v2540_v33, 0.0  ;;  %v2549_v7 = vmax.f32 %v2541_v59, 0.0  ;;  %v2550_v28 = vmax.f32 %v2542_v19, 0.0  ;;  %v2551_v30 = vmax.f32 %v2543_v22, 0.0 }
 0x4f3   : > { %v2552_v43 = vmax.f32 %v2544_v56, 0.0  ;;  %v2553_v5 = vmax.f32 %v2545_v21, 0.0  ;;  %v2554_v42 = vmax.f32 %v2546_v23, 0.0  ;;  %v2555_v4 = vmax.f32 %v2547_v24, 0.0 }
 0x4f4   : > { %2556 = vst [vmem:[%s4306_s11] sm:$0xff] %v2548_v27  ;;  %2557 = vst [vmem:[%s4306_s11 + $0x8] sm:$0xff] %v2549_v7 }
 0x4f5   : > { %2558 = vst [vmem:[%s4306_s11 + $0x10] sm:$0xff] %v2550_v28  ;;  %2559 = vst [vmem:[%s4306_s11 + $0x18] sm:$0xff] %v2551_v30 }
 0x4f6   : > { %2560 = vst [vmem:[%s4306_s11 + $0x20] sm:$0xff] %v2552_v43  ;;  %2561 = vst [vmem:[%s4306_s11 + $0x28] sm:$0xff] %v2553_v5 }
 0x4f7   : > { %2562 = vst [vmem:[%s4306_s11 + $0x30] sm:$0xff] %v2554_v42  ;;  %2563 = vst [vmem:[%s4306_s11 + $0x38] sm:$0xff] %v2555_v4 }
 0x4f8 PF: > { %s4806_s29 = sld [smem:[#allocation25_spill]]  ;;  %s4807_s26 = sld [smem:[#allocation26_spill]] }
 0x4f9   : > { %s2584_s10 = sshll.u32 %s4306_s11, 4  ;;  %s4808_s27 = sld [smem:[#allocation38_spill]]  ;;  %s4667_s10 = int_to_ptr.vmem [resolvable:$true] %s2584_s10 }
 0x4fa   : > { %s4676_s3 = scalar_lea.sflag [#allocation13], %s467_s4  ;;  %s3823_s1 = scalar_lea.vmem %s4667_s10, 1024 }
 0x4fb   : > { %p3824_p3 = scmp.ne.s32.totalorder %s4667_s10, %s3823_s1 }
 0x4fe   : > { %p2572_p1 = scmp.eq.s32.totalorder %s4806_s29, 3  ;;  %p4809_p11 = scmp.ne.s32.totalorder %s4807_s26, 0 }
 0x500   : > { %s2573_s20 = scalar_select %p2572_p1, 1, 0 }
 0x501   : > { %p3825_p9 = pnand %p3824_p3, %p4809_p11 }
 0x502   : > { %s2574_s25 = smul.u32 %s3937_s19, %s2573_s20  ;;  %s3968_s19 = smov [#allocation19]  }
 0x503   : > { %p3826_p6 = pneg %p3825_p9  ;;  %s3827_s11 = sshll.u32 %s3968_s19, 4  ;;  %s3828_s11 = int_to_ptr.vmem [resolvable:$false] %s3827_s11 }
 0x504   : > { %s3037_s30 = sshll.u32 %s2574_s25, 10  ;;  %s3829_s12 = scalar_lea.vmem %s3828_s11, 2048 }
 0x505   : > { %s4672_s2 = scalar_lea.hbm %s4808_s27, %s3037_s30  ;;  %p3830_p13 = scmp.lt.s32.totalorder %s4667_s10, %s3828_s11 }
 0x506   : > { %p3831_p2 = scmp.lt.s32.totalorder %s3829_s12, %s3823_s1 }
 0x508   : > { %p3832_p5 = por %p3831_p2, %p3830_p13 }
 0x50a   : > { %p3833_p8 = pnand %p3832_p5, %p3826_p6 }
 0x50c   : > { %3836 = shalt.err (!%p3833_p8)
}
 0x50d   : > { %s3837_s4 = scalar_lea.hbm %s4672_s2, 1024  ;;  %s3841_s28 = scalar_lea.hbm %s4808_s27, 2048 }
 0x50e   : > { %p3838_p7 = scmp.ne.s32.totalorder %s4672_s2, %s3837_s4  ;;  %p3842_p0 = scmp.lt.u32.totalorder %s4672_s2, %s4808_s27 }
 0x50f   : > { %p3843_p4 = scmp.lt.u32.totalorder %s3841_s28, %s3837_s4  ;;  %p3845_p3 = scmp.lt.u32.totalorder %s3837_s4, %s4672_s2 }
 0x510   : > { %p3839_p10 = pnand %p3838_p7, %p4809_p11 }
 0x511   : > { %p3844_p1 = por %p3843_p4, %p3842_p0 }
 0x512   : > { %p3840_p12 = pneg %p3839_p10 }
 0x513   : > { %p3846_p9 = por %p3845_p3, %p3844_p1 }
 0x515   : > { %p3847_p6 = pnand %p3846_p9, %p3840_p12 }
 0x517   : > { %3850 = shalt.err (!%p3847_p6)
}
 0x518   : > { %s3969_s20 = smov 128   ;;  %s3970_s25 = smov 8  }
 0x519   : > { %3485 = dma.vmem_to_hbm [thread:$0]  (%p4809_p11), %s4667_s10, 1024, %s4672_s2, %s4676_s3, %s3969_s20, %s3969_s20, %s3970_s25  }
 0x51a PF: > { %s4810_s30 = sld [smem:[#allocation24_spill]]  ;;  %s4811_s9 = sld [smem:[#allocation27_spill]] }
 0x51b   : > { %p3512_p13 = scmp.ge.s32.totalorder %s3953_s23, 2 }
 0x520   : > { %s2599_s8 = sand.u32 1, %s4810_s30   ;;  %p4812_p2 = scmp.ne.s32.totalorder %s4811_s9, 0 }
 0x521   : > { %s2600_s1 = scalar_lea.sflag [#allocation13], %s2599_s8 }
 0x522   : > { %p3502_p5 = pnand %p3512_p13, %p4812_p2 }
 0x524   : > { %3908 = dma.done.wait (!%p3502_p5), %s2600_s1, 1024  }
 0x525   : > { %3910 = vsyncadd (!%p3502_p5), %s2600_s1, 4294966272  ;;  %s28_s23 = sadd.s32 1, %s3953_s23   ;;  %s4813_s26 = smov %s4234_s16 }
 0x526   : > { %p25_p8 = scmp.ge.s32.totalorder %s28_s23, 10   ;;  %s4814_s10 = sld [smem:[#allocation28_spill]] }
 0x527   : > { %s4815_s13 = smov %s3917_s14  ;;  %s4816_s14 = smov %s3921_s15 }
 0x528   : > { %s4817_s15 = smov %s4255_s5  ;;  %s4818_s16 = smov %s3929_s17 }
 0x529   : > { %s4819_s17 = smov %s3933_s18  ;;  %s4820_s18 = smov %s4813_s26 }
 0x52a   : > { %s4821_s19 = smov %s3945_s21  ;;  %s4822_s20 = smov %s3949_s22 }
 0x52b   : > { %s4823_s21 = smov %s4826_s6  ;;  %27 = sbr.rel (!%p25_p8) target bundleno = 22 (0x16), region = 161 }
 0x52c   : > { %s4824_s22 = smov %s4814_s10 }
 0x532   :  { %2605 = vsyncpa [#allocation12], 1 }
 0x533   :  { %2607 = vsyncpa [#allocation12 + $0x1], 1 }
 0x534   :  { %2608 = vsyncpa [#allocation15], 1 }
 0x535   :  { %2609 = vsyncpa [#allocation18], 1 }
 0x536   :  { %2610 = vsyncpa [#allocation13], 1 }
 0x537   :  { %2612 = vsyncpa [#allocation13 + $0x1], 1 }

// kernel: tpu_custom_call.1
= control target key start
LH: loop header
LB: loop body
LE: loop exit
PB: predicated region body
PF: predicated region fallthrough
CT: control target
= control target key end

     0   :  { %s4737_s0 = inlined_call_operand.hbm [shape: f32[2,8,8,128], index: 0, kind: input, shape index: {}]   ;;  %s4738_s1 = inlined_call_operand.hbm [shape: bf16[128,128], index: 1, kind: input, shape index: {}]   ;;  %s4739_s2 = inlined_call_operand.vmem [shape: f32[1,128], index: 2, kind: input, shape index: {}]   ;;  %s4740_s3 = inlined_call_operand.vmem [shape: f32[1,128], index: 3, kind: input, shape index: {}]   ;;  %s4741_s4 = inlined_call_operand.hbm [shape: bf16[1152,128], index: 4, kind: input, shape index: {}]   ;;  %s4742_s5 = inlined_call_operand.vmem [shape: f32[1,128], index: 5, kind: input, shape index: {}]   ;;  %s4743_s6 = inlined_call_operand.vmem [shape: f32[1,128], index: 6, kind: input, shape index: {}]   ;;  %s4744_s7 = inlined_call_operand.hbm [shape: bf16[128,128], index: 7, kind: input, shape index: {}]   ;;  %s4745_s8 = inlined_call_operand.vmem [shape: f32[1,128], index: 8, kind: input, shape index: {}]   ;;  %s4746_s9 = inlined_call_operand.vmem [shape: f32[1,128], index: 9, kind: input, shape index: {}]   ;;  %s4747_s10 = inlined_call_operand.hbm [shape: f32[2,8,8,128], index: 10, kind: output, shape index: {}]  }
   0x1   :  { %4759 = sst [smem:[#allocation29_spill]] %s4738_s1 }
   0x2   :  { %4760 = sst [smem:[#allocation30_spill]] %s4739_s2 }
   0x3   :  { %4761 = sst [smem:[#allocation31_spill]] %s4740_s3 }
   0x4   :  { %4762 = sst [smem:[#allocation32_spill]] %s4741_s4 }
   0x5   :  { %4763 = sst [smem:[#allocation33_spill]] %s4742_s5 }
   0x6   :  { %4764 = sst [smem:[#allocation34_spill]] %s4743_s6 }
   0x7   :  { %4765 = sst [smem:[#allocation35_spill]] %s4744_s7 }
   0x8   :  { %4766 = sst [smem:[#allocation36_spill]] %s4745_s8 }
   0x9   :  { %4767 = sst [smem:[#allocation37_spill]] %s4746_s9 }
   0xa   :  { %4768 = sst [smem:[#allocation38_spill]] %s4747_s10 }
   0xb   :  { %15 = vsyncpa [#allocation12], 0 }
   0xc   :  { %17 = vsyncpa [#allocation12 + $0x1], 0 }
   0xd   :  { %18 = vsyncpa [#allocation15], 0 }
   0xe   :  { %19 = vsyncpa [#allocation18], 0 }
   0xf   :  { %20 = vsyncpa [#allocation13], 0 }
  0x10   :  { %22 = vsyncpa [#allocation13 + $0x1], 0  ;;  %s4026_s13 = smov 0   ;;  %s4028_s14 = smov 0  }
  0x11   :  { %s4030_s15 = smov 0   ;;  %s4032_s16 = smov 0  }
  0x12   :  { %s4034_s17 = smov 0   ;;  %s4036_s18 = smov 0  }
  0x13   :  { %s4038_s19 = smov 0   ;;  %s4040_s20 = smov 0  }
  0x14   :  { %s4042_s21 = smov 0   ;;  %s4044_s22 = smov 0  }
  0x15   :  { %s4046_s23 = smov 0  }
  0x16 LB: > { %4769 = sst [smem:[#allocation24_spill]] %s3913_s13  ;;  %s2743_s24 = sadd.s32 4294967295, %s3953_s23   ;;  %s3953_s23 = sphi %s4046_s23, %s28_s23   ;;  %s3949_s22 = sphi %s4044_s22, %s4824_s22   ;;  %s3945_s21 = sphi %s4042_s21, %s4823_s21   ;;  %s3941_s20 = sphi %s4040_s20, %s4822_s20   ;;  %s3937_s19 = sphi %s4038_s19, %s4821_s19   ;;  %s3933_s18 = sphi %s4036_s18, %s4820_s18   ;;  %s3929_s17 = sphi %s4034_s17, %s4819_s17   ;;  %s3925_s16 = sphi %s4032_s16, %s4818_s16   ;;  %s3921_s15 = sphi %s4030_s15, %s4817_s15   ;;  %s3917_s14 = sphi %s4028_s14, %s4816_s14   ;;  %s3913_s13 = sphi %s4026_s13, %s4815_s13  }
  0x17   : > { %4770 = sst [smem:[#allocation25_spill]] %s3941_s20  ;;  %s2744_s25 = sadd.s32 4294967294, %s3953_s23  }
  0x18   : > { %p79_p0 = scmp.ne.s32.totalorder %s3929_s17, %s3925_s16  ;;  %p4082_p1 = scmp.eq.s32.totalorder %s2743_s24, 0 }
  0x19   : > { %p301_p2 = scmp.ne.s32.totalorder %s3921_s15, %s3917_s14  ;;  %p302_p4 = scmp.eq.s32.totalorder %s2743_s24, 7 }
  0x1a   : > { %s4771_s26 = scalar_select %p4082_p1, 1, 0 }
  0x1b   : > { %p4091_p3 = por %p4082_p1, %p79_p0  ;;  %p307_p5 = scmp.ne.s32.totalorder %s3917_s14, %s3913_s13 }
  0x1c   : > { %p308_p6 = scmp.eq.s32.totalorder %s2744_s25, 7  ;;  %p4097_p7 = por %p302_p4, %p301_p2 }
  0x1d   : > { %s4772_s28 = scalar_select %p4091_p3, 1, 0 }
  0x1e   : > { %s4773_s29 = scalar_select %p4097_p7, 1, 0 }
  0x1f   : > { %p2745_p8 = scmp.ge.s32.totalorder %s3953_s23, 1  ;;  %p4102_p9 = por %p308_p6, %p307_p5 }
  0x20   : > { %4774 = sst [smem:[#allocation26_spill]] %s4773_s29  ;;  %p315_p10 = scmp.lt.s32.totalorder %s3953_s23, 9 }
  0x21   : > { %s4775_s30 = scalar_select %p4102_p9, 1, 0 }
  0x22   : > { %p4107_p11 = pnand %p2745_p8, %p315_p10  ;;  %s3955_s12 = smov [#allocation14]  }
  0x23   : > { %4776 = sst [smem:[#allocation27_spill]] %s4775_s30  ;;  %s327_s16 = sshll.u32 %s3955_s12, 4  ;;  %s4111_s16 = int_to_ptr.vmem [resolvable:$true] %s327_s16 }
  0x24   : > { %s4777_s11 = scalar_select %p4107_p11, 1, 0 }
  0x25   : > { %p3487_p12 = pneg %p4107_p11  ;;  %s3956_s25 = smov [#allocation16]  }
  0x26   : > { %s346_s27 = sshll.u32 %s3956_s25, 4  ;;  %s3957_s30 = smov [#allocation17]   ;;  %s4121_s27 = int_to_ptr.vmem [resolvable:$true] %s346_s27 }
  0x27   : > { %p4117_p13 = pnand %p3487_p12, %p4082_p1  ;;  %s4123_s13 = sshll.u32 %s3957_s30, 4  ;;  %s366_s13 = int_to_ptr.vmem [resolvable:$true] %s4123_s13 }
  0x28   : > { %s4779_s1 = sld [smem:[#allocation29_spill]] }
  0x29   : > { %p4133_p2 = pneg %p4117_p13 }
  0x2e   : > { %s3709_s12 = scalar_lea.hbm %s4779_s1, 1024 }
  0x2f   : > { %p3710_p0 = scmp.ne.s32.totalorder %s4779_s1, %s3709_s12  ;;  %p3716_p6 = scmp.lt.u32.totalorder %s3709_s12, %s4779_s1 }
  0x31   : > { %p3712_p4 = pnand %p4133_p2, %p3710_p0 }
  0x33   : > { %p3713_p5 = pneg %p3712_p4 }
  0x35   : > { %p3718_p8 = pnand %p3716_p6, %p3713_p5 }
  0x37   : > { %3721 = shalt.err (!%p3718_p8)
}
  0x38   : > { %s3722_s8 = scalar_lea.vmem %s4111_s16, 1024  ;;  %p3730_p7 = scmp.lt.s32.totalorder %s4111_s16, %s4111_s16 }
  0x39   : > { %p3723_p10 = scmp.ne.s32.totalorder %s4111_s16, %s3722_s8  ;;  %p3731_p1 = scmp.lt.s32.totalorder %s3722_s8, %s3722_s8 }
  0x3b   : > { %p3725_p12 = pnand %p3723_p10, %p4133_p2  ;;  %p3732_p0 = por %p3731_p1, %p3730_p7 }
  0x3d   : > { %p3726_p9 = pneg %p3725_p12 }
  0x3f   : > { %p3733_p4 = pnand %p3732_p0, %p3726_p9 }
  0x41   : > { %3736 = shalt.err (!%p3733_p4)
}
  0x42   : > { %s3958_s9 = smov 64   ;;  %s3959_s10 = smov 4  }
  0x43   : > { %3490 = dma.hbm_to_vmem [thread:$0]  (!%p4117_p13), %s4779_s1, 1024, %s4111_s16, [#allocation15], %s3958_s9, %s3958_s9, %s3959_s10  }
  0x44   : > { %s4781_s4 = sld [smem:[#allocation32_spill]] }
  0x4a   : > { %s3737_s8 = scalar_lea.hbm %s4781_s4, 9216 }
  0x4b   : > { %p3738_p1 = scmp.ne.s32.totalorder %s4781_s4, %s3737_s8  ;;  %p3744_p5 = scmp.lt.u32.totalorder %s3737_s8, %s4781_s4 }
  0x4d   : > { %p3740_p7 = pnand %p3738_p1, %p4133_p2 }
  0x4f   : > { %p3741_p9 = pneg %p3740_p7 }
  0x51   : > { %p3746_p6 = pnand %p3744_p5, %p3741_p9 }
  0x53   : > { %3749 = shalt.err (!%p3746_p6)
}
  0x54   : > { %s3750_s16 = scalar_lea.vmem %s4121_s27, 9216  ;;  %p3758_p0 = scmp.lt.s32.totalorder %s4121_s27, %s4121_s27 }
  0x55   : > { %p3751_p8 = scmp.ne.s32.totalorder %s4121_s27, %s3750_s16  ;;  %p3759_p4 = scmp.lt.s32.totalorder %s3750_s16, %s3750_s16 }
  0x57   : > { %p3753_p10 = pnand %p3751_p8, %p4133_p2  ;;  %p3760_p1 = por %p3759_p4, %p3758_p0 }
  0x59   : > { %p3754_p12 = pneg %p3753_p10 }
  0x5b   : > { %p3761_p7 = pnand %p3760_p1, %p3754_p12 }
  0x5d   : > { %3764 = shalt.err (!%p3761_p7)
}
  0x5e   : > { %3493 = dma.hbm_to_vmem [thread:$0]  (!%p4117_p13), %s4781_s4, 9216, %s4121_s27, [#allocation15], %s3958_s9, %s3958_s9, %s3959_s10  }
  0x5f   : > { %s4782_s7 = sld [smem:[#allocation35_spill]] }
  0x65   : > { %s3765_s29 = scalar_lea.hbm %s4782_s7, 1024 }
  0x66   : > { %p3766_p9 = scmp.ne.s32.totalorder %s4782_s7, %s3765_s29  ;;  %p3772_p8 = scmp.lt.u32.totalorder %s3765_s29, %s4782_s7 }
  0x68   : > { %p3768_p5 = pnand %p3766_p9, %p4133_p2 }
  0x6a   : > { %p3769_p6 = pneg %p3768_p5 }
  0x6c   : > { %p3774_p10 = pnand %p3772_p8, %p3769_p6 }
  0x6e   : > { %3777 = shalt.err (!%p3774_p10)
}
  0x6f   : > { %s3778_s16 = scalar_lea.vmem %s366_s13, 1024  ;;  %p3786_p1 = scmp.lt.s32.totalorder %s366_s13, %s366_s13 }
  0x70   : > { %p3779_p12 = scmp.ne.s32.totalorder %s366_s13, %s3778_s16  ;;  %p3787_p7 = scmp.lt.s32.totalorder %s3778_s16, %s3778_s16 }
  0x72   : > { %p3781_p0 = pnand %p3779_p12, %p4133_p2  ;;  %p3788_p3 = por %p3787_p7, %p3786_p1 }
  0x74   : > { %p3782_p4 = pneg %p3781_p0 }
  0x76   : > { %p3789_p11 = pnand %p3788_p3, %p3782_p4 }
  0x78   : > { %3792 = shalt.err (!%p3789_p11)
}
  0x79   : > { %3496 = dma.hbm_to_vmem [thread:$0]  (!%p4117_p13), %s4782_s7, 1024, %s366_s13, [#allocation18], %s3958_s9, %s3958_s9, %s3959_s10  }
  0x7a   : > { %s43_s6 = sadd.s32 1, %s3945_s21  ;;  %s47_s24 = sadd.s32 1, %s3949_s22 }
  0x7b   : > { %p45_p3 = scmp.ge.s32.totalorder %s43_s6, 2  ;;  %p51_p11 = scmp.eq.s32.totalorder %s3949_s22, 0 }
  0x7c   : > { %p52_p2 = scmp.eq.s32.totalorder %s3949_s22, 3  ;;  %s66_s3 = sadd.s32 1, %s3933_s18 }
  0x7d   : > { %s4826_s6 = smov (%p45_p3, %s43_s6), 0  ;;  %s4828_s24 = smov (!%p45_p3, %s47_s24), %s3949_s22 }
  0x7e   : > { %p53_p9 = por %p52_p2, %p51_p11  ;;  %p49_p5 = scmp.ge.s32.totalorder %s4828_s24, 4 }
  0x7f   : > { %p73_p6 = scmp.ne.s32.totalorder %s3933_s18, %s3929_s17  ;;  %p74_p13 = scmp.eq.s32.totalorder %s3953_s23, 0 }
  0x80   : > { %s54_s5 = scalar_select %p53_p9, %s3945_s21, 1 }
  0x81   : > { %s4830_s24 = smov (%p49_p5, %s4828_s24), 0  ;;  %p3508_p8 = scmp.lt.s32.totalorder %s3953_s23, 8 }
  0x82   : > { %4783 = sst [smem:[#allocation28_spill]] %s4830_s24  ;;  %p56_p10 = scmp.eq.s32.totalorder %s4830_s24, 0 }
  0x83   : > { %p57_p12 = scmp.eq.s32.totalorder %s4830_s24, 3  ;;  %p4224_p0 = por %p74_p13, %p73_p6 }
  0x84   : > { %s385_s9 = sand.u32 1, %s3933_s18   ;;  %s2940_s30 = sshll.u32 %s54_s5, 10 }
  0x85   : > { %p58_p4 = por %p57_p12, %p56_p10  ;;  %s2750_s12 = sshll.u32 %s385_s9, 6 }
  0x86   : > { %s279_s10 = scalar_select %p52_p2, 1, 0 }
  0x87   : > { %s59_s20 = scalar_select %p58_p4, %s4826_s6, 1 }
  0x88   : > { %s280_s29 = smul.u32 %s3945_s21, %s279_s10  ;;  %s4240_s4 = scalar_lea.hbm %s4737_s0, %s2940_s30 }
  0x89   : > { %s61_s25 = ssub.s32 %s54_s5, %s59_s20  ;;  %s389_s7 = scalar_lea.vmem [#allocation11], %s2750_s12 }
  0x8a   : > { %p64_p1 = scmp.eq.s32.totalorder %s61_s25, 0  ;;  %s403_s24 = sshll.u32 %s389_s7, 4  ;;  %s4250_s24 = int_to_ptr.vmem [resolvable:$true] %s403_s24 }
  0x8b   : > { %s283_s8 = scalar_select %p57_p12, 1, 0 }
  0x8c   : > { %s4234_s16 = scalar_select %p64_p1, %s3933_s18, %s66_s3  }
  0x8d   : > { %s284_s27 = smul.u32 %s283_s8, %s4826_s6  ;;  %p4246_p7 = pnand %p3508_p8, %p4224_p0 }
  0x8e   : > { %s4786_s1 = sadd.s32 1, %s3921_s15  ;;  %s4257_s20 = scalar_lea.sflag [#allocation12], %s385_s9 }
  0x8f   : > { %s286_s3 = ssub.s32 %s280_s29, %s284_s27  ;;  %s3793_s12 = scalar_lea.hbm %s4240_s4, 1024 }
  0x90   : > { %p289_p3 = scmp.eq.s32.totalorder %s286_s3, 0  ;;  %p3794_p11 = scmp.ne.s32.totalorder %s4240_s4, %s3793_s12 }
  0x91   : > { %p3795_p2 = pneg %p4246_p7  ;;  %s3798_s29 = scalar_lea.hbm %s4737_s0, 2048 }
  0x92   : > { %s4255_s5 = scalar_select %p289_p3, %s3921_s15, %s4786_s1  }
  0x93   : > { %p3796_p9 = pnand %p3795_p2, %p3794_p11  ;;  %p3799_p6 = scmp.lt.u32.totalorder %s4240_s4, %s4737_s0 }
  0x94   : > { %p3800_p13 = scmp.lt.u32.totalorder %s3798_s29, %s3793_s12  ;;  %p3802_p10 = scmp.lt.u32.totalorder %s3793_s12, %s4240_s4 }
  0x95   : > { %p3797_p5 = pneg %p3796_p9 }
  0x96   : > { %p3801_p8 = por %p3800_p13, %p3799_p6 }
  0x98   : > { %p3803_p12 = por %p3802_p10, %p3801_p8 }
  0x9a   : > { %p3804_p0 = pnand %p3803_p12, %p3797_p5 }
  0x9c   : > { %3807 = shalt.err (!%p3804_p0)
}
  0x9d   : > { %s3808_s9 = scalar_lea.vmem %s4250_s24, 1024  ;;  %s3960_s8 = smov [#allocation11]  }
  0x9e   : > { %p3809_p4 = scmp.ne.s32.totalorder %s4250_s24, %s3808_s9  ;;  %s3813_s27 = sshll.u32 %s3960_s8, 4  ;;  %s3814_s27 = int_to_ptr.vmem [resolvable:$false] %s3813_s27 }
  0x9f   : > { %s3815_s2 = scalar_lea.vmem %s3814_s27, 2048  ;;  %p3816_p11 = scmp.lt.s32.totalorder %s4250_s24, %s3814_s27 }
  0xa0   : > { %p3811_p1 = pnand %p3809_p4, %p3795_p2  ;;  %p3817_p9 = scmp.lt.s32.totalorder %s3815_s2, %s3808_s9 }
  0xa2   : > { %p3812_p3 = pneg %p3811_p1  ;;  %p3818_p6 = por %p3817_p9, %p3816_p11 }
  0xa4   : > { %p3819_p13 = pnand %p3818_p6, %p3812_p3 }
  0xa6   : > { %3822 = shalt.err (!%p3819_p13)
}
  0xa7   : > { %s3961_s3 = smov 128   ;;  %s3962_s1 = smov 8  }
  0xa8   : > { %3500 = dma.hbm_to_vmem [thread:$0]  (!%p4246_p7), %s4240_s4, 1024, %s4250_s24, %s4257_s20, %s3961_s3, %s3961_s3, %s3962_s1  }
  0xa9   : > { %p4787_p2 = scmp.ne.s32.totalorder %s4777_s11, 0 }
  0xaa   : > { %s417_s12 = sand.u32 (!%p4787_p2), 1, %s3929_s17   ;;  %p4788_p5 = scmp.ne.s32.totalorder (!%p4787_p2), %s4772_s28, 0 }
  0xab   : > { %415 = sbr.rel (%p4787_p2) target bundleno = 1306 (0x51a), region = 60  ;;  %s2754_s7 = sshll.u32 (!%p4787_p2), %s417_s12, 6 }
  0xac   : > { %s418_s13 = scalar_lea.sflag (!%p4787_p2), [#allocation12], %s417_s12  ;;  %s4288_s29 = scalar_lea.vmem (!%p4787_p2), [#allocation11], %s2754_s7 }
  0xb2   : > { %3896 = dma.done.wait (%p4788_p5), %s418_s13, 1024  }
  0xb3   : > { %3898 = vsyncadd (%p4788_p5), %s418_s13, 4294966272  ;;  %p4789_p8 = scmp.ne.s32.totalorder %s4771_s26, 0 }
  0xb5   : > { %3900 = dma.done.wait (%p4789_p8), [#allocation15], 10240  }
  0xb6   : > { %3902 = vsyncadd (%p4789_p8), [#allocation15], 4294957056 }
  0xb7   : > { %3904 = dma.done.wait (%p4789_p8), [#allocation18], 1024  }
  0xb8   : > { %3906 = vsyncadd (%p4789_p8), [#allocation18], 4294966272  ;;  %s467_s4 = sand.u32 1, %s3917_s14   ;;  %p482_p7 = scmp.eq.s32.totalorder %s3937_s19, 0 }
  0xb9   : > { %s2758_s28 = sshll.u32 %s467_s4, 6  ;;  %s4790_s24 = sld [smem:[#allocation25_spill]] }
  0xba   : > { %s4306_s11 = scalar_lea.vmem [#allocation19], %s2758_s28 }
  0xbf   : > { %p2760_p10 = scmp.ne.s32.totalorder %s4790_s24, 0 }
  0xc1   : > { %490 = sbr.rel (%p2760_p10) target bundleno = 486 (0x1e6), region = 80 }
  0xc8   : > { %492 = sbr.rel (!%p482_p7) target bundleno = 207 (0xcf), region = 84  ;;  %v3963_v0 = vmov (%p482_p7), 0.0  }
  0xc9   : > { %493 = vst [vmem:[#allocation5] sm:$0x3] (%p482_p7), %v3963_v0 }
  0xcf PF: > { %v3615_v1 = vld [vmem:[#allocation14] sm:$0xff]   ;;  %v3616_v2 = vld [vmem:[#allocation14 + $0x8] sm:$0xff]   ;;  %v3617_v3 = vld [vmem:[#allocation14 + $0x10] sm:$0xff]   ;;  %s2942_s26 = smul.u32 40, %s3937_s19  ;;  %v3964_v21 = vmov 0  }
  0xd0   : > { %3351 = vmatprep.subr.bf16.mxu0 %v3615_v1  ;;  %3423 = vmatprep.subr.bf16.mxu1 %v3615_v1  ;;  %v3618_v4 = vld [vmem:[#allocation14 + $0x18] sm:$0xff]   ;;  %v505_v5 = vld [vmem:[%s4288_s29] sm:$0xff]  ;;  %v506_v6 = vld [vmem:[%s4288_s29 + $0x8] sm:$0xff] }
  0xd1   : > { %3352 = vmatpush3.bf16.msra.mxu0 %v3615_v1  ;;  %3431 = vmatpush3.bf16.msra.mxu1 %v3615_v1  ;;  %v513_v7 = vpack.c.bf16 %v506_v6, %v505_v5  ;;  %v509_v8 = vld [vmem:[%s4288_s29 + $0x20] sm:$0xff]  ;;  %v510_v9 = vld [vmem:[%s4288_s29 + $0x28] sm:$0xff]  ;;  %v3621_v13 = vld [vmem:[#allocation14 + $0x30] sm:$0xff]   ;;  %s499_s10 = scalar_lea.vmem [#allocation2], %s2942_s26 }
  0xd2   : > { %3353 = vmatprep.subr.bf16.mxu0 %v3616_v2  ;;  %3424 = vmatprep.subr.bf16.mxu1 %v3616_v2  ;;  %v515_v10 = vpack.c.bf16 %v510_v9, %v509_v8  ;;  %v3619_v11 = vld [vmem:[#allocation14 + $0x20] sm:$0xff]   ;;  %v3620_v12 = vld [vmem:[#allocation14 + $0x28] sm:$0xff]   ;;  %v3622_v14 = vld [vmem:[#allocation14 + $0x38] sm:$0xff]   ;;  %500 = vst [vmem:[%s499_s10] sm:$0xf] %v3964_v21 }
  0xd3   : > { %3367 = vmatprep.mubr.bf16.mxu0 %v513_v7  ;;  %v507_v15 = vld [vmem:[%s4288_s29 + $0x10] sm:$0xff]  ;;  %v508_v16 = vld [vmem:[%s4288_s29 + $0x18] sm:$0xff]  ;;  %2763 = vst [vmem:[%s499_s10 + $0x24] sm:$0xf] %v3964_v21 }
  0xd4   : > { %3371 = vmatprep.mubr.bf16.mxu1 %v515_v10  ;;  %v511_v17 = vld [vmem:[%s4288_s29 + $0x30] sm:$0xff]  ;;  %v512_v18 = vld [vmem:[%s4288_s29 + $0x38] sm:$0xff]  ;;  %v514_v19 = vpack.c.bf16 %v508_v16, %v507_v15 }
  0xd5   : > { %3354 = vmatpush3.bf16.msra.mxu0 %v3616_v2  ;;  %3432 = vmatpush3.bf16.msra.mxu1 %v3616_v2  ;;  %v516_v20 = vpack.c.bf16 %v512_v18, %v511_v17  ;;  %v646_v2 = vld [vmem:[#allocation5] sm:$0x1]  ;;  %v662_v5 = vld [vmem:[#allocation5 + $0x1] sm:$0x1] }
  0xd6   : > { %3355 = vmatprep.subr.bf16.mxu0 %v3617_v3  ;;  %3425 = vmatprep.subr.bf16.mxu1 %v3617_v3 }
  0xd9   : > { %3356 = vmatpush3.bf16.msra.mxu0 %v3617_v3  ;;  %3433 = vmatpush3.bf16.msra.mxu1 %v3617_v3 }
  0xda   : > { %3357 = vmatprep.subr.bf16.mxu0 %v3618_v4  ;;  %3426 = vmatprep.subr.bf16.mxu1 %v3618_v4 }
  0xdd   : > { %3358 = vmatpush3.bf16.msra.mxu0 %v3618_v4  ;;  %3434 = vmatpush3.bf16.msra.mxu1 %v3618_v4 }
  0xde   : > { %3359 = vmatprep.subr.bf16.mxu0 %v3619_v11  ;;  %3427 = vmatprep.subr.bf16.mxu1 %v3619_v11 }
  0xe1   : > { %3360 = vmatpush3.bf16.msra.mxu0 %v3619_v11  ;;  %3435 = vmatpush3.bf16.msra.mxu1 %v3619_v11 }
  0xe2   : > { %3361 = vmatprep.subr.bf16.mxu0 %v3620_v12  ;;  %3428 = vmatprep.subr.bf16.mxu1 %v3620_v12 }
  0xe5   : > { %3362 = vmatpush3.bf16.msra.mxu0 %v3620_v12  ;;  %3436 = vmatpush3.bf16.msra.mxu1 %v3620_v12 }
  0xe6   : > { %3363 = vmatprep.subr.bf16.mxu0 %v3621_v13  ;;  %3429 = vmatprep.subr.bf16.mxu1 %v3621_v13 }
  0xe9   : > { %3364 = vmatpush3.bf16.msra.mxu0 %v3621_v13  ;;  %3437 = vmatpush3.bf16.msra.mxu1 %v3621_v13 }
  0xea   : > { %3365 = vmatprep.subr.bf16.mxu0 %v3622_v14  ;;  %3430 = vmatprep.subr.bf16.mxu1 %v3622_v14 }
  0xed   : > { %3366 = vmatpush3.bf16.msra.mxu0 %v3622_v14  ;;  %3438 = vmatpush3.bf16.msra.mxu1 %v3622_v14 }
  0xf0   : > { %3368 = vmatmul.mubr.bf16.vlgmr.msra.gmra.mrb[0].mxu0 %v514_v19  ;;  %3372 = vmatmul.mubr.bf16.vlgmr.msra.gmra.mrb[0].mxu1 %v516_v20 }
 0x1c3   : > { %v3369_v22 = vpop.f32.mrb[0].mxu0  ;;  %v3373_v23 = vpop.f32.mrb[0].mxu1 }
 0x1c4   : > { %v615_v24 = vpop.f32.mrb[1].mxu0  ;;  %v631_v25 = vpop.f32.mrb[1].mxu1  ;;  %v665_v38 = vmul.f32 %v3369_v22, %v3369_v22  ;;  %v669_v50 = vmul.f32 %v3373_v23, %v3373_v23 }
 0x1c5   : > { %v686_v26 = vpack.c.bf16 %v615_v24, %v615_v24  ;;  %v3370_v27 = vpop.f32.mrb[2].mxu0  ;;  %v3374_v28 = vpop.f32.mrb[2].mxu1  ;;  %v663_v33 = vmul.f32 %v615_v24, %v615_v24  ;;  %v667_v42 = vmul.f32 %v631_v25, %v631_v25 }
 0x1c6   : > { %v3046_v29 = vpack.c.bf16 %v631_v25, %v3370_v27  ;;  %v618_v30 = vpop.f32.mrb[3].mxu0  ;;  %v693_v31 = vpack.c.bf16 %v3374_v28, %v3374_v28  ;;  %v634_v32 = vpop.f32.mrb[3].mxu1  ;;  %v666_v41 = vmul.f32 %v3370_v27, %v3370_v27  ;;  %v670_v53 = vmul.f32 %v3374_v28, %v3374_v28 }
 0x1c7   : > { %2773 = vst [vmem:[%s499_s10 + $0x4] sm:$0xf] %v686_v26  ;;  %v647_v34 = vadd.f32 %v618_v30, %v615_v24  ;;  %v664_v35 = vmul.f32 %v618_v30, %v618_v30  ;;  %v3041_v36 = vpack.c.bf16 %v3369_v22, %v618_v30  ;;  %v3051_v37 = vpack.c.bf16 %v3373_v23, %v634_v32 }
 0x1c8   : > { %3138 = vst [vmem:[%s499_s10 + $0x10] sm:$0xff] %v3046_v29   ;;  %2780 = vst [vmem:[%s499_s10 + $0x20] sm:$0xf] %v693_v31  ;;  %v668_v48 = vmul.f32 %v634_v32, %v634_v32 }
 0x1c9   : > { %v648_v39 = vadd.f32 %v3369_v22, %v647_v34  ;;  %v671_v40 = vadd.f32 %v664_v35, %v663_v33  ;;  %3137 = vst [vmem:[%s499_s10 + $0x8] sm:$0xff] %v3041_v36   ;;  %3139 = vst [vmem:[%s499_s10 + $0x18] sm:$0xff] %v3051_v37  }
 0x1cb   : > { %v672_v43 = vadd.f32 %v671_v40, %v665_v38  ;;  %v649_v44 = vadd.f32 %v3370_v27, %v648_v39 }
 0x1cd   : > { %v650_v45 = vadd.f32 %v649_v44, %v631_v25  ;;  %v673_v46 = vadd.f32 %v672_v43, %v666_v41 }
 0x1cf   : > { %v651_v47 = vadd.f32 %v650_v45, %v634_v32  ;;  %v674_v49 = vadd.f32 %v673_v46, %v667_v42 }
 0x1d1   : > { %v652_v51 = vadd.f32 %v3373_v23, %v651_v47  ;;  %v675_v52 = vadd.f32 %v674_v49, %v668_v48 }
 0x1d3   : > { %v653_v54 = vadd.f32 %v3374_v28, %v652_v51  ;;  %v676_v55 = vadd.f32 %v675_v52, %v669_v50 }
 0x1d5   : > { %v654_v56 = vrot.slane %v653_v54, 4  ;;  %v677_v57 = vadd.f32 %v676_v55, %v670_v53 }
 0x1d7   : > { %v655_v58 = vadd.f32 %v654_v56, %v653_v54  ;;  %v678_v59 = vrot.slane %v677_v57, 4 }
 0x1d9   : > { %v656_v60 = vrot.slane %v655_v58, 2  ;;  %v679_v61 = vadd.f32 %v678_v59, %v677_v57 }
 0x1db   : > { %v657_v62 = vadd.f32 %v656_v60, %v655_v58  ;;  %v680_v63 = vrot.slane %v679_v61, 2 }
 0x1dd   : > { %v658_v0 = vrot.slane %v657_v62, 1  ;;  %v681_v1 = vadd.f32 %v680_v63, %v679_v61 }
 0x1df   : > { %v659_v3 = vadd.f32 %v658_v0, %v657_v62  ;;  %v682_v4 = vrot.slane %v681_v1, 1 }
 0x1e1   : > { %v660_v6 = vadd.f32 %v659_v3, %v646_v2  ;;  %v683_v7 = vadd.f32 %v682_v4, %v681_v1 }
 0x1e3   : > { %661 = vst [vmem:[#allocation5] sm:$0x1] %v660_v6  ;;  %v684_v8 = vadd.f32 %v683_v7, %v662_v5 }
 0x1e5   : > { %685 = vst [vmem:[#allocation5 + $0x1] sm:$0x1] %v684_v8 }
 0x1e6 PF: > { %s4791_s20 = sld [smem:[#allocation25_spill]] }
 0x1ec   : > { %p2781_p12 = scmp.ne.s32.totalorder %s4791_s20, 1 }
 0x1ee   : > { %710 = sbr.rel (%p2781_p12) target bundleno = 888 (0x378), region = 92 }
 0x1f5   : > { %712 = sbr.rel (!%p482_p7) target bundleno = 530 (0x212), region = 96  ;;  %v714_v9 = vld [vmem:[#allocation5] sm:$0x1] (%p482_p7)  ;;  %v716_v10 = vld [vmem:[#allocation5 + $0x1] sm:$0x1] (%p482_p7)  ;;  %v3965_v11 = vmov (%p482_p7), 0.0  }
 0x1f6   : > { %713 = vst [vmem:[#allocation6] sm:$0x3] (%p482_p7), %v3965_v11  ;;  %v715_v12 = vmul.f32 (%p482_p7), 0.0078125, %v714_v9  ;;  %v717_v13 = vmul.f32 (%p482_p7), 0.0078125, %v716_v10  ;;  %s4792_s9 = sld [smem:[#allocation30_spill]] (%p482_p7)  ;;  %s4793_s2 = sld [smem:[#allocation31_spill]] (%p482_p7) }
 0x1f8   : > { %v718_v14 = vmul.f32 (%p482_p7), %v715_v12, %v715_v12 }
 0x1fa   : > { %v719_v15 = vsub.f32 (%p482_p7), %v717_v13, %v718_v14 }
 0x1fc   : > { %v720_v16 = vmax.f32 %v719_v15, 0.0  ;;  %v723_v18 = vld [vmem:[%s4792_s9] sm:$0x1] }
 0x1fd   : > { %v725_v21 = vld [vmem:[%s4793_s2] sm:$0x1] }
 0x1fe   : > { %v721_v17 = vadd.f32 1e-05, %v720_v16 }
 0x200   : > { %3623 = vrsqrt.f32 %v721_v17 }
 0x20a   : > { %v3624_v19 = vpop.eup %3623 }
 0x20b   : > { %v724_v20 = vmul.f32 %v3624_v19, %v723_v18 }
 0x20d   : > { %728 = vst [vmem:[#allocation8] sm:$0x1] %v724_v20  ;;  %v726_v22 = vmul.f32 %v724_v20, %v715_v12 }
 0x20f   : > { %v727_v23 = vsub.f32 %v725_v21, %v726_v22 }
 0x211   : > { %729 = vst [vmem:[#allocation8 + $0x1] sm:$0x1] %v727_v23 }
 0x212 PF: > { %v3625_v24 = vld [vmem:[#allocation16 + $0x40] sm:$0xff]   ;;  %v3629_v28 = vld [vmem:[#allocation16 + $0x48] sm:$0xff]   ;;  %v3633_v32 = vld [vmem:[#allocation16 + $0x50] sm:$0xff]   ;;  %v3966_v46 = vmov 0.0   ;;  %vm894_vm0 = vcmask 1040384   ;;  %s2943_s3 = smul.u32 40, %s3937_s19 }
 0x213   : > { %v3626_v25 = vld [vmem:[#allocation16 + $0xc0] sm:$0xff]   ;;  %3167 = vmatprep.subr.bf16.mxu0 %v3625_v24  ;;  %v3630_v29 = vld [vmem:[#allocation16 + $0xc8] sm:$0xff]   ;;  %v3634_v33 = vld [vmem:[#allocation16 + $0xd0] sm:$0xff]   ;;  %v4329_v47 = vrot.slane %v3966_v46, 7  ;;  %vm965_vm1 = vsmask.f32 3328 }
 0x214   : > { %v3627_v26 = vld [vmem:[#allocation16] sm:$0xff]   ;;  %3207 = vmatprep.subr.bf16.mxu1 %v3626_v25  ;;  %v3631_v30 = vld [vmem:[#allocation16 + $0x8] sm:$0xff]   ;;  %v3635_v34 = vld [vmem:[#allocation16 + $0x10] sm:$0xff]   ;;  %s4340_s1 = scalar_lea.vmem [#allocation2], %s2943_s3  ;;  %vm1080_vm2 = vcmask 1042432   ;;  %vm1081_vm3 = vcmask 1046532  }
 0x215   : > { %v3628_v27 = vld [vmem:[#allocation16 + $0x80] sm:$0xff]   ;;  %3168 = vmatpush3.bf16.msra.mxu0 %v3627_v26  ;;  %v3632_v31 = vld [vmem:[#allocation16 + $0x88] sm:$0xff]   ;;  %v3636_v35 = vld [vmem:[#allocation16 + $0x90] sm:$0xff]   ;;  %v895_v52 = vsel %vm894_vm0, 0.0, %v4329_v47  ;;  %v905_v60 = vsel %vm894_vm0, %v4329_v47, 0.0  ;;  %s3033_s12 = sshll.u32 %s3937_s19, 5 }
 0x216   : > { %3208 = vmatpush3.bf16.msra.mxu1 %v3628_v27  ;;  %3169 = vmatprep.subr.bf16.mxu0 %v3629_v28  ;;  %v3637_v36 = vld [vmem:[#allocation16 + $0x58] sm:$0xff]   ;;  %v3641_v40 = vld [vmem:[#allocation16 + $0x60] sm:$0xff]   ;;  %v3645_v44 = vld [vmem:[#allocation16 + $0x68] sm:$0xff]   ;;  %v4334_v56 = vpack.c.bf16 %v895_v52, %v895_v52  ;;  %v2945_v6 = vpack.c.bf16 %v905_v60, %v905_v60  ;;  %vm966_vm5 = vsmask.f32 7440  ;;  %s2187_s7 = scalar_lea.vmem [#allocation3], %s3033_s12 }
 0x217   : > { %3209 = vmatprep.subr.bf16.mxu1 %v3630_v29  ;;  %v3638_v37 = vld [vmem:[#allocation16 + $0xd8] sm:$0xff]   ;;  %v3642_v41 = vld [vmem:[#allocation16 + $0xe0] sm:$0xff]   ;;  %v3646_v45 = vld [vmem:[#allocation16 + $0xe8] sm:$0xff]  }
 0x218   : > { %v3639_v38 = vld [vmem:[#allocation16 + $0x18] sm:$0xff]   ;;  %v3643_v42 = vld [vmem:[#allocation16 + $0x20] sm:$0xff]   ;;  %v3647_v48 = vld [vmem:[#allocation16 + $0x28] sm:$0xff]   ;;  %v969_v63 = vshrl.u32 %v4334_v56, 16  ;;  %v972_v0 = vshll.u32 %v4334_v56, 16  ;;  %v978_v15 = vshll.u32 %v2945_v6, 16 }
 0x219   : > { %3170 = vmatpush3.bf16.msra.mxu0 %v3631_v30  ;;  %v3640_v39 = vld [vmem:[#allocation16 + $0x98] sm:$0xff]   ;;  %v3644_v43 = vld [vmem:[#allocation16 + $0xa0] sm:$0xff]   ;;  %v3648_v49 = vld [vmem:[#allocation16 + $0xa8] sm:$0xff]  }
 0x21a   : > { %3210 = vmatpush3.bf16.msra.mxu1 %v3632_v31  ;;  %3171 = vmatprep.subr.bf16.mxu0 %v3633_v32  ;;  %v3649_v50 = vld [vmem:[#allocation16 + $0x70] sm:$0xff]   ;;  %v3653_v55 = vld [vmem:[#allocation16 + $0x78] sm:$0xff]   ;;  %v737_v62 = vld [vmem:[%s4340_s1 + $0x4] ss:$28 sps:$4 sm:$0xff]   ;;  %v971_v9 = vrot.slane %v969_v63, 4  ;;  %v974_v10 = vrot.slane %v972_v0, 5 }
 0x21b   : > { %3211 = vmatprep.subr.bf16.mxu1 %v3634_v33  ;;  %v3650_v51 = vld [vmem:[#allocation16 + $0xf0] sm:$0xff]   ;;  %v3654_v57 = vld [vmem:[#allocation16 + $0xf8] sm:$0xff]   ;;  %v747_v2 = vunpack.c.l.bf16 %v737_v62  ;;  %v3657_v3 = vld [vmem:[#allocation16 + $0x140] sm:$0xff]   ;;  %v754_v12 = vunpack.c.h.bf16 %v737_v62  ;;  %v980_v23 = vrot.slane %v978_v15, 5 }
 0x21c   : > { %v3651_v53 = vld [vmem:[#allocation16 + $0x30] sm:$0xff]   ;;  %v3655_v58 = vld [vmem:[#allocation16 + $0x38] sm:$0xff]   ;;  %v3658_v11 = vld [vmem:[#allocation16 + $0x1c0] sm:$0xff]   ;;  %v975_v19 = vor.u32 %v974_v10, %v971_v9 }
 0x21d   : > { %3172 = vmatpush3.bf16.msra.mxu0 %v3635_v34  ;;  %v3652_v54 = vld [vmem:[#allocation16 + $0xb0] sm:$0xff]   ;;  %v3656_v59 = vld [vmem:[#allocation16 + $0xb8] sm:$0xff]   ;;  %vm2973_vm4 = vmneg %vm894_vm0 }
 0x21e   : > { %3212 = vmatpush3.bf16.msra.mxu1 %v3636_v35  ;;  %3173 = vmatprep.subr.bf16.mxu0 %v3637_v36  ;;  %v4338_v61 = vld [vmem:[#allocation8] ss:$0 sm:$0xff]  ;;  %v3140_v1 = vld [vmem:[%s4340_s1 + $0x8] sm:$0xff]   ;;  %v4346_v4 = vld [vmem:[#allocation8 + $0x1] ss:$0 sm:$0xff]  ;;  %v976_v30 = vrot.slane %v975_v19, 4 }
 0x21f   : > { %3213 = vmatprep.subr.bf16.mxu1 %v3638_v37  ;;  %v3055_v5 = vunpack.c.l.bf16 %v3140_v1  ;;  %v761_v7 = vmul.f32 %v4338_v61, %v747_v2  ;;  %v3056_v17 = vunpack.c.h.bf16 %v3140_v1  ;;  %v768_v20 = vmul.f32 %v4338_v61, %v754_v12  ;;  %vm4370_vm6 = vmpackc.low %vm2973_vm4, %vm2973_vm4  ;;  %v3660_v60 = vld [vmem:[#allocation16 + $0x180] sm:$0xff]   ;;  %v3664_v15 = vld [vmem:[#allocation16 + $0x188] sm:$0xff]  }
 0x220   : > { %v2801_v35 = vrot.slane %v4334_v56, 9  ;;  %vm4379_vm7 = vmor %vm965_vm1, %vm966_vm5 }
 0x221   : > { %3174 = vmatpush3.bf16.msra.mxu0 %v3639_v38  ;;  %v762_v8 = vmul.f32 %v3055_v5, %v4338_v61  ;;  %v775_v13 = vadd.f32 %v4346_v4, %v761_v7  ;;  %v763_v26 = vmul.f32 %v3056_v17, %v4338_v61  ;;  %v782_v31 = vadd.f32 %v4346_v4, %v768_v20  ;;  %vm4392_vm8 = vmor %vm1080_vm2, %vm1081_vm3 }
 0x222   : > { %3214 = vmatpush3.bf16.msra.mxu1 %v3640_v39  ;;  %3175 = vmatprep.subr.bf16.mxu0 %v3641_v40  ;;  %v3694_v40 = vld [vmem:[#allocation16 + $0x228] sm:$0xff]  }
 0x223   : > { %3215 = vmatprep.subr.bf16.mxu1 %v3642_v41  ;;  %v776_v14 = vadd.f32 %v4346_v4, %v762_v8  ;;  %v785_v16 = vmax.f32 %v775_v13, 0.0 }
 0x225   : > { %3176 = vmatpush3.bf16.msra.mxu0 %v3643_v42  ;;  %v786_v18 = vmax.f32 %v776_v14, 0.0  ;;  %v4353_v21 = vrot.slane %v785_v16, 7  ;;  %v3661_v14 = vld [vmem:[#allocation16 + $0x148] sm:$0xff]  }
 0x226   : > { %3216 = vmatpush3.bf16.msra.mxu1 %v3644_v43  ;;  %3177 = vmatprep.subr.bf16.mxu0 %v3645_v44  ;;  %v1085_v43 = vrot.slane %v2945_v6, 5  ;;  %v777_v44 = vadd.f32 %v4346_v4, %v763_v26  ;;  %v3659_v6 = vld [vmem:[#allocation16 + $0x100] sm:$0xff]  }
 0x227   : > { %3217 = vmatprep.subr.bf16.mxu1 %v3646_v45  ;;  %v4355_v22 = vrot.slane %v786_v18, 7  ;;  %v896_v24 = vsel %vm894_vm0, 0.0, %v4353_v21  ;;  %v906_v25 = vsel %vm894_vm0, %v4353_v21, 0.0  ;;  %v2976_v9 = vpack.c.bf16 %v4353_v21, %v4329_v47 }
 0x228   : > { %v2946_v28 = vpack.c.bf16 %v896_v24, %v896_v24  ;;  %v2947_v29 = vpack.c.bf16 %v906_v25, %v906_v25  ;;  %v787_v62 = vmax.f32 %v777_v44, 0.0  ;;  %v3666_v24 = vld [vmem:[#allocation16 + $0x1d0] sm:$0xff]  }
 0x229   : > { %3178 = vmatpush3.bf16.msra.mxu0 %v3647_v48  ;;  %v897_v27 = vsel %vm894_vm0, 0.0, %v4355_v22  ;;  %v907_v32 = vsel %vm894_vm0, %v4355_v22, 0.0  ;;  %v2996_v39 = vpack.c.bf16 %v4355_v22, %v4353_v21 }
 0x22a   : > { %3218 = vmatpush3.bf16.msra.mxu1 %v3648_v49  ;;  %3179 = vmatprep.subr.bf16.mxu0 %v3649_v50  ;;  %v4368_v33 = vpack.c.bf16 %v897_v27, %v897_v27  ;;  %v983_v36 = vshrl.u32 %v2946_v28, 16  ;;  %v986_v37 = vshll.u32 %v2946_v28, 16  ;;  %v992_v38 = vshll.u32 %v2947_v29, 16  ;;  %v4432_v27 = vld [vmem:[%s4340_s1 + $0x18] sm:$0xff]  }
 0x22b   : > { %3219 = vmatprep.subr.bf16.mxu1 %v3650_v51  ;;  %v4386_v45 = vpack.c.bf16 %v907_v32, %v907_v32  ;;  %2997 = vmatprep.mubr.msk.bf16.mxu1 %vm4370_vm6, %v2996_v39  ;;  %v792_v50 = vmax.f32 %v782_v31, 0.0  ;;  %v4412_v7 = vrot.slane %v787_v62, 7  ;;  %v3663_v32 = vld [vmem:[#allocation16 + $0x108] sm:$0xff]  }
 0x22c   : > { %v997_v41 = vshrl.u32 %v4368_v33, 16  ;;  %v1000_v42 = vshll.u32 %v4368_v33, 16  ;;  %v985_v46 = vrot.slane %v983_v36, 4  ;;  %v988_v48 = vrot.slane %v986_v37, 5 }
 0x22d   : > { %3180 = vmatpush3.bf16.msra.mxu0 %v3651_v53  ;;  %v3141_v53 = vld [vmem:[%s4340_s1 + $0x10] sm:$0xff]   ;;  %v994_v56 = vrot.slane %v992_v38, 5  ;;  %v1006_v1 = vshll.u32 %v4386_v45, 16  ;;  %v898_v16 = vsel %vm894_vm0, 0.0, %v4412_v7  ;;  %v908_v17 = vsel %vm894_vm0, %v4412_v7, 0.0 }
 0x22e   : > { %3220 = vmatpush3.bf16.msra.mxu1 %v3652_v54  ;;  %3181 = vmatprep.subr.bf16.mxu0 %v3653_v55  ;;  %v999_v51 = vrot.slane %v997_v41, 4  ;;  %v1002_v52 = vrot.slane %v1000_v42, 5  ;;  %v4399_v54 = vsel %vm4379_vm7, %v976_v30, %v980_v23  ;;  %v989_v55 = vor.u32 %v988_v48, %v985_v46  ;;  %v3668_v46 = vld [vmem:[#allocation16 + $0x190] sm:$0xff]  }
 0x22f   : > { %3221 = vmatprep.subr.bf16.mxu1 %v3654_v57  ;;  %v4403_v57 = vsel %vm4392_vm8, %v2801_v35, %v1085_v43  ;;  %v3059_v2 = vunpack.c.l.bf16 %v3141_v53  ;;  %v3060_v18 = vunpack.c.h.bf16 %v3141_v53  ;;  %v1008_v20 = vrot.slane %v1006_v1, 5  ;;  %v3665_v43 = vld [vmem:[#allocation16 + $0x150] sm:$0xff]   ;;  %v3669_v1 = vld [vmem:[#allocation16 + $0x158] sm:$0xff]  }
 0x230   : > { %v990_v63 = vrot.slane %v989_v55, 4  ;;  %v1003_v0 = vor.u32 %v1002_v52, %v999_v51  ;;  %v2950_v21 = vpack.c.bf16 %v898_v16, %v898_v16  ;;  %v2951_v23 = vpack.c.bf16 %v908_v17, %v908_v17 }
 0x231   : > { %3182 = vmatpush3.bf16.msra.mxu0 %v3655_v58  ;;  %v2802_v58 = vrot.slane %v2946_v28, 9  ;;  %v764_v12 = vmul.f32 %v3059_v2, %v4338_v61  ;;  %v2803_v26 = vrot.slane %v4368_v33, 9  ;;  %v1093_v31 = vrot.slane %v4386_v45, 5 }
 0x232   : > { %3222 = vmatpush3.bf16.msra.mxu1 %v3656_v59  ;;  %3247 = vmatprep.subr.bf16.mxu0 %v3657_v3  ;;  %v1089_v59 = vrot.slane %v2947_v29, 5  ;;  %v4406_v3 = vrot.slane %v792_v50, 7  ;;  %v4416_v8 = vsel %vm4379_vm7, %v990_v63, %v994_v56  ;;  %v1004_v19 = vrot.slane %v1003_v0, 4  ;;  %v3670_v56 = vld [vmem:[#allocation16 + $0x1d8] sm:$0xff]  }
 0x233   : > { %3287 = vmatprep.subr.bf16.mxu1 %v3658_v11  ;;  %v3662_v11 = vld [vmem:[#allocation16 + $0x1c8] sm:$0xff]   ;;  %v2819_v13 = vcombine.low %v4399_v54, %v4416_v8  ;;  %v778_v25 = vadd.f32 %v4346_v4, %v764_v12  ;;  %v1011_v28 = vshrl.u32 %v2950_v21, 16  ;;  %v1014_v29 = vshll.u32 %v2950_v21, 16  ;;  %v3672_v12 = vld [vmem:[#allocation16 + $0x198] sm:$0xff]  }
 0x234   : > { %v4410_v5 = vsel %vm4392_vm8, %v2802_v58, %v1089_v59  ;;  %v1020_v30 = vshll.u32 %v2951_v23, 16  ;;  %v2804_v36 = vrot.slane %v2950_v21, 9  ;;  %v1097_v37 = vrot.slane %v2951_v23, 5  ;;  %v3667_v59 = vld [vmem:[#allocation16 + $0x110] sm:$0xff]  }
 0x235   : > { %v2823_v10 = vcombine.low %v4403_v57, %v4410_v5  ;;  %1843 = vmatprep.mubr.bf16.mxu0 %v2819_v13  ;;  %v788_v35 = vmax.f32 %v778_v25, 0.0  ;;  %v765_v38 = vmul.f32 %v3060_v18, %v4338_v61  ;;  %v4440_v33 = vsel %vm894_vm0, 0.0, %v4406_v3 }
 0x236   : > { %2977 = vmatmul.mubr.msk.bf16.vlgmr.msra.gmra.mrb[0].mxu0 %vm4370_vm6, %v2976_v9  ;;  %v1013_v39 = vrot.slane %v1011_v28, 4  ;;  %v1016_v41 = vrot.slane %v1014_v29, 5  ;;  %v4444_v42 = vsel %vm4392_vm8, %v2803_v26, %v1093_v31  ;;  %v4450_v45 = vsel %vm4392_vm8, %v2804_v36, %v1097_v37  ;;  %v3676_v31 = vld [vmem:[#allocation16 + $0x1a0] sm:$0xff]  }
 0x237   : > { %1909 = vmatmul.mubr.bf16.vlgmr.msra.gmra.mrb[0].mxu1 %v2823_v10  ;;  %3248 = vmatpush3.bf16.msra.mxu0 %v3659_v6  ;;  %v4446_v44 = vrot.slane %v788_v35, 7  ;;  %v779_v48 = vadd.f32 %v4346_v4, %v765_v38  ;;  %v3063_v50 = vunpack.c.l.bf16 %v4432_v27  ;;  %v4456_v51 = vsel %vm4379_vm7, %v1004_v19, %v1008_v20  ;;  %v3673_v19 = vld [vmem:[#allocation16 + $0x160] sm:$0xff]  }
 0x238   : > { %3288 = vmatpush3.bf16.msra.mxu1 %v3660_v60  ;;  %3249 = vmatprep.subr.bf16.mxu0 %v3661_v14  ;;  %v1017_v52 = vor.u32 %v1016_v41, %v1013_v39  ;;  %v1022_v53 = vrot.slane %v1020_v30, 5  ;;  %v4460_v55 = vcombine.low %v4444_v42, %v4450_v45  ;;  %v4473_v10 = vpack.c.bf16 %v4412_v7, %v4355_v22  ;;  %v3674_v22 = vld [vmem:[#allocation16 + $0x1e0] sm:$0xff]   ;;  %v3677_v39 = vld [vmem:[#allocation16 + $0x168] sm:$0xff]  }
 0x239   : > { %3289 = vmatprep.subr.bf16.mxu1 %v3662_v11  ;;  %v3001_v58 = vpack.c.bf16 %v4446_v44, %v4412_v7  ;;  %v789_v60 = vmax.f32 %v779_v48, 0.0  ;;  %v899_v62 = vsel %vm894_vm0, 0.0, %v4446_v44  ;;  %v909_v63 = vsel %vm894_vm0, %v4446_v44, 0.0  ;;  %v3671_v11 = vld [vmem:[#allocation16 + $0x118] sm:$0xff]   ;;  %v3675_v30 = vld [vmem:[#allocation16 + $0x120] sm:$0xff]   ;;  %v3678_v41 = vld [vmem:[#allocation16 + $0x1e8] sm:$0xff]  }
 0x23a   : > { %v1018_v0 = vrot.slane %v1017_v52, 4  ;;  %v2952_v2 = vpack.c.bf16 %v899_v62, %v899_v62  ;;  %v2953_v6 = vpack.c.bf16 %v909_v63, %v909_v63  ;;  %v766_v9 = vmul.f32 %v3063_v50, %v4338_v61  ;;  %v3680_v52 = vld [vmem:[#allocation16 + $0x1a8] sm:$0xff]  }
 0x23b   : > { %3250 = vmatpush3.bf16.msra.mxu0 %v3663_v32  ;;  %3002 = vmatprep.mubr.msk.bf16.mxu1 %vm4370_vm6, %v3001_v58  ;;  %v4475_v13 = vrot.slane %v789_v60, 7  ;;  %v3064_v14 = vunpack.c.h.bf16 %v4432_v27 }
 0x23c   : > { %3290 = vmatpush3.bf16.msra.mxu1 %v3664_v15  ;;  %3251 = vmatprep.subr.bf16.mxu0 %v3665_v43  ;;  %v4480_v15 = vsel %vm4379_vm7, %v1018_v0, %v1022_v53  ;;  %v1025_v16 = vshrl.u32 %v2952_v2, 16  ;;  %v1028_v17 = vshll.u32 %v2952_v2, 16  ;;  %v1034_v18 = vshll.u32 %v2953_v6, 16  ;;  %v3682_v0 = vld [vmem:[#allocation16 + $0x1f0] sm:$0xff]  }
 0x23d   : > { %3291 = vmatprep.subr.bf16.mxu1 %v3666_v24  ;;  %v4485_v7 = vcombine.low %v4456_v51, %v4480_v15  ;;  %v900_v20 = vsel %vm894_vm0, 0.0, %v4475_v13  ;;  %v910_v21 = vsel %vm894_vm0, %v4475_v13, 0.0  ;;  %v780_v23 = vadd.f32 %v4346_v4, %v766_v9 }
 0x23e   : > { %v2954_v24 = vpack.c.bf16 %v900_v20, %v900_v20  ;;  %v2955_v25 = vpack.c.bf16 %v910_v21, %v910_v21  ;;  %v1027_v26 = vrot.slane %v1025_v16, 4  ;;  %v1030_v27 = vrot.slane %v1028_v17, 5  ;;  %v3681_v16 = vld [vmem:[#allocation16 + $0x170] sm:$0xff]  }
 0x23f   : > { %1917 = vmatmul.mubr.bf16.gmra.mrb[4].mxu1 %v4460_v55  ;;  %3252 = vmatpush3.bf16.msra.mxu0 %v3667_v59  ;;  %v790_v28 = vmax.f32 %v780_v23, 0.0  ;;  %v2805_v29 = vrot.slane %v2952_v2, 9  ;;  %v767_v32 = vmul.f32 %v3064_v14, %v4338_v61  ;;  %v1036_v61 = vrot.slane %v1034_v18, 5 }
 0x240   : > { %3292 = vmatpush3.bf16.msra.mxu1 %v3668_v46  ;;  %3253 = vmatprep.subr.bf16.mxu0 %v3669_v1  ;;  %v1031_v35 = vor.u32 %v1030_v27, %v1027_v26  ;;  %v1039_v36 = vshrl.u32 %v2954_v24, 16  ;;  %v1042_v37 = vshll.u32 %v2954_v24, 16  ;;  %v1048_v38 = vshll.u32 %v2955_v25, 16 }
 0x241   : > { %3293 = vmatprep.subr.bf16.mxu1 %v3670_v56  ;;  %1851 = vmatprep.mubr.bf16.mxu0 %v4485_v7  ;;  %v4497_v43 = vrot.slane %v790_v28, 7  ;;  %v1101_v46 = vrot.slane %v2953_v6, 5  ;;  %v2806_v48 = vrot.slane %v2954_v24, 9  ;;  %v1105_v50 = vrot.slane %v2955_v25, 5  ;;  %v3686_v24 = vld [vmem:[#allocation16 + $0x1f8] sm:$0xff]  }
 0x242   : > { %2982 = vmatmul.mubr.msk.bf16.gmra.mrb[4].mxu0 %vm4370_vm6, %v4473_v10  ;;  %v1032_v53 = vrot.slane %v1031_v35, 4  ;;  %v1041_v56 = vrot.slane %v1039_v36, 4  ;;  %v1044_v58 = vrot.slane %v1042_v37, 5  ;;  %v781_v63 = vadd.f32 %v4346_v4, %v767_v32  ;;  %v3683_v35 = vld [vmem:[#allocation16 + $0x130] sm:$0xff]  }
 0x243   : > { %3254 = vmatpush3.bf16.msra.mxu0 %v3671_v11  ;;  %v3006_v59 = vpack.c.bf16 %v4497_v43, %v4475_v13  ;;  %v4503_v60 = vsel %vm4392_vm8, %v2805_v29, %v1101_v46  ;;  %v4507_v62 = vsel %vm4392_vm8, %v2806_v48, %v1105_v50  ;;  %v1050_v2 = vrot.slane %v1048_v38, 5  ;;  %v3679_v11 = vld [vmem:[#allocation16 + $0x128] sm:$0xff]   ;;  %v3687_v46 = vld [vmem:[#allocation16 + $0x138] sm:$0xff]  }
 0x244   : > { %3294 = vmatpush3.bf16.msra.mxu1 %v3672_v12  ;;  %3255 = vmatprep.subr.bf16.mxu0 %v3673_v19  ;;  %v1045_v1 = vor.u32 %v1044_v58, %v1041_v56  ;;  %v4512_v6 = vcombine.low %v4503_v60, %v4507_v62  ;;  %v901_v9 = vsel %vm894_vm0, 0.0, %v4497_v43  ;;  %v791_v12 = vmax.f32 %v781_v63, 0.0 }
 0x245   : > { %3295 = vmatprep.subr.bf16.mxu1 %v3674_v22  ;;  %3007 = vmatprep.mubr.msk.bf16.mxu1 %vm4370_vm6, %v3006_v59  ;;  %v911_v4 = vsel %vm894_vm0, %v4497_v43, 0.0  ;;  %v2956_v14 = vpack.c.bf16 %v901_v9, %v901_v9  ;;  %v4522_v17 = vsel %vm4379_vm7, %v1032_v53, %v1036_v61  ;;  %v3684_v22 = vld [vmem:[#allocation16 + $0x1b0] sm:$0xff]   ;;  %v4531_v26 = vpack.c.bf16 %v4475_v13, %v4446_v44  ;;  %v3685_v44 = vld [vmem:[#allocation16 + $0x178] sm:$0xff]   ;;  %v3689_v61 = vld [vmem:[#allocation16 + $0x200] sm:$0xff]  }
 0x246   : > { %v1046_v18 = vrot.slane %v1045_v1, 4  ;;  %v2957_v19 = vpack.c.bf16 %v911_v4, %v911_v4  ;;  %v881_v20 = vrot.slane %v791_v12, 7  ;;  %v3688_v13 = vld [vmem:[#allocation16 + $0x1b8] sm:$0xff]  }
 0x247   : > { %3256 = vmatpush3.bf16.msra.mxu0 %v3675_v30  ;;  %1925 = vmatmul.mubr.bf16.gmra.mrb[8].mxu1 %v4512_v6  ;;  %v1053_v21 = vshrl.u32 %v2956_v14, 16  ;;  %v1056_v23 = vshll.u32 %v2956_v14, 16  ;;  %v2807_v27 = vrot.slane %v2956_v14, 9 }
 0x248   : > { %3296 = vmatpush3.bf16.msra.mxu1 %v3676_v31  ;;  %3257 = vmatprep.subr.bf16.mxu0 %v3677_v39  ;;  %v4527_v25 = vsel %vm4379_vm7, %v1046_v18, %v1050_v2  ;;  %v1109_v28 = vrot.slane %v2957_v19, 5  ;;  %v902_v30 = vsel %vm894_vm0, 0.0, %v881_v20  ;;  %v912_v31 = vsel %vm894_vm0, %v881_v20, 0.0 }
 0x249   : > { %3297 = vmatprep.subr.bf16.mxu1 %v3678_v41  ;;  %v2821_v29 = vcombine.low %v4522_v17, %v4527_v25  ;;  %v1055_v32 = vrot.slane %v1053_v21, 4  ;;  %v2958_v36 = vpack.c.bf16 %v902_v30, %v902_v30  ;;  %v2959_v37 = vpack.c.bf16 %v912_v31, %v912_v31  ;;  %v3690_v31 = vld [vmem:[#allocation16 + $0x208] sm:$0xff]  }
 0x24a   : > { %v1058_v38 = vrot.slane %v1056_v23, 5  ;;  %v1062_v39 = vshll.u32 %v2957_v19, 16  ;;  %v3011_v41 = vpack.c.bf16 %v4406_v3, %v881_v20  ;;  %v4545_v56 = vsel %vm4392_vm8, %v2807_v27, %v1109_v28 }
 0x24b   : > { %3258 = vmatpush3.bf16.msra.mxu0 %v3679_v11  ;;  %1859 = vmatprep.mubr.bf16.mxu0 %v2821_v29  ;;  %v1067_v50 = vshrl.u32 %v2958_v36, 16  ;;  %v1076_v53 = vshll.u32 %v2959_v37, 16  ;;  %v2808_v58 = vrot.slane %v2958_v36, 9  ;;  %v1113_v59 = vrot.slane %v2959_v37, 5  ;;  %v3692_v37 = vld [vmem:[#allocation16 + $0x218] sm:$0xff]  }
 0x24c   : > { %3298 = vmatpush3.bf16.msra.mxu1 %v3680_v52  ;;  %3259 = vmatprep.subr.bf16.mxu0 %v3681_v16  ;;  %v1059_v48 = vor.u32 %v1058_v38, %v1055_v32  ;;  %v1070_v52 = vshll.u32 %v2958_v36, 16  ;;  %v4553_v11 = vpack.c.bf16 %v4440_v33, %v4440_v33  ;;  %v2991_v21 = vpack.c.bf16 %v881_v20, %v4497_v43 }
 0x24d   : > { %3299 = vmatprep.subr.bf16.mxu1 %v3682_v0  ;;  %2987 = vmatmul.mubr.msk.bf16.gmra.mrb[8].mxu0 %vm4370_vm6, %v4531_v26  ;;  %v1064_v0 = vrot.slane %v1062_v39, 5  ;;  %v1069_v1 = vrot.slane %v1067_v50, 4  ;;  %v4549_v9 = vsel %vm4392_vm8, %v2808_v58, %v1113_v59  ;;  %v1078_v4 = vrot.slane %v1076_v53, 5  ;;  %v3696_v39 = vld [vmem:[#allocation16 + $0x238] sm:$0xff]  }
 0x24e   : > { %3012 = vmatprep.mubr.msk.bf16.mxu1 %vm4370_vm6, %v3011_v41  ;;  %v1060_v63 = vrot.slane %v1059_v48, 4  ;;  %v1072_v2 = vrot.slane %v1070_v52, 5  ;;  %v4557_v14 = vcombine.low %v4545_v56, %v4549_v9  ;;  %v1121_v33 = vshrl.u32 %v4553_v11, 16 }
 0x24f   : > { %3260 = vmatpush3.bf16.msra.mxu0 %v3683_v35  ;;  %v1124_v19 = vshll.u32 %v4553_v11, 16  ;;  %v913_v23 = vsel %vm894_vm0, %v4406_v3, 0.0  ;;  %v2835_v27 = vcombine.low %v4410_v5, %v4444_v42  ;;  %v2831_v5 = vcombine.low %v4416_v8, %v4456_v51  ;;  %v3691_v42 = vld [vmem:[#allocation16 + $0x210] sm:$0xff]   ;;  %v3693_v51 = vld [vmem:[#allocation16 + $0x220] sm:$0xff]  }
 0x250   : > { %3300 = vmatpush3.bf16.msra.mxu1 %v3684_v22  ;;  %3261 = vmatprep.subr.bf16.mxu0 %v3685_v44  ;;  %v1073_v12 = vor.u32 %v1072_v2, %v1069_v1  ;;  %v4561_v16 = vsel %vm4379_vm7, %v1060_v63, %v1064_v0  ;;  %v1123_v28 = vrot.slane %v1121_v33, 4  ;;  %v2836_v32 = vcombine.low %v4450_v45, %v4503_v60 }
 0x251   : > { %3301 = vmatprep.subr.bf16.mxu1 %v3686_v24  ;;  %1933 = vmatmul.mubr.bf16.gmra.mrb[12].mxu1 %v4557_v14  ;;  %v1126_v30 = vrot.slane %v1124_v19, 5  ;;  %v2832_v45 = vcombine.low %v4480_v15, %v4522_v17  ;;  %v2811_v60 = vrot.slane %v4553_v11, 9  ;;  %v3031_v38 = vpack.c.bf16 %v4329_v47, %v4406_v3 }
 0x252   : > { %v1074_v18 = vrot.slane %v1073_v12, 4  ;;  %2038 = vmatprep.mubr.bf16.mxu1 %v4485_v7  ;;  %v2961_v7 = vpack.c.bf16 %v913_v23, %v913_v23 }
 0x253   : > { %3262 = vmatpush3.bf16.msra.mxu0 %v3687_v46  ;;  %v1127_v43 = vor.u32 %v1126_v30, %v1123_v28 }
 0x254   : > { %3302 = vmatpush3.bf16.msra.mxu1 %v3688_v13  ;;  %3375 = vmatprep.subr.bf16.mxu0 %v3689_v61  ;;  %v4569_v22 = vsel %vm4379_vm7, %v1074_v18, %v1078_v4  ;;  %v1130_v20 = vshll.u32 %v2961_v7, 16 }
 0x255   : > { %3439 = vmatprep.subr.bf16.mxu1 %v3689_v61  ;;  %v2822_v24 = vcombine.low %v4561_v16, %v4569_v22  ;;  %v1128_v35 = vrot.slane %v1127_v43, 4 }
 0x256   : > { %v1132_v36 = vrot.slane %v1130_v20, 5 }
 0x257   : > { %1867 = vmatprep.mubr.bf16.mxu0 %v2822_v24 }
 0x258   : > { %2992 = vmatmul.mubr.msk.bf16.gmra.mrb[12].mxu0 %vm4370_vm6, %v2991_v21  ;;  %v1133_v8 = vsel %vm4379_vm7, %v1128_v35, %v1132_v36 }
 0x259   : > { %1973 = vmatprep.mubr.bf16.mxu0 %v2835_v27  ;;  %3017 = vmatmul.mubr.msk.bf16.vlgmr.msra.gmra.mrb[16].mxu1 %vm4370_vm6, %v4473_v10  ;;  %v2837_v10 = vcombine.low %v4507_v62, %v4545_v56  ;;  %v2833_v62 = vcombine.low %v4527_v25, %v4561_v16  ;;  %v2834_v49 = vcombine.low %v4569_v22, %v1133_v8 }
 0x25a   : > { %3447 = vmatpush3.bf16.msra.mxu1 %v3689_v61  ;;  %2046 = vmatprep.mubr.bf16.mxu1 %v2821_v29  ;;  %v1136_v29 = vrot.slane %v2961_v7, 5 }
 0x25b   : > { %3440 = vmatprep.subr.bf16.mxu1 %v3690_v31 }
 0x25c   : > { %v1137_v15 = vsel %vm4392_vm8, %v2811_v60, %v1136_v29 }
 0x25d   : > { %v2838_v17 = vcombine.low %v4549_v9, %v1137_v15  ;;  %v2841_v25 = vcombine.low %v1137_v15, %v4403_v57 }
 0x25e   : > { %3448 = vmatpush3.bf16.msra.mxu1 %v3690_v31 }
 0x25f   : > { %3441 = vmatprep.subr.bf16.mxu1 %v3691_v42 }
 0x260   : > { %1974 = vmatmul.mubr.bf16.vlgmr.msra.gmra.mrb[16].mxu0 %v2831_v5 }
 0x261   : > { %3376 = vmatpush3.bf16.msra.mxu0 %v3689_v61  ;;  %1981 = vmatprep.mubr.bf16.mxu0 %v2836_v32 }
 0x262   : > { %3377 = vmatprep.subr.bf16.mxu0 %v3690_v31  ;;  %3022 = vmatmul.mubr.msk.bf16.gmra.mrb[20].mxu1 %vm4370_vm6, %v4531_v26  ;;  %v2840_v26 = vcombine.low %v1133_v8, %v4399_v54  ;;  %v3695_v54 = vld [vmem:[#allocation16 + $0x230] sm:$0xff]  }
 0x263   : > { %3449 = vmatpush3.bf16.msra.mxu1 %v3691_v42  ;;  %2054 = vmatprep.mubr.bf16.mxu1 %v2822_v24 }
 0x264   : > { %3442 = vmatprep.subr.bf16.mxu1 %v3692_v37 }
 0x265   : > { %3378 = vmatpush3.bf16.msra.mxu0 %v3690_v31 }
 0x266   : > { %3379 = vmatprep.subr.bf16.mxu0 %v3691_v42 }
 0x267   : > { %3450 = vmatpush3.bf16.msra.mxu1 %v3692_v37 }
 0x268   : > { %1982 = vmatmul.mubr.bf16.gmra.mrb[20].mxu0 %v2832_v45  ;;  %3443 = vmatprep.subr.bf16.mxu1 %v3693_v51 }
 0x269   : > { %3380 = vmatpush3.bf16.msra.mxu0 %v3691_v42  ;;  %1989 = vmatprep.mubr.bf16.mxu0 %v2837_v10 }
 0x26a   : > { %3381 = vmatprep.subr.bf16.mxu0 %v3692_v37  ;;  %3027 = vmatmul.mubr.msk.bf16.gmra.mrb[24].mxu1 %vm4370_vm6, %v2991_v21 }
 0x26b   : > { %3451 = vmatpush3.bf16.msra.mxu1 %v3693_v51  ;;  %2062 = vmatprep.mubr.bf16.mxu1 %v2840_v26 }
 0x26c   : > { %3444 = vmatprep.subr.bf16.mxu1 %v3694_v40 }
 0x26d   : > { %3382 = vmatpush3.bf16.msra.mxu0 %v3692_v37 }
 0x26e   : > { %3383 = vmatprep.subr.bf16.mxu0 %v3693_v51 }
 0x26f   : > { %3452 = vmatpush3.bf16.msra.mxu1 %v3694_v40 }
 0x270   : > { %1990 = vmatmul.mubr.bf16.gmra.mrb[24].mxu0 %v2833_v62  ;;  %3445 = vmatprep.subr.bf16.mxu1 %v3695_v54 }
 0x271   : > { %3384 = vmatpush3.bf16.msra.mxu0 %v3693_v51  ;;  %1997 = vmatprep.mubr.bf16.mxu0 %v2838_v17 }
 0x272   : > { %3385 = vmatprep.subr.bf16.mxu0 %v3694_v40  ;;  %3032 = vmatmul.mubr.msk.bf16.gmra.mrb[28].mxu1 %vm4370_vm6, %v3031_v38 }
 0x273   : > { %3453 = vmatpush3.bf16.msra.mxu1 %v3695_v54  ;;  %3395 = vmatprep.mubr.bf16.mxu1 %v4557_v14 }
 0x274   : > { %3446 = vmatprep.subr.bf16.mxu1 %v3696_v39 }
 0x275   : > { %3386 = vmatpush3.bf16.msra.mxu0 %v3694_v40 }
 0x276   : > { %3387 = vmatprep.subr.bf16.mxu0 %v3695_v54 }
 0x277   : > { %3454 = vmatpush3.bf16.msra.mxu1 %v3696_v39 }
 0x278   : > { %1998 = vmatmul.mubr.bf16.gmra.mrb[28].mxu0 %v2834_v49 }
 0x279   : > { %3388 = vmatpush3.bf16.msra.mxu0 %v3695_v54  ;;  %3391 = vmatprep.mubr.bf16.mxu0 %v4460_v55 }
 0x27a   : > { %3389 = vmatprep.subr.bf16.mxu0 %v3696_v39  ;;  %3396 = vmatmul.mubr.bf16.vlgmr.msra.gmra.mrb[32].mxu1 %v2841_v25 }
 0x27d   : > { %3390 = vmatpush3.bf16.msra.mxu0 %v3696_v39 }
 0x280   : > { %3392 = vmatmul.mubr.bf16.vlgmr.msra.gmra.mrb[32].mxu0 %v4512_v6 }
 0x309   : > { %v3183_v3 = vpop.f32.mrb[0].mxu0 }
 0x30a   : > { %v3223_v47 = vpop.f32.mrb[0].mxu1  ;;  %v3184_v41 = vpop.f32.mrb[1].mxu0 }
 0x30b   : > { %v3224_v34 = vpop.f32.mrb[1].mxu1  ;;  %v3185_v48 = vadd.f32 %v3184_v41, %v3183_v3  ;;  %v3186_v57 = vpop.f32.mrb[2].mxu0 }
 0x30c   : > { %v3225_v44 = vadd.f32 %v3224_v34, %v3223_v47  ;;  %v3226_v13 = vpop.f32.mrb[2].mxu1  ;;  %v3187_v52 = vpop.f32.mrb[3].mxu0 }
 0x30d   : > { %v3227_v46 = vpop.f32.mrb[3].mxu1  ;;  %v3188_v61 = vadd.f32 %v3187_v52, %v3186_v57 }
 0x30e   : > { %v3228_v50 = vadd.f32 %v3227_v46, %v3226_v13  ;;  %v1911_v53 = vadd.f32 %v3225_v44, %v3185_v48 }
 0x310   : > { %v1914_v56 = vadd.f32 %v3228_v50, %v3188_v61 }
 0x312   : > { %v3229_v55 = vpop.f32.mrb[4].mxu1 }
 0x313   : > { %v3230_v58 = vpop.f32.mrb[5].mxu1 }
 0x314   : > { %v3231_v59 = vadd.f32 %v3230_v58, %v3229_v55  ;;  %v3232_v63 = vpop.f32.mrb[6].mxu1 }
 0x315   : > { %v3233_v0 = vpop.f32.mrb[7].mxu1  ;;  %v3189_v6 = vpop.f32.mrb[4].mxu0 }
 0x316   : > { %v3234_v1 = vadd.f32 %v3233_v0, %v3232_v63  ;;  %v3190_v2 = vpop.f32.mrb[5].mxu0 }
 0x317   : > { %v3191_v9 = vadd.f32 %v3190_v2, %v3189_v6  ;;  %v3192_v11 = vpop.f32.mrb[6].mxu0 }
 0x318   : > { %v3193_v12 = vpop.f32.mrb[7].mxu0 }
 0x319   : > { %v1919_v4 = vadd.f32 %v3231_v59, %v3191_v9  ;;  %v3194_v14 = vadd.f32 %v3193_v12, %v3192_v11 }
 0x31a   : > { %v3235_v18 = vpop.f32.mrb[8].mxu1 }
 0x31b   : > { %v4614_v16 = vadd.f32 %v3234_v1, %v3194_v14  ;;  %v3236_v33 = vpop.f32.mrb[9].mxu1 }
 0x31c   : > { %v3237_v19 = vadd.f32 %v3236_v33, %v3235_v18  ;;  %v3238_v22 = vpop.f32.mrb[10].mxu1 }
 0x31d   : > { %v3239_v21 = vpop.f32.mrb[11].mxu1 }
 0x31e   : > { %v3240_v23 = vadd.f32 %v3239_v21, %v3238_v22 }
 0x320   : > { %v3195_v24 = vpop.f32.mrb[8].mxu0 }
 0x321   : > { %v3196_v27 = vpop.f32.mrb[9].mxu0 }
 0x322   : > { %v3197_v7 = vadd.f32 %v3196_v27, %v3195_v24  ;;  %v3198_v28 = vpop.f32.mrb[10].mxu0 }
 0x323   : > { %v3199_v30 = vpop.f32.mrb[11].mxu0 }
 0x324   : > { %v1927_v31 = vadd.f32 %v3237_v19, %v3197_v7  ;;  %v3200_v43 = vadd.f32 %v3199_v30, %v3198_v28  ;;  %v3241_v5 = vpop.f32.mrb[12].mxu1 }
 0x325   : > { %v3242_v42 = vpop.f32.mrb[13].mxu1 }
 0x326   : > { %v4616_v20 = vadd.f32 %v3240_v23, %v3200_v43  ;;  %v3243_v32 = vadd.f32 %v3242_v42, %v3241_v5  ;;  %v3244_v35 = vpop.f32.mrb[14].mxu1 }
 0x327   : > { %v3245_v36 = vpop.f32.mrb[15].mxu1 }
 0x328   : > { %v3246_v37 = vadd.f32 %v3245_v36, %v3244_v35 }
 0x32b   : > { %v3201_v8 = vpop.f32.mrb[12].mxu0 }
 0x32c   : > { %v3202_v45 = vpop.f32.mrb[13].mxu0  ;;  %v3303_v60 = vpop.f32.mrb[16].mxu1 }
 0x32d   : > { %v3203_v51 = vadd.f32 %v3202_v45, %v3201_v8  ;;  %v3204_v10 = vpop.f32.mrb[14].mxu0  ;;  %v3304_v26 = vpop.f32.mrb[17].mxu1 }
 0x32e   : > { %v3205_v29 = vpop.f32.mrb[15].mxu0  ;;  %v3305_v62 = vadd.f32 %v3304_v26, %v3303_v60  ;;  %v3306_v54 = vpop.f32.mrb[18].mxu1 }
 0x32f   : > { %v1935_v40 = vadd.f32 %v3243_v32, %v3203_v51  ;;  %v3206_v15 = vadd.f32 %v3205_v29, %v3204_v10  ;;  %v3307_v17 = vpop.f32.mrb[19].mxu1 }
 0x330   : > { %v3308_v39 = vadd.f32 %v3307_v17, %v3306_v54 }
 0x331   : > { %v4618_v38 = vadd.f32 %v3246_v37, %v3206_v15 }
 0x333   : > { %v3263_v49 = vpop.f32.mrb[16].mxu0 }
 0x334   : > { %v3264_v25 = vpop.f32.mrb[17].mxu0 }
 0x335   : > { %v3265_v47 = vadd.f32 %v3264_v25, %v3263_v49  ;;  %v3266_v34 = vpop.f32.mrb[18].mxu0  ;;  %v3309_v3 = vpop.f32.mrb[20].mxu1 }
 0x336   : > { %v3267_v44 = vpop.f32.mrb[19].mxu0  ;;  %v3310_v13 = vpop.f32.mrb[21].mxu1 }
 0x337   : > { %v1976_v41 = vadd.f32 %v3265_v47, %v1911_v53  ;;  %v3268_v46 = vadd.f32 %v3267_v44, %v3266_v34  ;;  %v3311_v48 = vadd.f32 %v3310_v13, %v3309_v3  ;;  %v3312_v57 = vpop.f32.mrb[22].mxu1 }
 0x338   : > { %v3313_v50 = vpop.f32.mrb[23].mxu1 }
 0x339   : > { %v1979_v52 = vadd.f32 %v3268_v46, %v1914_v56  ;;  %v3314_v61 = vadd.f32 %v3313_v50, %v3312_v57  ;;  %v2041_v55 = vadd.f32 %v3305_v62, %v1976_v41 }
 0x33b   : > { %v3269_v58 = vpop.f32.mrb[20].mxu0  ;;  %v2044_v59 = vadd.f32 %v3308_v39, %v1979_v52 }
 0x33c   : > { %v3270_v63 = vpop.f32.mrb[21].mxu0 }
 0x33d   : > { %v3271_v0 = vadd.f32 %v3270_v63, %v3269_v58  ;;  %v3272_v6 = vpop.f32.mrb[22].mxu0  ;;  %v3315_v1 = vpop.f32.mrb[24].mxu1 }
 0x33e   : > { %v3273_v2 = vpop.f32.mrb[23].mxu0  ;;  %v3316_v9 = vpop.f32.mrb[25].mxu1 }
 0x33f   : > { %v1984_v11 = vadd.f32 %v3271_v0, %v1919_v4  ;;  %v3274_v12 = vadd.f32 %v3273_v2, %v3272_v6  ;;  %v3317_v14 = vadd.f32 %v3316_v9, %v3315_v1  ;;  %v3318_v18 = vpop.f32.mrb[26].mxu1 }
 0x340   : > { %v3319_v53 = vpop.f32.mrb[27].mxu1 }
 0x341   : > { %v1987_v33 = vadd.f32 %v3274_v12, %v4614_v16  ;;  %v3320_v19 = vadd.f32 %v3319_v53, %v3318_v18  ;;  %v2049_v22 = vadd.f32 %v3311_v48, %v1984_v11 }
 0x343   : > { %v3275_v56 = vpop.f32.mrb[24].mxu0  ;;  %v2052_v21 = vadd.f32 %v3314_v61, %v1987_v33 }
 0x344   : > { %v3276_v23 = vpop.f32.mrb[25].mxu0 }
 0x345   : > { %v3277_v24 = vadd.f32 %v3276_v23, %v3275_v56  ;;  %v3278_v27 = vpop.f32.mrb[26].mxu0  ;;  %v3321_v7 = vpop.f32.mrb[28].mxu1 }
 0x346   : > { %v3279_v28 = vpop.f32.mrb[27].mxu0  ;;  %v3322_v30 = vpop.f32.mrb[29].mxu1 }
 0x347   : > { %v1992_v43 = vadd.f32 %v3277_v24, %v1927_v31  ;;  %v3280_v5 = vadd.f32 %v3279_v28, %v3278_v27  ;;  %v3323_v42 = vadd.f32 %v3322_v30, %v3321_v7  ;;  %v3324_v4 = vpop.f32.mrb[30].mxu1 }
 0x348   : > { %v3325_v32 = vpop.f32.mrb[31].mxu1 }
 0x349   : > { %v1995_v35 = vadd.f32 %v3280_v5, %v4616_v20  ;;  %v3326_v36 = vadd.f32 %v3325_v32, %v3324_v4  ;;  %v2057_v16 = vadd.f32 %v3317_v14, %v1992_v43 }
 0x34b   : > { %v3281_v37 = vpop.f32.mrb[28].mxu0  ;;  %v2060_v8 = vadd.f32 %v3320_v19, %v1995_v35 }
 0x34c   : > { %v3282_v45 = vpop.f32.mrb[29].mxu0 }
 0x34d   : > { %v3283_v51 = vadd.f32 %v3282_v45, %v3281_v37  ;;  %v3284_v10 = vpop.f32.mrb[30].mxu0  ;;  %v3397_v60 = vpop.f32.mrb[32].mxu1 }
 0x34e   : > { %v3285_v29 = vpop.f32.mrb[31].mxu0  ;;  %v2121_v26 = vpop.f32.mrb[33].mxu1 }
 0x34f   : > { %v2000_v15 = vadd.f32 %v3283_v51, %v1935_v40  ;;  %v3286_v62 = vadd.f32 %v3285_v29, %v3284_v10  ;;  %v2122_v31 = vadd.f32 %v2121_v26, %v2057_v16  ;;  %v3398_v54 = vpop.f32.mrb[34].mxu1 }
 0x350   : > { %v2124_v17 = vpop.f32.mrb[35].mxu1 }
 0x351   : > { %v2003_v39 = vadd.f32 %v3286_v62, %v4618_v38  ;;  %v2065_v49 = vadd.f32 %v3323_v42, %v2000_v15  ;;  %v2125_v20 = vadd.f32 %v2124_v17, %v2060_v8  ;;  %v2157_v12 = vmul.f32 %v2122_v31, %v2122_v31  ;;  %v2152_v8 = vld [vmem:[#allocation6 + $0x1] sm:$0x1] }
 0x353   : > { %v3393_v25 = vpop.f32.mrb[32].mxu0  ;;  %v2130_v47 = vadd.f32 %v3397_v60, %v2065_v49  ;;  %v2068_v34 = vadd.f32 %v3326_v36, %v2003_v39  ;;  %v3078_v3 = vpack.c.bf16 %v2125_v20, %v2122_v31  ;;  %v2158_v33 = vmul.f32 %v2125_v20, %v2125_v20  ;;  %v2136_v36 = vld [vmem:[#allocation6] sm:$0x1] }
 0x354   : > { %v2114_v44 = vadd.f32 %v3393_v25, %v2049_v22  ;;  %v2105_v13 = vpop.f32.mrb[33].mxu0 }
 0x355   : > { %v2106_v41 = vadd.f32 %v2105_v13, %v2041_v55  ;;  %v3394_v46 = vpop.f32.mrb[34].mxu0  ;;  %v2133_v48 = vadd.f32 %v3398_v54, %v2068_v34  ;;  %3144 = vst [vmem:[%s2187_s7 + $0x10] sm:$0xff] %v3078_v3   ;;  %v2159_v19 = vmul.f32 %v2130_v47, %v2130_v47 }
 0x356   : > { %v2117_v40 = vadd.f32 %v3394_v46, %v2052_v21  ;;  %v2108_v57 = vpop.f32.mrb[35].mxu0  ;;  %v2155_v6 = vmul.f32 %v2114_v44, %v2114_v44 }
 0x357   : > { %v3083_v50 = vpack.c.bf16 %v2133_v48, %v2130_v47  ;;  %v2109_v52 = vadd.f32 %v2108_v57, %v2044_v59  ;;  %v2153_v58 = vmul.f32 %v2106_v41, %v2106_v41  ;;  %v2160_v21 = vmul.f32 %v2133_v48, %v2133_v48 }
 0x358   : > { %v3073_v61 = vpack.c.bf16 %v2117_v40, %v2114_v44  ;;  %v2156_v55 = vmul.f32 %v2117_v40, %v2117_v40 }
 0x359   : > { %3145 = vst [vmem:[%s2187_s7 + $0x18] sm:$0xff] %v3083_v50   ;;  %v2137_v38 = vadd.f32 %v2109_v52, %v2106_v41  ;;  %v2154_v63 = vmul.f32 %v2109_v52, %v2109_v52  ;;  %v3068_v0 = vpack.c.bf16 %v2109_v52, %v2106_v41 }
 0x35a   : > { %3143 = vst [vmem:[%s2187_s7 + $0x8] sm:$0xff] %v3073_v61  }
 0x35b   : > { %v2138_v1 = vadd.f32 %v2137_v38, %v2114_v44  ;;  %v2161_v2 = vadd.f32 %v2154_v63, %v2153_v58  ;;  %3069 = vst [vmem:[%s2187_s7] sm:$0xff] %v3068_v0  }
 0x35d   : > { %v2162_v9 = vadd.f32 %v2161_v2, %v2155_v6  ;;  %v2139_v11 = vadd.f32 %v2138_v1, %v2117_v40 }
 0x35f   : > { %v2140_v14 = vadd.f32 %v2139_v11, %v2122_v31  ;;  %v2163_v18 = vadd.f32 %v2162_v9, %v2156_v55 }
 0x361   : > { %v2141_v53 = vadd.f32 %v2140_v14, %v2125_v20  ;;  %v2164_v59 = vadd.f32 %v2163_v18, %v2157_v12 }
 0x363   : > { %v2142_v22 = vadd.f32 %v2141_v53, %v2130_v47  ;;  %v2165_v56 = vadd.f32 %v2164_v59, %v2158_v33 }
 0x365   : > { %v2143_v23 = vadd.f32 %v2142_v22, %v2133_v48  ;;  %v2166_v24 = vadd.f32 %v2165_v56, %v2159_v19 }
 0x367   : > { %v2144_v27 = vrot.slane %v2143_v23, 4  ;;  %v2167_v7 = vadd.f32 %v2166_v24, %v2160_v21 }
 0x369   : > { %v2145_v28 = vadd.f32 %v2144_v27, %v2143_v23  ;;  %v2168_v30 = vrot.slane %v2167_v7, 4 }
 0x36b   : > { %v2146_v43 = vrot.slane %v2145_v28, 2  ;;  %v2169_v5 = vadd.f32 %v2168_v30, %v2167_v7 }
 0x36d   : > { %v2147_v42 = vadd.f32 %v2146_v43, %v2145_v28  ;;  %v2170_v4 = vrot.slane %v2169_v5, 2 }
 0x36f   : > { %v2148_v32 = vrot.slane %v2147_v42, 1  ;;  %v2171_v35 = vadd.f32 %v2170_v4, %v2169_v5 }
 0x371   : > { %v2149_v16 = vadd.f32 %v2148_v32, %v2147_v42  ;;  %v2172_v37 = vrot.slane %v2171_v35, 1 }
 0x373   : > { %v2150_v45 = vadd.f32 %v2149_v16, %v2136_v36  ;;  %v2173_v51 = vadd.f32 %v2172_v37, %v2171_v35 }
 0x375   : > { %2151 = vst [vmem:[#allocation6] sm:$0x1] %v2150_v45  ;;  %v2174_v10 = vadd.f32 %v2173_v51, %v2152_v8 }
 0x377   : > { %2175 = vst [vmem:[#allocation6 + $0x1] sm:$0x1] %v2174_v10 }
 0x378 PF: > { %s4800_s13 = sld [smem:[#allocation25_spill]] }
 0x37e   : > { %p2916_p0 = scmp.ne.s32.totalorder %s4800_s13, 2 }
 0x380   : > { %2199 = sbr.rel (%p2916_p0) target bundleno = 1211 (0x4bb), region = 100 }
 0x387   : > { %2201 = sbr.rel (!%p482_p7) target bundleno = 932 (0x3a4), region = 104  ;;  %v2203_v60 = vld [vmem:[#allocation6] sm:$0x1] (%p482_p7)  ;;  %v2205_v29 = vld [vmem:[#allocation6 + $0x1] sm:$0x1] (%p482_p7)  ;;  %v3967_v26 = vmov (%p482_p7), 0.0  }
 0x388   : > { %2202 = vst [vmem:[#allocation7] sm:$0x3] (%p482_p7), %v3967_v26  ;;  %v2204_v15 = vmul.f32 (%p482_p7), 0.0078125, %v2203_v60  ;;  %v2206_v62 = vmul.f32 (%p482_p7), 0.0078125, %v2205_v29  ;;  %s4801_s26 = sld [smem:[#allocation33_spill]] (%p482_p7)  ;;  %s4802_s25 = sld [smem:[#allocation34_spill]] (%p482_p7) }
 0x38a   : > { %v2207_v31 = vmul.f32 (%p482_p7), %v2204_v15, %v2204_v15 }
 0x38c   : > { %v2208_v54 = vsub.f32 (%p482_p7), %v2206_v62, %v2207_v31 }
 0x38e   : > { %v2209_v17 = vmax.f32 %v2208_v54, 0.0  ;;  %v2212_v49 = vld [vmem:[%s4801_s26] sm:$0x1] }
 0x38f   : > { %v2214_v47 = vld [vmem:[%s4802_s25] sm:$0x1] }
 0x390   : > { %v2210_v39 = vadd.f32 1e-05, %v2209_v17 }
 0x392   : > { %3697 = vrsqrt.f32 %v2210_v39 }
 0x39c   : > { %v3698_v20 = vpop.eup %3697 }
 0x39d   : > { %v2213_v25 = vmul.f32 %v3698_v20, %v2212_v49 }
 0x39f   : > { %2217 = vst [vmem:[#allocation9] sm:$0x1] %v2213_v25  ;;  %v2215_v34 = vmul.f32 %v2213_v25, %v2204_v15 }
 0x3a1   : > { %v2216_v3 = vsub.f32 %v2214_v47, %v2215_v34 }
 0x3a3   : > { %2218 = vst [vmem:[#allocation9 + $0x1] sm:$0x1] %v2216_v3 }
 0x3a4 PF: > { %v3699_v44 = vld [vmem:[#allocation17] sm:$0xff]   ;;  %v3700_v13 = vld [vmem:[#allocation17 + $0x8] sm:$0xff]   ;;  %s3034_s30 = sshll.u32 %s3937_s19, 5  ;;  %v3701_v41 = vld [vmem:[#allocation17 + $0x10] sm:$0xff]  }
 0x3a5   : > { %3399 = vmatprep.subr.bf16.mxu0 %v3699_v44  ;;  %3455 = vmatprep.subr.bf16.mxu1 %v3699_v44  ;;  %v3702_v46 = vld [vmem:[#allocation17 + $0x18] sm:$0xff]   ;;  %s2222_s9 = scalar_lea.vmem [#allocation3], %s3034_s30  ;;  %v3703_v2 = vld [vmem:[#allocation17 + $0x20] sm:$0xff]   ;;  %v3704_v21 = vld [vmem:[#allocation17 + $0x28] sm:$0xff]   ;;  %s2455_s8 = scalar_lea.vmem [#allocation4], %s3034_s30 }
 0x3a6   : > { %3400 = vmatpush3.bf16.msra.mxu0 %v3699_v44  ;;  %3463 = vmatpush3.bf16.msra.mxu1 %v3699_v44  ;;  %v3086_v48 = vld [vmem:[%s2222_s9] sm:$0xff]   ;;  %v2919_v40 = vld [vmem:[#allocation9] ss:$0 sm:$0xff]  ;;  %v3147_v52 = vld [vmem:[%s2222_s9 + $0x10] sm:$0xff]  }
 0x3a7   : > { %3401 = vmatprep.subr.bf16.mxu0 %v3700_v13  ;;  %3456 = vmatprep.subr.bf16.mxu1 %v3700_v13  ;;  %v3087_v57 = vunpack.c.l.bf16 %v3086_v48  ;;  %v3088_v50 = vunpack.c.h.bf16 %v3086_v48  ;;  %v3146_v58 = vld [vmem:[%s2222_s9 + $0x8] sm:$0xff]   ;;  %v3095_v38 = vunpack.c.l.bf16 %v3147_v52  ;;  %v3096_v63 = vunpack.c.h.bf16 %v3147_v52  ;;  %v3148_v1 = vld [vmem:[%s2222_s9 + $0x18] sm:$0xff]  }
 0x3a8   : > { %v3091_v12 = vunpack.c.l.bf16 %v3146_v58  ;;  %v3092_v18 = vunpack.c.h.bf16 %v3146_v58  ;;  %v3099_v33 = vunpack.c.l.bf16 %v3148_v1  ;;  %v3100_v59 = vunpack.c.h.bf16 %v3148_v1  ;;  %v3705_v42 = vld [vmem:[#allocation17 + $0x30] sm:$0xff]   ;;  %v3706_v16 = vld [vmem:[#allocation17 + $0x38] sm:$0xff]  }
 0x3a9   : > { %v2244_v0 = vmul.f32 %v3087_v57, %v2919_v40  ;;  %v2245_v6 = vmul.f32 %v3088_v50, %v2919_v40  ;;  %v2248_v55 = vmul.f32 %v3095_v38, %v2919_v40  ;;  %v2249_v14 = vmul.f32 %v3096_v63, %v2919_v40 }
 0x3aa   : > { %3402 = vmatpush3.bf16.msra.mxu0 %v3700_v13  ;;  %3464 = vmatpush3.bf16.msra.mxu1 %v3700_v13  ;;  %v2920_v61 = vld [vmem:[#allocation9 + $0x1] ss:$0 sm:$0xff]  ;;  %v2246_v7 = vmul.f32 %v3091_v12, %v2919_v40  ;;  %v2247_v28 = vmul.f32 %v3092_v18, %v2919_v40  ;;  %v2250_v30 = vmul.f32 %v3099_v33, %v2919_v40 }
 0x3ab   : > { %3403 = vmatprep.subr.bf16.mxu0 %v3701_v41  ;;  %3457 = vmatprep.subr.bf16.mxu1 %v3701_v41  ;;  %v2257_v9 = vadd.f32 %v2920_v61, %v2244_v0  ;;  %v2258_v11 = vadd.f32 %v2920_v61, %v2245_v6  ;;  %v2261_v53 = vadd.f32 %v2920_v61, %v2248_v55 }
 0x3ac   : > { %v2262_v56 = vadd.f32 %v2920_v61, %v2249_v14  ;;  %v2251_v43 = vmul.f32 %v3100_v59, %v2919_v40  ;;  %v2259_v4 = vadd.f32 %v2920_v61, %v2246_v7  ;;  %v2260_v32 = vadd.f32 %v2920_v61, %v2247_v28 }
 0x3ad   : > { %v2265_v19 = vmax.f32 %v2257_v9, 0.0  ;;  %v2266_v22 = vmax.f32 %v2258_v11, 0.0  ;;  %v2269_v23 = vmax.f32 %v2261_v53, 0.0  ;;  %v2263_v35 = vadd.f32 %v2920_v61, %v2250_v30 }
 0x3ae   : > { %3404 = vmatpush3.bf16.msra.mxu0 %v3701_v41  ;;  %3465 = vmatpush3.bf16.msra.mxu1 %v3701_v41  ;;  %v2270_v27 = vmax.f32 %v2262_v56, 0.0  ;;  %v2264_v36 = vadd.f32 %v2920_v61, %v2251_v43  ;;  %v2267_v37 = vmax.f32 %v2259_v4, 0.0  ;;  %v2268_v8 = vmax.f32 %v2260_v32, 0.0 }
 0x3af   : > { %3405 = vmatprep.subr.bf16.mxu0 %v3702_v46  ;;  %3458 = vmatprep.subr.bf16.mxu1 %v3702_v46  ;;  %v2273_v24 = vpack.c.bf16 %v2266_v22, %v2265_v19  ;;  %v2271_v45 = vmax.f32 %v2263_v35, 0.0 }
 0x3b0   : > { %v2275_v5 = vpack.c.bf16 %v2270_v27, %v2269_v23  ;;  %v2272_v51 = vmax.f32 %v2264_v36, 0.0  ;;  %v2274_v10 = vpack.c.bf16 %v2268_v8, %v2267_v37  ;;  %v2422_v27 = vld [vmem:[#allocation7 + $0x1] sm:$0x1] }
 0x3b1   : > { %3415 = vmatprep.mubr.bf16.mxu0 %v2273_v24 }
 0x3b2   : > { %3406 = vmatpush3.bf16.msra.mxu0 %v3702_v46  ;;  %3466 = vmatpush3.bf16.msra.mxu1 %v3702_v46  ;;  %v2276_v60 = vpack.c.bf16 %v2272_v51, %v2271_v45 }
 0x3b3   : > { %3407 = vmatprep.subr.bf16.mxu0 %v3703_v2  ;;  %3459 = vmatprep.subr.bf16.mxu1 %v3703_v2 }
 0x3b4   : > { %3419 = vmatprep.mubr.bf16.mxu1 %v2275_v5 }
 0x3b6   : > { %3408 = vmatpush3.bf16.msra.mxu0 %v3703_v2  ;;  %3467 = vmatpush3.bf16.msra.mxu1 %v3703_v2 }
 0x3b7   : > { %3409 = vmatprep.subr.bf16.mxu0 %v3704_v21  ;;  %3460 = vmatprep.subr.bf16.mxu1 %v3704_v21 }
 0x3ba   : > { %3410 = vmatpush3.bf16.msra.mxu0 %v3704_v21  ;;  %3468 = vmatpush3.bf16.msra.mxu1 %v3704_v21  ;;  %v2406_v21 = vld [vmem:[#allocation7] sm:$0x1] }
 0x3bb   : > { %3411 = vmatprep.subr.bf16.mxu0 %v3705_v42  ;;  %3461 = vmatprep.subr.bf16.mxu1 %v3705_v42 }
 0x3be   : > { %3412 = vmatpush3.bf16.msra.mxu0 %v3705_v42  ;;  %3469 = vmatpush3.bf16.msra.mxu1 %v3705_v42 }
 0x3bf   : > { %3413 = vmatprep.subr.bf16.mxu0 %v3706_v16  ;;  %3462 = vmatprep.subr.bf16.mxu1 %v3706_v16 }
 0x3c2   : > { %3414 = vmatpush3.bf16.msra.mxu0 %v3706_v16  ;;  %3470 = vmatpush3.bf16.msra.mxu1 %v3706_v16 }
 0x3c5   : > { %3416 = vmatmul.mubr.bf16.vlgmr.msra.gmra.mrb[0].mxu0 %v2274_v10  ;;  %3420 = vmatmul.mubr.bf16.vlgmr.msra.gmra.mrb[0].mxu1 %v2276_v60 }
 0x498   : > { %v3417_v29 = vpop.f32.mrb[0].mxu0  ;;  %v3421_v26 = vpop.f32.mrb[0].mxu1 }
 0x499   : > { %v2375_v15 = vpop.f32.mrb[1].mxu0  ;;  %v2391_v62 = vpop.f32.mrb[1].mxu1  ;;  %v2425_v13 = vmul.f32 %v3417_v29, %v3417_v29  ;;  %v2429_v0 = vmul.f32 %v3421_v26, %v3421_v26 }
 0x49a   : > { %v3418_v31 = vpop.f32.mrb[2].mxu0  ;;  %v3422_v54 = vpop.f32.mrb[2].mxu1  ;;  %v2423_v25 = vmul.f32 %v2375_v15, %v2375_v15  ;;  %v2427_v50 = vmul.f32 %v2391_v62, %v2391_v62 }
 0x49b   : > { %v3109_v17 = vpack.c.bf16 %v3418_v31, %v3417_v29  ;;  %v2378_v39 = vpop.f32.mrb[3].mxu0  ;;  %v3119_v49 = vpack.c.bf16 %v3422_v54, %v3421_v26  ;;  %v2394_v20 = vpop.f32.mrb[3].mxu1  ;;  %v2426_v48 = vmul.f32 %v3418_v31, %v3418_v31  ;;  %v2430_v2 = vmul.f32 %v3422_v54, %v3422_v54 }
 0x49c   : > { %v2407_v47 = vadd.f32 %v2378_v39, %v2375_v15  ;;  %v2424_v34 = vmul.f32 %v2378_v39, %v2378_v39  ;;  %v3104_v3 = vpack.c.bf16 %v2378_v39, %v2375_v15  ;;  %v3114_v44 = vpack.c.bf16 %v2394_v20, %v2391_v62 }
 0x49d   : > { %3149 = vst [vmem:[%s2455_s8 + $0x8] sm:$0xff] %v3109_v17   ;;  %3151 = vst [vmem:[%s2455_s8 + $0x18] sm:$0xff] %v3119_v49   ;;  %v2428_v63 = vmul.f32 %v2394_v20, %v2394_v20 }
 0x49e   : > { %v2408_v41 = vadd.f32 %v3417_v29, %v2407_v47  ;;  %v2431_v46 = vadd.f32 %v2424_v34, %v2423_v25  ;;  %3105 = vst [vmem:[%s2455_s8] sm:$0xff] %v3104_v3   ;;  %3150 = vst [vmem:[%s2455_s8 + $0x10] sm:$0xff] %v3114_v44  }
 0x4a0   : > { %v2432_v40 = vadd.f32 %v2431_v46, %v2425_v13  ;;  %v2409_v57 = vadd.f32 %v3418_v31, %v2408_v41 }
 0x4a2   : > { %v2410_v52 = vadd.f32 %v2409_v57, %v2391_v62  ;;  %v2433_v61 = vadd.f32 %v2432_v40, %v2426_v48 }
 0x4a4   : > { %v2434_v58 = vadd.f32 %v2433_v61, %v2427_v50  ;;  %v2411_v38 = vadd.f32 %v2410_v52, %v2394_v20 }
 0x4a6   : > { %v2412_v6 = vadd.f32 %v3421_v26, %v2411_v38  ;;  %v2435_v1 = vadd.f32 %v2434_v58, %v2428_v63 }
 0x4a8   : > { %v2413_v55 = vadd.f32 %v3422_v54, %v2412_v6  ;;  %v2436_v9 = vadd.f32 %v2435_v1, %v2429_v0 }
 0x4aa   : > { %v2414_v11 = vrot.slane %v2413_v55, 4  ;;  %v2437_v12 = vadd.f32 %v2436_v9, %v2430_v2 }
 0x4ac   : > { %v2415_v14 = vadd.f32 %v2414_v11, %v2413_v55  ;;  %v2438_v18 = vrot.slane %v2437_v12, 4 }
 0x4ae   : > { %v2416_v53 = vrot.slane %v2415_v14, 2  ;;  %v2439_v33 = vadd.f32 %v2438_v18, %v2437_v12 }
 0x4b0   : > { %v2417_v59 = vadd.f32 %v2416_v53, %v2415_v14  ;;  %v2440_v19 = vrot.slane %v2439_v33, 2 }
 0x4b2   : > { %v2418_v22 = vrot.slane %v2417_v59, 1  ;;  %v2441_v56 = vadd.f32 %v2440_v19, %v2439_v33 }
 0x4b4   : > { %v2419_v23 = vadd.f32 %v2418_v22, %v2417_v59  ;;  %v2442_v24 = vrot.slane %v2441_v56, 1 }
 0x4b6   : > { %v2420_v7 = vadd.f32 %v2419_v23, %v2406_v21  ;;  %v2443_v28 = vadd.f32 %v2442_v24, %v2441_v56 }
 0x4b8   : > { %2421 = vst [vmem:[#allocation7] sm:$0x1] %v2420_v7  ;;  %v2444_v30 = vadd.f32 %v2443_v28, %v2422_v27 }
 0x4ba   : > { %2445 = vst [vmem:[#allocation7 + $0x1] sm:$0x1] %v2444_v30 }
 0x4bb PF: > { %s4803_s27 = sld [smem:[#allocation25_spill]] }
 0x4c1   : > { %p2930_p4 = scmp.ne.s32.totalorder %s4803_s27, 3 }
 0x4c3   : > { %2467 = sbr.rel (%p2930_p4) target bundleno = 1272 (0x4f8), region = 108 }
 0x4ca   : > { %2469 = sbr.rel (!%p482_p7) target bundleno = 1255 (0x4e7), region = 112  ;;  %v2470_v43 = vld [vmem:[#allocation7] sm:$0x1] (%p482_p7)  ;;  %v2472_v5 = vld [vmem:[#allocation7 + $0x1] sm:$0x1] (%p482_p7)  ;;  %s4804_s1 = sld [smem:[#allocation36_spill]] (%p482_p7) }
 0x4cb   : > { %v2471_v42 = vmul.f32 (%p482_p7), 0.0078125, %v2470_v43  ;;  %v2473_v4 = vmul.f32 (%p482_p7), 0.0078125, %v2472_v5  ;;  %s4805_s13 = sld [smem:[#allocation37_spill]] (%p482_p7) }
 0x4cd   : > { %v2474_v32 = vmul.f32 (%p482_p7), %v2471_v42, %v2471_v42 }
 0x4cf   : > { %v2475_v35 = vsub.f32 (%p482_p7), %v2473_v4, %v2474_v32 }
 0x4d0   : > { %v2479_v37 = vld [vmem:[%s4804_s1] sm:$0x1] (%p482_p7) }
 0x4d1   : > { %v2476_v36 = vmax.f32 %v2475_v35, 0.0  ;;  %v2481_v51 = vld [vmem:[%s4805_s13] sm:$0x1] }
 0x4d3   : > { %v2477_v16 = vadd.f32 1e-05, %v2476_v36 }
 0x4d5   : > { %3707 = vrsqrt.f32 %v2477_v16 }
 0x4df   : > { %v3708_v8 = vpop.eup %3707 }
 0x4e0   : > { %v2480_v45 = vmul.f32 %v3708_v8, %v2479_v37 }
 0x4e2   : > { %2484 = vst [vmem:[#allocation10] sm:$0x1] %v2480_v45  ;;  %v2482_v10 = vmul.f32 %v2480_v45, %v2471_v42 }
 0x4e4   : > { %v2483_v60 = vsub.f32 %v2481_v51, %v2482_v10 }
 0x4e6   : > { %2485 = vst [vmem:[#allocation10 + $0x1] sm:$0x1] %v2483_v60 }
 0x4e7 PF: > { %s3036_s28 = sshll.u32 %s3937_s19, 5  ;;  %v2506_v44 = vld [vmem:[%s4288_s29] sm:$0xff]  ;;  %v2507_v41 = vld [vmem:[%s4288_s29 + $0x8] sm:$0xff]  ;;  %v2508_v57 = vld [vmem:[%s4288_s29 + $0x10] sm:$0xff] }
 0x4e8   : > { %s2489_s24 = scalar_lea.vmem [#allocation4], %s3036_s28  ;;  %v2509_v50 = vld [vmem:[%s4288_s29 + $0x18] sm:$0xff]  ;;  %v2510_v52 = vld [vmem:[%s4288_s29 + $0x20] sm:$0xff]  ;;  %v2511_v55 = vld [vmem:[%s4288_s29 + $0x28] sm:$0xff] }
 0x4e9   : > { %v2933_v29 = vld [vmem:[#allocation10] ss:$0 sm:$0xff]  ;;  %v3122_v26 = vld [vmem:[%s2489_s24] sm:$0xff]   ;;  %v3152_v15 = vld [vmem:[%s2489_s24 + $0x8] sm:$0xff]  }
 0x4ea   : > { %v3153_v62 = vld [vmem:[%s2489_s24 + $0x10] sm:$0xff]   ;;  %v3123_v31 = vunpack.c.l.bf16 %v3122_v26  ;;  %v3124_v54 = vunpack.c.h.bf16 %v3122_v26  ;;  %v3127_v17 = vunpack.c.l.bf16 %v3152_v15  ;;  %v3128_v39 = vunpack.c.h.bf16 %v3152_v15  ;;  %v3154_v49 = vld [vmem:[%s2489_s24 + $0x18] sm:$0xff]  }
 0x4eb   : > { %v3131_v25 = vunpack.c.l.bf16 %v3153_v62  ;;  %v3132_v47 = vunpack.c.h.bf16 %v3153_v62  ;;  %v3135_v34 = vunpack.c.l.bf16 %v3154_v49  ;;  %v3136_v3 = vunpack.c.h.bf16 %v3154_v49  ;;  %v2512_v9 = vld [vmem:[%s4288_s29 + $0x30] sm:$0xff]  ;;  %v2513_v11 = vld [vmem:[%s4288_s29 + $0x38] sm:$0xff] }
 0x4ec   : > { %v2519_v13 = vmul.f32 %v3123_v31, %v2933_v29  ;;  %v2520_v46 = vmul.f32 %v3124_v54, %v2933_v29  ;;  %v2521_v48 = vmul.f32 %v3127_v17, %v2933_v29  ;;  %v2522_v40 = vmul.f32 %v3128_v39, %v2933_v29 }
 0x4ed   : > { %v2934_v20 = vld [vmem:[#allocation10 + $0x1] ss:$0 sm:$0xff]  ;;  %v2523_v61 = vmul.f32 %v3131_v25, %v2933_v29  ;;  %v2524_v58 = vmul.f32 %v3132_v47, %v2933_v29  ;;  %v2525_v38 = vmul.f32 %v3135_v34, %v2933_v29  ;;  %v2526_v63 = vmul.f32 %v3136_v3, %v2933_v29 }
 0x4ee   : > { %v2532_v0 = vadd.f32 %v2934_v20, %v2519_v13  ;;  %v2533_v6 = vadd.f32 %v2934_v20, %v2520_v46  ;;  %v2534_v1 = vadd.f32 %v2934_v20, %v2521_v48  ;;  %v2535_v2 = vadd.f32 %v2934_v20, %v2522_v40 }
 0x4ef   : > { %v2536_v12 = vadd.f32 %v2934_v20, %v2523_v61  ;;  %v2537_v14 = vadd.f32 %v2934_v20, %v2524_v58  ;;  %v2538_v18 = vadd.f32 %v2934_v20, %v2525_v38  ;;  %v2539_v53 = vadd.f32 %v2934_v20, %v2526_v63 }
 0x4f0   : > { %v2540_v33 = vadd.f32 %v2532_v0, %v2506_v44  ;;  %v2541_v59 = vadd.f32 %v2533_v6, %v2507_v41  ;;  %v2542_v19 = vadd.f32 %v2534_v1, %v2508_v57  ;;  %v2543_v22 = vadd.f32 %v2535_v2, %v2509_v50 }
 0x4f1   : > { %v2544_v56 = vadd.f32 %v2536_v12, %v2510_v52  ;;  %v2545_v21 = vadd.f32 %v2537_v14, %v2511_v55  ;;  %v2546_v23 = vadd.f32 %v2538_v18, %v2512_v9  ;;  %v2547_v24 = vadd.f32 %v2539_v53, %v2513_v11 }
 0x4f2   : > { %v2548_v27 = vmax.f32 %v2540_v33, 0.0  ;;  %v2549_v7 = vmax.f32 %v2541_v59, 0.0  ;;  %v2550_v28 = vmax.f32 %v2542_v19, 0.0  ;;  %v2551_v30 = vmax.f32 %v2543_v22, 0.0 }
 0x4f3   : > { %v2552_v43 = vmax.f32 %v2544_v56, 0.0  ;;  %v2553_v5 = vmax.f32 %v2545_v21, 0.0  ;;  %v2554_v42 = vmax.f32 %v2546_v23, 0.0  ;;  %v2555_v4 = vmax.f32 %v2547_v24, 0.0 }
 0x4f4   : > { %2556 = vst [vmem:[%s4306_s11] sm:$0xff] %v2548_v27  ;;  %2557 = vst [vmem:[%s4306_s11 + $0x8] sm:$0xff] %v2549_v7 }
 0x4f5   : > { %2558 = vst [vmem:[%s4306_s11 + $0x10] sm:$0xff] %v2550_v28  ;;  %2559 = vst [vmem:[%s4306_s11 + $0x18] sm:$0xff] %v2551_v30 }
 0x4f6   : > { %2560 = vst [vmem:[%s4306_s11 + $0x20] sm:$0xff] %v2552_v43  ;;  %2561 = vst [vmem:[%s4306_s11 + $0x28] sm:$0xff] %v2553_v5 }
 0x4f7   : > { %2562 = vst [vmem:[%s4306_s11 + $0x30] sm:$0xff] %v2554_v42  ;;  %2563 = vst [vmem:[%s4306_s11 + $0x38] sm:$0xff] %v2555_v4 }
 0x4f8 PF: > { %s4806_s29 = sld [smem:[#allocation25_spill]]  ;;  %s4807_s26 = sld [smem:[#allocation26_spill]] }
 0x4f9   : > { %s2584_s10 = sshll.u32 %s4306_s11, 4  ;;  %s4808_s27 = sld [smem:[#allocation38_spill]]  ;;  %s4667_s10 = int_to_ptr.vmem [resolvable:$true] %s2584_s10 }
 0x4fa   : > { %s4676_s3 = scalar_lea.sflag [#allocation13], %s467_s4  ;;  %s3823_s1 = scalar_lea.vmem %s4667_s10, 1024 }
 0x4fb   : > { %p3824_p3 = scmp.ne.s32.totalorder %s4667_s10, %s3823_s1 }
 0x4fe   : > { %p2572_p1 = scmp.eq.s32.totalorder %s4806_s29, 3  ;;  %p4809_p11 = scmp.ne.s32.totalorder %s4807_s26, 0 }
 0x500   : > { %s2573_s20 = scalar_select %p2572_p1, 1, 0 }
 0x501   : > { %p3825_p9 = pnand %p3824_p3, %p4809_p11 }
 0x502   : > { %s2574_s25 = smul.u32 %s3937_s19, %s2573_s20  ;;  %s3968_s19 = smov [#allocation19]  }
 0x503   : > { %p3826_p6 = pneg %p3825_p9  ;;  %s3827_s11 = sshll.u32 %s3968_s19, 4  ;;  %s3828_s11 = int_to_ptr.vmem [resolvable:$false] %s3827_s11 }
 0x504   : > { %s3037_s30 = sshll.u32 %s2574_s25, 10  ;;  %s3829_s12 = scalar_lea.vmem %s3828_s11, 2048 }
 0x505   : > { %s4672_s2 = scalar_lea.hbm %s4808_s27, %s3037_s30  ;;  %p3830_p13 = scmp.lt.s32.totalorder %s4667_s10, %s3828_s11 }
 0x506   : > { %p3831_p2 = scmp.lt.s32.totalorder %s3829_s12, %s3823_s1 }
 0x508   : > { %p3832_p5 = por %p3831_p2, %p3830_p13 }
 0x50a   : > { %p3833_p8 = pnand %p3832_p5, %p3826_p6 }
 0x50c   : > { %3836 = shalt.err (!%p3833_p8)
}
 0x50d   : > { %s3837_s4 = scalar_lea.hbm %s4672_s2, 1024  ;;  %s3841_s28 = scalar_lea.hbm %s4808_s27, 2048 }
 0x50e   : > { %p3838_p7 = scmp.ne.s32.totalorder %s4672_s2, %s3837_s4  ;;  %p3842_p0 = scmp.lt.u32.totalorder %s4672_s2, %s4808_s27 }
 0x50f   : > { %p3843_p4 = scmp.lt.u32.totalorder %s3841_s28, %s3837_s4  ;;  %p3845_p3 = scmp.lt.u32.totalorder %s3837_s4, %s4672_s2 }
 0x510   : > { %p3839_p10 = pnand %p3838_p7, %p4809_p11 }
 0x511   : > { %p3844_p1 = por %p3843_p4, %p3842_p0 }
 0x512   : > { %p3840_p12 = pneg %p3839_p10 }
 0x513   : > { %p3846_p9 = por %p3845_p3, %p3844_p1 }
 0x515   : > { %p3847_p6 = pnand %p3846_p9, %p3840_p12 }
 0x517   : > { %3850 = shalt.err (!%p3847_p6)
}
 0x518   : > { %s3969_s20 = smov 128   ;;  %s3970_s25 = smov 8  }
 0x519   : > { %3485 = dma.vmem_to_hbm [thread:$0]  (%p4809_p11), %s4667_s10, 1024, %s4672_s2, %s4676_s3, %s3969_s20, %s3969_s20, %s3970_s25  }
 0x51a PF: > { %s4810_s30 = sld [smem:[#allocation24_spill]]  ;;  %s4811_s9 = sld [smem:[#allocation27_spill]] }
 0x51b   : > { %p3512_p13 = scmp.ge.s32.totalorder %s3953_s23, 2 }
 0x520   : > { %s2599_s8 = sand.u32 1, %s4810_s30   ;;  %p4812_p2 = scmp.ne.s32.totalorder %s4811_s9, 0 }
 0x521   : > { %s2600_s1 = scalar_lea.sflag [#allocation13], %s2599_s8 }
 0x522   : > { %p3502_p5 = pnand %p3512_p13, %p4812_p2 }
 0x524   : > { %3908 = dma.done.wait (!%p3502_p5), %s2600_s1, 1024  }
 0x525   : > { %3910 = vsyncadd (!%p3502_p5), %s2600_s1, 4294966272  ;;  %s28_s23 = sadd.s32 1, %s3953_s23   ;;  %s4813_s26 = smov %s4234_s16 }
 0x526   : > { %p25_p8 = scmp.ge.s32.totalorder %s28_s23, 10   ;;  %s4814_s10 = sld [smem:[#allocation28_spill]] }
 0x527   : > { %s4815_s13 = smov %s3917_s14  ;;  %s4816_s14 = smov %s3921_s15 }
 0x528   : > { %s4817_s15 = smov %s4255_s5  ;;  %s4818_s16 = smov %s3929_s17 }
 0x529   : > { %s4819_s17 = smov %s3933_s18  ;;  %s4820_s18 = smov %s4813_s26 }
 0x52a   : > { %s4821_s19 = smov %s3945_s21  ;;  %s4822_s20 = smov %s3949_s22 }
 0x52b   : > { %s4823_s21 = smov %s4826_s6  ;;  %27 = sbr.rel (!%p25_p8) target bundleno = 22 (0x16), region = 161 }
 0x52c   : > { %s4824_s22 = smov %s4814_s10 }
 0x532   :  { %2605 = vsyncpa [#allocation12], 1 }
 0x533   :  { %2607 = vsyncpa [#allocation12 + $0x1], 1 }
 0x534   :  { %2608 = vsyncpa [#allocation15], 1 }
 0x535   :  { %2609 = vsyncpa [#allocation18], 1 }
 0x536   :  { %2610 = vsyncpa [#allocation13], 1 }
 0x537   :  { %2612 = vsyncpa [#allocation13 + $0x1], 1 }

</bundles_post_ra>
